<compile_context>
chip_gen: v6e
topology: v6e:2x2x1
jax: 0.10.0
libtpu: 0.0.40
codegen_flags: <defaults>
</compile_context>

<pallas_src>
import functools

import jax
import jax.numpy as jnp
from jax.experimental import pallas as pl
from jax.experimental.pallas import tpu as pltpu


def _round_up(v, m):
    return -(-v // m) * m


@functools.lru_cache(maxsize=None)
def _vmem_limit():
    # Generation-dependent VMEM budget: leave headroom below physical VMEM.
    cap = 64 * 1024 * 1024
    try:
        cap = int(pltpu.get_tpu_info().vmem_capacity_bytes)
    except Exception:
        pass
    return int(min(cap - 16 * 1024 * 1024, int(cap * 0.85)))


# ---------------------------------------------------------------------------
# Fused (multi-operand) matmul + folded-BN affine + optional SiLU.
#   sum_p x_p:(M,K_p) @ w_p:(K_p,N)  ->  *scale + bias -> SiLU -> out:(M,N)
# N is always a multiple of 128 (padded channels) -> lane-dense stores.
# ---------------------------------------------------------------------------
def _mm_kernel(*args, n_pairs, act):
    o_ref = args[-1]
    s_ref = args[2 * n_pairs]
    b_ref = args[2 * n_pairs + 1]
    acc = jnp.zeros(o_ref.shape, jnp.float32)
    for p in range(n_pairs):
        acc = acc + jnp.dot(args[p][...], args[n_pairs + p][...],
                            preferred_element_type=jnp.float32)
    y = acc * s_ref[...] + b_ref[...]
    if act:                                   # SiLU
        y = y * jax.nn.sigmoid(y)
    o_ref[...] = y.astype(o_ref.dtype)


def matmul_bn_act(xs, ws, scale, bias, act, out_dtype=jnp.bfloat16):
    M = xs[0].shape[0]
    N = ws[0].shape[1]
    # Row tile: multiple of 16 (bf16 sublane packing).  Aim for >=2 M tiles so
    # v7x's second TensorCore has work; grow toward 512 for big M.
    if M >= 4096:
        tm = 512
    elif M >= 1024:
        tm = 256
    else:
        tm = min(256, max(16, 16 * ((M + 31) // 32)))
    Mp = _round_up(M, tm)
    if Mp != M:
        xs = [jnp.pad(x, ((0, Mp - M), (0, 0))) for x in xs]
    tn = 256 if (N % 256 == 0) else 128
    gm, gn = Mp // tm, N // tn
    n_pairs = len(xs)

    in_specs = []
    for x in xs:
        K = x.shape[1]
        in_specs.append(pl.BlockSpec((tm, K), lambda i, j: (i, 0)))
    for w in ws:
        K = w.shape[0]
        in_specs.append(pl.BlockSpec((K, tn), lambda i, j: (0, j)))
    in_specs += [pl.BlockSpec((1, tn), lambda i, j: (0, j)),
                 pl.BlockSpec((1, tn), lambda i, j: (0, j))]

    out = pl.pallas_call(
        functools.partial(_mm_kernel, n_pairs=n_pairs, act=act),
        out_shape=jax.ShapeDtypeStruct((Mp, N), out_dtype),
        grid=(gm, gn),
        in_specs=in_specs,
        out_specs=pl.BlockSpec((tm, tn), lambda i, j: (i, j)),
        compiler_params=pltpu.CompilerParams(
            dimension_semantics=("parallel", "parallel"),
            vmem_limit_bytes=_vmem_limit()),
    )(*[x.astype(jnp.bfloat16) for x in xs],
      *[w.astype(jnp.bfloat16) for w in ws],
      scale.reshape(1, N).astype(jnp.float32),
      bias.reshape(1, N).astype(jnp.float32))
    return out[:M] if Mp != M else out


# ---------------------------------------------------------------------------
# 3x3 conv (stride 1, padding 1) + folded-BN affine + SiLU.
# Input is clean padded-channel NHWC; the wrapper spatially zero-pads once and
# flattens rows with stride Wpr (multiple of 8).  The kernel builds an in-VMEM
# im2col slab (rows, 9*Cp) and does a single K=9*Cp MXU dot, then crops the
# garbage columns in VMEM before a lane-dense (Coutp>=128) store.
# TODO(synk): for large H*W on v7x, tile spatially (grid over row blocks with
#             a 2-row halo) to bound the im2col slab / accumulator in VMEM.
# ---------------------------------------------------------------------------
def _conv3x3_kernel(x_ref, w_ref, s_ref, b_ref, o_ref, *, H, W, Wpr, act):
    Cp = x_ref.shape[-1]
    Coutp = o_ref.shape[-1]
    Lo = H * Wpr
    x = x_ref[0]                                        # ((H+3)*Wpr, Cp) bf16
    cols = jnp.concatenate(
        [x[di * Wpr + dj: di * Wpr + dj + Lo, :]
         for di in range(3) for dj in range(3)], axis=-1)   # (Lo, 9*Cp)
    acc = jnp.dot(cols, w_ref[...], preferred_element_type=jnp.float32)
    y = acc * s_ref[...] + b_ref[...]
    if act:                                             # SiLU
        y = y * jax.nn.sigmoid(y)
    y = y.reshape(H, Wpr, Coutp)[:, :W, :]              # drop garbage columns
    o_ref[0] = y.astype(o_ref.dtype)


def conv3x3_bn_act(x, w, scale, bias, in_off, c_in, c_out, act=True):
    # x: (B, H, W, Cp) bf16 padded-channel NHWC; real input channels live at
    # [in_off, in_off + c_in).  w: torch layout (c_out, c_in, 3, 3).
    B, H, W, Cp = x.shape
    Coutp = _round_up(c_out, 128)
    Wpr = _round_up(W + 2, 8)
    xp = jnp.pad(x, ((0, 0), (1, 2), (1, Wpr - W - 1), (0, 0)))
    xf = xp.reshape(B, (H + 3) * Wpr, Cp)

    w9 = jnp.zeros((9, Cp, Coutp), jnp.float32)
    w9 = w9.at[:, in_off:in_off + c_in, :c_out].set(
        jnp.transpose(w.reshape(c_out, c_in, 9), (2, 1, 0)))
    w9 = w9.reshape(9 * Cp, Coutp).astype(jnp.bfloat16)
    sp = jnp.zeros((1, Coutp), jnp.float32).at[0, :c_out].set(scale)
    bp = jnp.zeros((1, Coutp), jnp.float32).at[0, :c_out].set(bias)

    return pl.pallas_call(
        functools.partial(_conv3x3_kernel, H=H, W=W, Wpr=Wpr, act=act),
        out_shape=jax.ShapeDtypeStruct((B, H, W, Coutp), jnp.bfloat16),
        grid=(B,),
        in_specs=[
            pl.BlockSpec((1, (H + 3) * Wpr, Cp), lambda b: (b, 0, 0)),
            pl.BlockSpec((9 * Cp, Coutp), lambda b: (0, 0)),
            pl.BlockSpec((1, Coutp), lambda b: (0, 0)),
            pl.BlockSpec((1, Coutp), lambda b: (0, 0)),
        ],
        out_specs=pl.BlockSpec((1, H, W, Coutp), lambda b: (b, 0, 0, 0)),
        compiler_params=pltpu.CompilerParams(
            dimension_semantics=("parallel",),
            vmem_limit_bytes=_vmem_limit()),
    )(xf, w9, sp, bp)


# ---------------------------------------------------------------------------
# Fused EMA attention kernel in padded-channel NHWC (one program per image).
# Channel axis = lanes (Cp = 128-padded); per-(group,channel) ops are per-lane,
# all reductions (over H, W) are off-lane, and the grouped channel mixes /
# group-softmax reweighting run on the MXU via block-diagonal matrices.
# TODO(synk): for large H*W on v7x, add a spatial grid axis (the f32
#             temporaries scale with H*W*Cp per program).
# ---------------------------------------------------------------------------
def _ema_kernel(x_ref, w1_ref, b1_ref, gnw_ref, gnb_ref, w3_ref, b3_ref,
                ones_ref, o_ref, *, H, W, Wpr, Cg):
    Cp = x_ref.shape[-1]
    Lo = H * Wpr
    xf = x_ref[0]                                      # ((H+3)*Wpr, Cp) bf16
    rows = xf.reshape(H + 3, Wpr, Cp)
    gx_bf = rows[1:H + 1, 1:W + 1, :]                  # (H, W, Cp) interior
    gx = gx_bf.astype(jnp.float32)

    b1 = b1_ref[...]                                   # (1, Cp) f32
    gnw = gnw_ref[...]
    gnb = gnb_ref[...]
    b3 = b3_ref[...]

    # --- directional pools -------------------------------------------------
    xh = jnp.mean(gx, axis=1)                          # (H, Cp)
    xw = jnp.mean(gx, axis=0)                          # (W, Cp)

    # --- shared grouped 1x1 conv (block-diagonal channel mix on the MXU) ---
    ch = jnp.dot(xh.astype(jnp.bfloat16), w1_ref[...],
                 preferred_element_type=jnp.float32) + b1    # (H, Cp)
    cw = jnp.dot(xw.astype(jnp.bfloat16), w1_ref[...],
                 preferred_element_type=jnp.float32) + b1    # (W, Cp)

    # --- modulate + GroupNorm (num_groups == channels -> per-channel) ------
    mod = gx * jax.nn.sigmoid(ch)[:, None, :] * jax.nn.sigmoid(cw)[None, :, :]
    mu = jnp.mean(mod, axis=(0, 1), keepdims=True)
    d = mod - mu
    var = jnp.mean(d * d, axis=(0, 1), keepdims=True)
    x1 = d * jax.lax.rsqrt(var + 1e-5) * gnw[None] + gnb[None]

    # --- grouped 3x3 conv branch: 9 shifted taps, each a K=Cp MXU matmul ----
    x2f = jnp.zeros((Lo, Cp), jnp.float32) + b3
    for di in range(3):
        for dj in range(3):
            off = di * Wpr + dj
            x2f = x2f + jnp.dot(xf[off:off + Lo, :], w3_ref[di * 3 + dj],
                                preferred_element_type=jnp.float32)
    x2 = x2f.reshape(H, Wpr, Cp)[:, :W, :]             # (H, W, Cp)

    # --- per-group channel softmax of globally pooled branches -------------
    a1 = jnp.mean(x1.reshape(H * W, Cp), axis=0, keepdims=True)   # (1, Cp)
    a2 = jnp.mean(x2.reshape(H * W, Cp), axis=0, keepdims=True)
    if Cg == 1:
        s1 = jnp.ones_like(a1)                         # softmax over 1 elem
        s2 = jnp.ones_like(a2)
    else:
        e1 = jnp.exp(a1 - jnp.max(a1))
        e2 = jnp.exp(a2 - jnp.max(a2))
        gs1 = jnp.dot(e1.astype(jnp.bfloat16), ones_ref[...],
                      preferred_element_type=jnp.float32)
        gs2 = jnp.dot(e2.astype(jnp.bfloat16), ones_ref[...],
                      preferred_element_type=jnp.float32)
        s1 = e1 / gs1
        s2 = e2 / gs2

    # --- spatial weights = s1 . x2 + s2 . x1, summed within each group -----
    wpc = s1[None] * x2 + s2[None] * x1                # (H, W, Cp)
    if Cg == 1:
        wsum = wpc
    else:
        wsum = jnp.dot(wpc.reshape(H * W, Cp).astype(jnp.bfloat16),
                       ones_ref[...],
                       preferred_element_type=jnp.float32).reshape(H, W, Cp)

    o_ref[0] = (gx * jax.nn.sigmoid(wsum)).astype(o_ref.dtype)


def ema_forward(x, p, c, factor=32):
    # x: (B, H, W, Cp) bf16, real channels [0, c), zero elsewhere.
    B, H, W, Cp = x.shape
    G = factor
    Cg = c // G
    Wpr = _round_up(W + 2, 8)
    xp = jnp.pad(x, ((0, 0), (1, 2), (1, Wpr - W - 1), (0, 0)))
    xf = xp.reshape(B, (H + 3) * Wpr, Cp)

    eyeG = jnp.eye(G, dtype=jnp.float32)
    w1 = p["c1_w"].reshape(Cg, Cg)
    w1bd = jnp.zeros((Cp, Cp), jnp.float32).at[:c, :c].set(
        jnp.kron(eyeG, w1.T)).astype(jnp.bfloat16)
    w3 = p["c3_w"].reshape(Cg, Cg, 9)
    w3bd = jnp.zeros((9, Cp, Cp), jnp.float32)
    for t in range(9):
        w3bd = w3bd.at[t, :c, :c].set(jnp.kron(eyeG, w3[:, :, t].T))
    w3bd = w3bd.astype(jnp.bfloat16)
    ones_bd = jnp.zeros((Cp, Cp), jnp.float32).at[:c, :c].set(
        jnp.kron(eyeG, jnp.ones((Cg, Cg), jnp.float32)))
    pad_diag = jnp.concatenate([jnp.zeros((c,), jnp.float32),
                                jnp.ones((Cp - c,), jnp.float32)])
    ones_bd = (ones_bd + jnp.diag(pad_diag)).astype(jnp.bfloat16)

    def tile_pad(v):  # (Cg,) shared per-channel param -> (1, Cp) lane vector
        return jnp.zeros((1, Cp), jnp.float32).at[0, :c].set(
            jnp.tile(v.reshape(-1), G))

    b1 = tile_pad(p["c1_b"])
    b3 = tile_pad(p["c3_b"])
    gnw = tile_pad(p["gn_w"])
    gnb = tile_pad(p["gn_b"])

    return pl.pallas_call(
        functools.partial(_ema_kernel, H=H, W=W, Wpr=Wpr, Cg=Cg),
        out_shape=jax.ShapeDtypeStruct((B, H, W, Cp), jnp.bfloat16),
        grid=(B,),
        in_specs=[
            pl.BlockSpec((1, (H + 3) * Wpr, Cp), lambda b: (b, 0, 0)),
            pl.BlockSpec((Cp, Cp), lambda b: (0, 0)),
            pl.BlockSpec((1, Cp), lambda b: (0, 0)),
            pl.BlockSpec((1, Cp), lambda b: (0, 0)),
            pl.BlockSpec((1, Cp), lambda b: (0, 0)),
            pl.BlockSpec((9, Cp, Cp), lambda b: (0, 0, 0)),
            pl.BlockSpec((1, Cp), lambda b: (0, 0)),
            pl.BlockSpec((Cp, Cp), lambda b: (0, 0)),
        ],
        out_specs=pl.BlockSpec((1, H, W, Cp), lambda b: (b, 0, 0, 0)),
        compiler_params=pltpu.CompilerParams(
            dimension_semantics=("parallel",),
            vmem_limit_bytes=_vmem_limit()),
    )(xf, w1bd, b1, gnw, gnb, w3bd, b3, ones_bd)


# ---------------------------------------------------------------------------
# Module-level forward (NHWC + padded channels internally, NCHW at boundary)
# ---------------------------------------------------------------------------
def c2f_ema_forward(x_nchw, p, factor=32):
    B, C1, H, W = x_nchw.shape
    twoc = p["cv1_w"].shape[0]
    c = twoc // 2
    c2 = p["cv2_w"].shape[0]
    Cin_p = _round_up(C1, 128)
    Cy_p = _round_up(twoc, 128)
    Cc_p = _round_up(c, 128)
    Cout_p = _round_up(c2, 128)
    M = B * H * W

    # NCHW -> NHWC, zero-pad channels to 128, bf16 (one boundary relayout).
    x = jnp.transpose(x_nchw, (0, 2, 3, 1))
    x = jnp.pad(x, ((0, 0), (0, 0), (0, 0), (0, Cin_p - C1))).astype(jnp.bfloat16)

    # cv1 (1x1): output channels [0:c) = y0, [c:2c) = y1, [2c:Cy_p) = 0.
    w1 = jnp.zeros((Cin_p, Cy_p), jnp.float32).at[:C1, :twoc].set(p["cv1_w"].T)
    s1 = jnp.zeros((Cy_p,), jnp.float32).at[:twoc].set(p["cv1_s"])
    b1 = jnp.zeros((Cy_p,), jnp.float32).at[:twoc].set(p["cv1_b"])
    y_full = matmul_bn_act([x.reshape(M, Cin_p)], [w1], s1, b1, act=True)
    y_full = y_full.reshape(B, H, W, Cy_p)

    # Bottleneck_EMA chain (shortcut=False): cv1(3x3) -> EMA -> cv2(3x3).
    # chunk(2,1) is realised via the weight row offset (in_off=c picks y1).
    last, last_off = y_full, c
    m_outs = []
    for bp in p["m"]:
        t = conv3x3_bn_act(last, bp["cv1_w"], bp["cv1_s"], bp["cv1_b"],
                           in_off=last_off, c_in=c, c_out=c, act=True)
        e = ema_forward(t, bp["ema"], c, factor=factor)
        mo = conv3x3_bn_act(e, bp["cv2_w"], bp["cv2_s"], bp["cv2_b"],
                            in_off=0, c_in=c, c_out=c, act=True)
        m_outs.append(mo)
        last, last_off = mo, 0

    # cv2 (1x1) over the logical concat [y0 | y1 | m_1 | ... | m_n]:
    # one fused multi-operand matmul, the concat never materialises.
    wcv2 = p["cv2_w"]                                  # (c2, (2+n)*c)
    xs = [y_full.reshape(M, Cy_p)]
    ws = [jnp.zeros((Cy_p, Cout_p), jnp.float32)
          .at[:twoc, :c2].set(wcv2[:, :twoc].T)]
    for idx, mo in enumerate(m_outs):
        k0 = twoc + idx * c
        xs.append(mo.reshape(M, Cc_p))
        ws.append(jnp.zeros((Cc_p, Cout_p), jnp.float32)
                  .at[:c, :c2].set(wcv2[:, k0:k0 + c].T))
    s2 = jnp.zeros((Cout_p,), jnp.float32).at[:c2].set(p["cv2_s"])
    b2 = jnp.zeros((Cout_p,), jnp.float32).at[:c2].set(p["cv2_b"])
    out = matmul_bn_act(xs, ws, s2, b2, act=True, out_dtype=jnp.float32)
    out = out.reshape(B, H, W, Cout_p)[..., :c2]
    return jnp.transpose(out, (0, 3, 1, 2))            # NHWC -> NCHW


# ---------------------------------------------------------------------------
# Deterministic synthetic parameters (BN folded to eval-mode scale/bias)
# ---------------------------------------------------------------------------
def init_params(key, c1, c2, n=1, factor=32):
    c = int(c2 * 0.5)
    cg = c // factor
    keys = iter(jax.random.split(key, 128))

    def nrm(shape, s=0.1):
        return s * jax.random.normal(next(keys), shape, jnp.float32)

    params = {
        "cv1_w": nrm((2 * c, c1)),
        "cv1_s": 1.0 + nrm((2 * c,)), "cv1_b": nrm((2 * c,)),
        "cv2_w": nrm((c2, (2 + n) * c)),
        "cv2_s": 1.0 + nrm((c2,)), "cv2_b": nrm((c2,)),
        "m": [],
    }
    for _ in range(n):
        params["m"].append({
            "cv1_w": nrm((c, c, 3, 3)),
            "cv1_s": 1.0 + nrm((c,)), "cv1_b": nrm((c,)),
            "cv2_w": nrm((c, c, 3, 3)),
            "cv2_s": 1.0 + nrm((c,)), "cv2_b": nrm((c,)),
            "ema": {
                "c1_w": nrm((cg, cg, 1, 1)), "c1_b": nrm((cg,)),
                "c3_w": nrm((cg, cg, 3, 3)), "c3_b": nrm((cg,)),
                "gn_w": 1.0 + nrm((cg,)), "gn_b": nrm((cg,)),
            },
        })
    return params


if __name__ == "__main__":
    # EMA uses factor=32, so c = c2*0.5 must be >= 32: c1=c2=64 -> c=32, Cg=1.
    B, C1, C2, H, W = 2, 64, 64, 8, 8
    n = 1

    key = jax.random.PRNGKey(0)
    kx, kp = jax.random.split(key)
    x = jax.random.normal(kx, (B, C1, H, W), jnp.float32)
    params = init_params(kp, C1, C2, n=n, factor=32)

    fwd = jax.jit(c2f_ema_forward)
    out = jax.block_until_ready(fwd(x, params))
    assert out.shape == (B, C2, H, W), out.shape
    assert bool(jnp.all(jnp.isfinite(out)))
    print("KERNEL_OK")
</pallas_src>

<mosaic_0001>
module attributes {stable_mosaic.version = 11 : i64} {
  func.func @_mm_kernel(%arg0: i32, %arg1: i32, %arg2: memref<64x128xbf16, #tpu.memory_space<vmem>>, %arg3: memref<128x128xbf16, #tpu.memory_space<vmem>>, %arg4: memref<1x128xf32, #tpu.memory_space<vmem>>, %arg5: memref<1x128xf32, #tpu.memory_space<vmem>>, %arg6: memref<64x128xbf16, #tpu.memory_space<vmem>>) attributes {dimension_semantics = [#tpu.dimension_semantics<parallel>, #tpu.dimension_semantics<parallel>], iteration_bounds = array<i64: 2, 1>, scalar_prefetch = 0 : i64, scratch_operands = 0 : i64, tpu.core_type = #tpu.core_type<tc>, window_params = [{transform_indices = @transform_0, window_bounds = array<i64: 64, 128>}, {transform_indices = @transform_1, window_bounds = array<i64: 128, 128>}, {transform_indices = @transform_2, window_bounds = array<i64: 1, 128>}, {transform_indices = @transform_3, window_bounds = array<i64: 1, 128>}, {transform_indices = @transform_4, window_bounds = array<i64: 64, 128>}]} {
    %cst = arith.constant 0.000000e+00 : f32
    %0 = vector.broadcast %cst : f32 to vector<64x128xf32>
    %c0 = arith.constant 0 : index
    %c0_0 = arith.constant 0 : index
    %1 = vector.load %arg2[%c0, %c0_0] : memref<64x128xbf16, #tpu.memory_space<vmem>>, vector<64x128xbf16>
    %c0_1 = arith.constant 0 : index
    %c0_2 = arith.constant 0 : index
    %2 = vector.load %arg3[%c0_1, %c0_2] : memref<128x128xbf16, #tpu.memory_space<vmem>>, vector<128x128xbf16>
    %cst_3 = arith.constant dense<0.000000e+00> : vector<64x128xf32>
    %3 = tpu.matmul %1, %2, %cst_3 {dimension_numbers = #tpu.dot_dimension_numbers<[1], [0], [0], [1], [0, 0, 1, 1], [], []>} : vector<64x128xbf16>, vector<128x128xbf16>, vector<64x128xf32> -> vector<64x128xf32>
    %4 = arith.addf %0, %3 : vector<64x128xf32>
    %c0_4 = arith.constant 0 : index
    %c0_5 = arith.constant 0 : index
    %5 = vector.load %arg4[%c0_4, %c0_5] : memref<1x128xf32, #tpu.memory_space<vmem>>, vector<1x128xf32>
    %6 = vector.broadcast %5 : vector<1x128xf32> to vector<64x128xf32>
    %7 = arith.mulf %4, %6 : vector<64x128xf32>
    %c0_6 = arith.constant 0 : index
    %c0_7 = arith.constant 0 : index
    %8 = vector.load %arg5[%c0_6, %c0_7] : memref<1x128xf32, #tpu.memory_space<vmem>>, vector<1x128xf32>
    %9 = vector.broadcast %8 : vector<1x128xf32> to vector<64x128xf32>
    %10 = arith.addf %7, %9 : vector<64x128xf32>
    %11 = arith.negf %10 : vector<64x128xf32>
    %12 = math.exp %11 : vector<64x128xf32>
    %cst_8 = arith.constant 1.000000e+00 : f32
    %13 = vector.broadcast %cst_8 : f32 to vector<64x128xf32>
    %14 = arith.addf %13, %12 : vector<64x128xf32>
    %15 = arith.divf %13, %14 : vector<64x128xf32>
    %16 = arith.mulf %10, %15 : vector<64x128xf32>
    %17 = arith.truncf %16 : vector<64x128xf32> to vector<64x128xbf16>
    %c0_9 = arith.constant 0 : index
    %c0_10 = arith.constant 0 : index
    %18 = vector.load %arg6[%c0_9, %c0_10] : memref<64x128xbf16, #tpu.memory_space<vmem>>, vector<64x128xbf16>
    tpu.vector_store %arg6[%c0_9, %c0_10], %17 {strides = array<i32>} : memref<64x128xbf16, #tpu.memory_space<vmem>>, vector<64x128xbf16>,
    return
  }
  func.func @transform_0(%arg0: i32, %arg1: i32) -> (i32, i32) {
    %c0_i32 = arith.constant 0 : i32
    %c0_i32_0 = arith.constant 0 : i32
    return %arg0, %c0_i32 : i32, i32
  }
  func.func @transform_1(%arg0: i32, %arg1: i32) -> (i32, i32) {
    %c0_i32 = arith.constant 0 : i32
    %c0_i32_0 = arith.constant 0 : i32
    return %c0_i32, %arg1 : i32, i32
  }
  func.func @transform_2(%arg0: i32, %arg1: i32) -> (i32, i32) {
    %c0_i32 = arith.constant 0 : i32
    %c0_i32_0 = arith.constant 0 : i32
    return %c0_i32, %arg1 : i32, i32
  }
  func.func @transform_3(%arg0: i32, %arg1: i32) -> (i32, i32) {
    %c0_i32 = arith.constant 0 : i32
    %c0_i32_0 = arith.constant 0 : i32
    return %c0_i32, %arg1 : i32, i32
  }
  func.func @transform_4(%arg0: i32, %arg1: i32) -> (i32, i32) {
    %c0_i32 = arith.constant 0 : i32
    return %arg0, %arg1 : i32, i32
  }
}

module attributes {stable_mosaic.version = 11 : i64} {
  func.func @_conv3x3_kernel(%arg0: i32, %arg1: memref<1x176x128xbf16, #tpu.memory_space<vmem>>, %arg2: memref<1152x128xbf16, #tpu.memory_space<vmem>>, %arg3: memref<1x128xf32, #tpu.memory_space<vmem>>, %arg4: memref<1x128xf32, #tpu.memory_space<vmem>>, %arg5: memref<1x8x8x128xbf16, #tpu.memory_space<vmem>>) attributes {dimension_semantics = [#tpu.dimension_semantics<parallel>], iteration_bounds = array<i64: 2>, scalar_prefetch = 0 : i64, scratch_operands = 0 : i64, tpu.core_type = #tpu.core_type<tc>, window_params = [{transform_indices = @transform_0, window_bounds = array<i64: 1, 176, 128>}, {pipeline_mode = #tpu.pipeline_mode<synchronous>, transform_indices = @transform_1, window_bounds = array<i64: 1152, 128>}, {pipeline_mode = #tpu.pipeline_mode<synchronous>, transform_indices = @transform_2, window_bounds = array<i64: 1, 128>}, {pipeline_mode = #tpu.pipeline_mode<synchronous>, transform_indices = @transform_3, window_bounds = array<i64: 1, 128>}, {transform_indices = @transform_4, window_bounds = array<i64: 1, 8, 8, 128>}]} {
    %c0 = arith.constant 0 : index
    %c0_0 = arith.constant 0 : index
    %c0_1 = arith.constant 0 : index
    %0 = vector.load %arg1[%c0, %c0_0, %c0_1] : memref<1x176x128xbf16, #tpu.memory_space<vmem>>, vector<1x176x128xbf16>
    %1 = vector.shape_cast %0 : vector<1x176x128xbf16> to vector<176x128xbf16>
    %2 = vector.extract_strided_slice %1 {offsets = [0, 0], sizes = [128, 128], strides = [1, 1]} : vector<176x128xbf16> to vector<128x128xbf16>
    %3 = vector.extract_strided_slice %1 {offsets = [1, 0], sizes = [128, 128], strides = [1, 1]} : vector<176x128xbf16> to vector<128x128xbf16>
    %4 = vector.extract_strided_slice %1 {offsets = [2, 0], sizes = [128, 128], strides = [1, 1]} : vector<176x128xbf16> to vector<128x128xbf16>
    %5 = vector.extract_strided_slice %1 {offsets = [16, 0], sizes = [128, 128], strides = [1, 1]} : vector<176x128xbf16> to vector<128x128xbf16>
    %6 = vector.extract_strided_slice %1 {offsets = [17, 0], sizes = [128, 128], strides = [1, 1]} : vector<176x128xbf16> to vector<128x128xbf16>
    %7 = vector.extract_strided_slice %1 {offsets = [18, 0], sizes = [128, 128], strides = [1, 1]} : vector<176x128xbf16> to vector<128x128xbf16>
    %8 = vector.extract_strided_slice %1 {offsets = [32, 0], sizes = [128, 128], strides = [1, 1]} : vector<176x128xbf16> to vector<128x128xbf16>
    %9 = vector.extract_strided_slice %1 {offsets = [33, 0], sizes = [128, 128], strides = [1, 1]} : vector<176x128xbf16> to vector<128x128xbf16>
    %10 = vector.extract_strided_slice %1 {offsets = [34, 0], sizes = [128, 128], strides = [1, 1]} : vector<176x128xbf16> to vector<128x128xbf16>
    %11 = tpu.concatenate %2, %3, %4, %5, %6, %7, %8, %9, %10 in 1 : vector<128x128xbf16>, vector<128x128xbf16>, vector<128x128xbf16>, vector<128x128xbf16>, vector<128x128xbf16>, vector<128x128xbf16>, vector<128x128xbf16>, vector<128x128xbf16>, vector<128x128xbf16> -> vector<128x1152xbf16>
    %c0_2 = arith.constant 0 : index
    %c0_3 = arith.constant 0 : index
    %12 = vector.load %arg2[%c0_2, %c0_3] : memref<1152x128xbf16, #tpu.memory_space<vmem>>, vector<1152x128xbf16>
    %cst = arith.constant dense<0.000000e+00> : vector<128x128xf32>
    %13 = tpu.matmul %11, %12, %cst {dimension_numbers = #tpu.dot_dimension_numbers<[1], [0], [0], [1], [0, 0, 1, 1], [], []>} : vector<128x1152xbf16>, vector<1152x128xbf16>, vector<128x128xf32> -> vector<128x128xf32>
    %c0_4 = arith.constant 0 : index
    %c0_5 = arith.constant 0 : index
    %14 = vector.load %arg3[%c0_4, %c0_5] : memref<1x128xf32, #tpu.memory_space<vmem>>, vector<1x128xf32>
    %15 = vector.broadcast %14 : vector<1x128xf32> to vector<128x128xf32>
    %16 = arith.mulf %13, %15 : vector<128x128xf32>
    %c0_6 = arith.constant 0 : index
    %c0_7 = arith.constant 0 : index
    %17 = vector.load %arg4[%c0_6, %c0_7] : memref<1x128xf32, #tpu.memory_space<vmem>>, vector<1x128xf32>
    %18 = vector.broadcast %17 : vector<1x128xf32> to vector<128x128xf32>
    %19 = arith.addf %16, %18 : vector<128x128xf32>
    %20 = arith.negf %19 : vector<128x128xf32>
    %21 = math.exp %20 : vector<128x128xf32>
    %cst_8 = arith.constant 1.000000e+00 : f32
    %22 = vector.broadcast %cst_8 : f32 to vector<128x128xf32>
    %23 = arith.addf %22, %21 : vector<128x128xf32>
    %24 = arith.divf %22, %23 : vector<128x128xf32>
    %25 = arith.mulf %19, %24 : vector<128x128xf32>
    %26 = vector.shape_cast %25 : vector<128x128xf32> to vector<8x16x128xf32>
    %27 = vector.extract_strided_slice %26 {offsets = [0, 0, 0], sizes = [8, 8, 128], strides = [1, 1, 1]} : vector<8x16x128xf32> to vector<8x8x128xf32>
    %28 = arith.truncf %27 : vector<8x8x128xf32> to vector<8x8x128xbf16>
    %c0_9 = arith.constant 0 : index
    %c0_10 = arith.constant 0 : index
    %c0_11 = arith.constant 0 : index
    %c0_12 = arith.constant 0 : index
    %29 = vector.load %arg5[%c0_9, %c0_10, %c0_11, %c0_12] : memref<1x8x8x128xbf16, #tpu.memory_space<vmem>>, vector<1x8x8x128xbf16>
    %30 = vector.shape_cast %29 : vector<1x8x8x128xbf16> to vector<8x8x128xbf16>
    %31 = vector.shape_cast %28 : vector<8x8x128xbf16> to vector<1x8x8x128xbf16>
    tpu.vector_store %arg5[%c0_9, %c0_10, %c0_11, %c0_12], %31 {strides = array<i32>} : memref<1x8x8x128xbf16, #tpu.memory_space<vmem>>, vector<1x8x8x128xbf16>,
    return
  }
  func.func @transform_0(%arg0: i32) -> (i32, i32, i32) {
    %c0_i32 = arith.constant 0 : i32
    %c0_i32_0 = arith.constant 0 : i32
    %c0_i32_1 = arith.constant 0 : i32
    return %arg0, %c0_i32, %c0_i32_0 : i32, i32, i32
  }
  func.func @transform_1(%arg0: i32) -> (i32, i32) {
    %c0_i32 = arith.constant 0 : i32
    %c0_i32_0 = arith.constant 0 : i32
    %c0_i32_1 = arith.constant 0 : i32
    return %c0_i32, %c0_i32_0 : i32, i32
  }
  func.func @transform_2(%arg0: i32) -> (i32, i32) {
    %c0_i32 = arith.constant 0 : i32
    %c0_i32_0 = arith.constant 0 : i32
    %c0_i32_1 = arith.constant 0 : i32
    return %c0_i32, %c0_i32_0 : i32, i32
  }
  func.func @transform_3(%arg0: i32) -> (i32, i32) {
    %c0_i32 = arith.constant 0 : i32
    %c0_i32_0 = arith.constant 0 : i32
    %c0_i32_1 = arith.constant 0 : i32
    return %c0_i32, %c0_i32_0 : i32, i32
  }
  func.func @transform_4(%arg0: i32) -> (i32, i32, i32, i32) {
    %c0_i32 = arith.constant 0 : i32
    %c0_i32_0 = arith.constant 0 : i32
    %c0_i32_1 = arith.constant 0 : i32
    %c0_i32_2 = arith.constant 0 : i32
    return %arg0, %c0_i32, %c0_i32_0, %c0_i32_1 : i32, i32, i32, i32
  }
}

module attributes {stable_mosaic.version = 11 : i64} {
  func.func @_ema_kernel(%arg0: i32, %arg1: memref<1x176x128xbf16, #tpu.memory_space<vmem>>, %arg2: memref<128x128xbf16, #tpu.memory_space<vmem>>, %arg3: memref<1x128xf32, #tpu.memory_space<vmem>>, %arg4: memref<1x128xf32, #tpu.memory_space<vmem>>, %arg5: memref<1x128xf32, #tpu.memory_space<vmem>>, %arg6: memref<9x128x128xbf16, #tpu.memory_space<vmem>>, %arg7: memref<1x128xf32, #tpu.memory_space<vmem>>, %arg8: memref<128x128xbf16, #tpu.memory_space<vmem>>, %arg9: memref<1x8x8x128xbf16, #tpu.memory_space<vmem>>) attributes {dimension_semantics = [#tpu.dimension_semantics<parallel>], iteration_bounds = array<i64: 2>, scalar_prefetch = 0 : i64, scratch_operands = 0 : i64, tpu.core_type = #tpu.core_type<tc>, window_params = [{transform_indices = @transform_0, window_bounds = array<i64: 1, 176, 128>}, {pipeline_mode = #tpu.pipeline_mode<synchronous>, transform_indices = @transform_1, window_bounds = array<i64: 128, 128>}, {pipeline_mode = #tpu.pipeline_mode<synchronous>, transform_indices = @transform_2, window_bounds = array<i64: 1, 128>}, {pipeline_mode = #tpu.pipeline_mode<synchronous>, transform_indices = @transform_3, window_bounds = array<i64: 1, 128>}, {pipeline_mode = #tpu.pipeline_mode<synchronous>, transform_indices = @transform_4, window_bounds = array<i64: 1, 128>}, {pipeline_mode = #tpu.pipeline_mode<synchronous>, transform_indices = @transform_5, window_bounds = array<i64: 9, 128, 128>}, {pipeline_mode = #tpu.pipeline_mode<synchronous>, transform_indices = @transform_6, window_bounds = array<i64: 1, 128>}, {pipeline_mode = #tpu.pipeline_mode<synchronous>, transform_indices = @transform_7, window_bounds = array<i64: 128, 128>}, {transform_indices = @transform_8, window_bounds = array<i64: 1, 8, 8, 128>}]} {
    %c0 = arith.constant 0 : index
    %c0_0 = arith.constant 0 : index
    %c0_1 = arith.constant 0 : index
    %0 = vector.load %arg1[%c0, %c0_0, %c0_1] : memref<1x176x128xbf16, #tpu.memory_space<vmem>>, vector<1x176x128xbf16>
    %1 = vector.shape_cast %0 : vector<1x176x128xbf16> to vector<176x128xbf16>
    %2 = vector.shape_cast %1 : vector<176x128xbf16> to vector<11x16x128xbf16>
    %3 = vector.extract_strided_slice %2 {offsets = [1, 1, 0], sizes = [8, 8, 128], strides = [1, 1, 1]} : vector<11x16x128xbf16> to vector<8x8x128xbf16>
    %4 = arith.extf %3 : vector<8x8x128xbf16> to vector<8x8x128xf32>
    %c0_2 = arith.constant 0 : index
    %c0_3 = arith.constant 0 : index
    %5 = vector.load %arg3[%c0_2, %c0_3] : memref<1x128xf32, #tpu.memory_space<vmem>>, vector<1x128xf32>
    %c0_4 = arith.constant 0 : index
    %c0_5 = arith.constant 0 : index
    %6 = vector.load %arg4[%c0_4, %c0_5] : memref<1x128xf32, #tpu.memory_space<vmem>>, vector<1x128xf32>
    %c0_6 = arith.constant 0 : index
    %c0_7 = arith.constant 0 : index
    %7 = vector.load %arg5[%c0_6, %c0_7] : memref<1x128xf32, #tpu.memory_space<vmem>>, vector<1x128xf32>
    %c0_8 = arith.constant 0 : index
    %c0_9 = arith.constant 0 : index
    %8 = vector.load %arg7[%c0_8, %c0_9] : memref<1x128xf32, #tpu.memory_space<vmem>>, vector<1x128xf32>
    %cst = arith.constant dense<0.000000e+00> : vector<8x128xf32>
    %9 = vector.multi_reduction <add>, %4, %cst [1] : vector<8x8x128xf32> to vector<8x128xf32>
    %cst_10 = arith.constant 8.000000e+00 : f32
    %10 = vector.broadcast %cst_10 : f32 to vector<8x128xf32>
    %11 = arith.divf %9, %10 : vector<8x128xf32>
    %cst_11 = arith.constant dense<0.000000e+00> : vector<8x128xf32>
    %12 = vector.multi_reduction <add>, %4, %cst_11 [0] : vector<8x8x128xf32> to vector<8x128xf32>
    %cst_12 = arith.constant 8.000000e+00 : f32
    %13 = vector.broadcast %cst_12 : f32 to vector<8x128xf32>
    %14 = arith.divf %12, %13 : vector<8x128xf32>
    %15 = arith.truncf %11 : vector<8x128xf32> to vector<8x128xbf16>
    %c0_13 = arith.constant 0 : index
    %c0_14 = arith.constant 0 : index
    %16 = vector.load %arg2[%c0_13, %c0_14] : memref<128x128xbf16, #tpu.memory_space<vmem>>, vector<128x128xbf16>
    %cst_15 = arith.constant dense<0.000000e+00> : vector<8x128xf32>
    %17 = tpu.matmul %15, %16, %cst_15 {dimension_numbers = #tpu.dot_dimension_numbers<[1], [0], [0], [1], [0, 0, 1, 1], [], []>} : vector<8x128xbf16>, vector<128x128xbf16>, vector<8x128xf32> -> vector<8x128xf32>
    %18 = vector.broadcast %5 : vector<1x128xf32> to vector<8x128xf32>
    %19 = arith.addf %17, %18 : vector<8x128xf32>
    %20 = arith.truncf %14 : vector<8x128xf32> to vector<8x128xbf16>
    %c0_16 = arith.constant 0 : index
    %c0_17 = arith.constant 0 : index
    %21 = vector.load %arg2[%c0_16, %c0_17] : memref<128x128xbf16, #tpu.memory_space<vmem>>, vector<128x128xbf16>
    %cst_18 = arith.constant dense<0.000000e+00> : vector<8x128xf32>
    %22 = tpu.matmul %20, %21, %cst_18 {dimension_numbers = #tpu.dot_dimension_numbers<[1], [0], [0], [1], [0, 0, 1, 1], [], []>} : vector<8x128xbf16>, vector<128x128xbf16>, vector<8x128xf32> -> vector<8x128xf32>
    %23 = vector.broadcast %5 : vector<1x128xf32> to vector<8x128xf32>
    %24 = arith.addf %22, %23 : vector<8x128xf32>
    %25 = arith.negf %19 : vector<8x128xf32>
    %26 = math.exp %25 : vector<8x128xf32>
    %cst_19 = arith.constant 1.000000e+00 : f32
    %27 = vector.broadcast %cst_19 : f32 to vector<8x128xf32>
    %28 = arith.addf %27, %26 : vector<8x128xf32>
    %29 = arith.divf %27, %28 : vector<8x128xf32>
    %30 = vector.shape_cast %29 : vector<8x128xf32> to vector<8x1x128xf32>
    %31 = vector.broadcast %30 : vector<8x1x128xf32> to vector<8x8x128xf32>
    %32 = arith.mulf %4, %31 : vector<8x8x128xf32>
    %33 = arith.negf %24 : vector<8x128xf32>
    %34 = math.exp %33 : vector<8x128xf32>
    %cst_20 = arith.constant 1.000000e+00 : f32
    %35 = vector.broadcast %cst_20 : f32 to vector<8x128xf32>
    %36 = arith.addf %35, %34 : vector<8x128xf32>
    %37 = arith.divf %35, %36 : vector<8x128xf32>
    %38 = vector.shape_cast %37 : vector<8x128xf32> to vector<1x8x128xf32>
    %39 = vector.broadcast %38 : vector<1x8x128xf32> to vector<8x8x128xf32>
    %40 = arith.mulf %32, %39 : vector<8x8x128xf32>
    %cst_21 = arith.constant dense<0.000000e+00> : vector<128xf32>
    %41 = vector.multi_reduction <add>, %40, %cst_21 [0, 1] : vector<8x8x128xf32> to vector<128xf32>
    %42 = vector.shape_cast %41 : vector<128xf32> to vector<1x1x128xf32>
    %cst_22 = arith.constant 6.400000e+01 : f32
    %43 = vector.broadcast %cst_22 : f32 to vector<1x1x128xf32>
    %44 = arith.divf %42, %43 : vector<1x1x128xf32>
    %45 = vector.broadcast %44 : vector<1x1x128xf32> to vector<8x8x128xf32>
    %46 = arith.subf %40, %45 : vector<8x8x128xf32>
    %47 = arith.mulf %46, %46 : vector<8x8x128xf32>
    %cst_23 = arith.constant dense<0.000000e+00> : vector<128xf32>
    %48 = vector.multi_reduction <add>, %47, %cst_23 [0, 1] : vector<8x8x128xf32> to vector<128xf32>
    %49 = vector.shape_cast %48 : vector<128xf32> to vector<1x1x128xf32>
    %cst_24 = arith.constant 6.400000e+01 : f32
    %50 = vector.broadcast %cst_24 : f32 to vector<1x1x128xf32>
    %51 = arith.divf %49, %50 : vector<1x1x128xf32>
    %cst_25 = arith.constant 9.99999974E-6 : f32
    %52 = vector.broadcast %cst_25 : f32 to vector<1x1x128xf32>
    %53 = arith.addf %51, %52 : vector<1x1x128xf32>
    %54 = math.rsqrt %53 : vector<1x1x128xf32>
    %55 = vector.broadcast %54 : vector<1x1x128xf32> to vector<8x8x128xf32>
    %56 = arith.mulf %46, %55 : vector<8x8x128xf32>
    %57 = vector.shape_cast %6 : vector<1x128xf32> to vector<1x1x128xf32>
    %58 = vector.broadcast %57 : vector<1x1x128xf32> to vector<8x8x128xf32>
    %59 = arith.mulf %56, %58 : vector<8x8x128xf32>
    %60 = vector.shape_cast %7 : vector<1x128xf32> to vector<1x1x128xf32>
    %61 = vector.broadcast %60 : vector<1x1x128xf32> to vector<8x8x128xf32>
    %62 = arith.addf %59, %61 : vector<8x8x128xf32>
    %cst_26 = arith.constant 0.000000e+00 : f32
    %63 = vector.broadcast %cst_26 : f32 to vector<128x128xf32>
    %64 = vector.broadcast %8 : vector<1x128xf32> to vector<128x128xf32>
    %65 = arith.addf %63, %64 : vector<128x128xf32>
    %66 = vector.extract_strided_slice %1 {offsets = [0, 0], sizes = [128, 128], strides = [1, 1]} : vector<176x128xbf16> to vector<128x128xbf16>
    %c0_27 = arith.constant 0 : index
    %c0_28 = arith.constant 0 : index
    %c0_29 = arith.constant 0 : index
    %67 = vector.load %arg6[%c0_27, %c0_28, %c0_29] : memref<9x128x128xbf16, #tpu.memory_space<vmem>>, vector<1x128x128xbf16>
    %68 = vector.shape_cast %67 : vector<1x128x128xbf16> to vector<128x128xbf16>
    %cst_30 = arith.constant dense<0.000000e+00> : vector<128x128xf32>
    %69 = tpu.matmul %66, %68, %cst_30 {dimension_numbers = #tpu.dot_dimension_numbers<[1], [0], [0], [1], [0, 0, 1, 1], [], []>} : vector<128x128xbf16>, vector<128x128xbf16>, vector<128x128xf32> -> vector<128x128xf32>
    %70 = arith.addf %65, %69 : vector<128x128xf32>
    %71 = vector.extract_strided_slice %1 {offsets = [1, 0], sizes = [128, 128], strides = [1, 1]} : vector<176x128xbf16> to vector<128x128xbf16>
    %c1 = arith.constant 1 : index
    %c0_31 = arith.constant 0 : index
    %c0_32 = arith.constant 0 : index
    %72 = vector.load %arg6[%c1, %c0_31, %c0_32] : memref<9x128x128xbf16, #tpu.memory_space<vmem>>, vector<1x128x128xbf16>
    %73 = vector.shape_cast %72 : vector<1x128x128xbf16> to vector<128x128xbf16>
    %cst_33 = arith.constant dense<0.000000e+00> : vector<128x128xf32>
    %74 = tpu.matmul %71, %73, %cst_33 {dimension_numbers = #tpu.dot_dimension_numbers<[1], [0], [0], [1], [0, 0, 1, 1], [], []>} : vector<128x128xbf16>, vector<128x128xbf16>, vector<128x128xf32> -> vector<128x128xf32>
    %75 = arith.addf %70, %74 : vector<128x128xf32>
    %76 = vector.extract_strided_slice %1 {offsets = [2, 0], sizes = [128, 128], strides = [1, 1]} : vector<176x128xbf16> to vector<128x128xbf16>
    %c2 = arith.constant 2 : index
    %c0_34 = arith.constant 0 : index
    %c0_35 = arith.constant 0 : index
    %77 = vector.load %arg6[%c2, %c0_34, %c0_35] : memref<9x128x128xbf16, #tpu.memory_space<vmem>>, vector<1x128x128xbf16>
    %78 = vector.shape_cast %77 : vector<1x128x128xbf16> to vector<128x128xbf16>
    %cst_36 = arith.constant dense<0.000000e+00> : vector<128x128xf32>
    %79 = tpu.matmul %76, %78, %cst_36 {dimension_numbers = #tpu.dot_dimension_numbers<[1], [0], [0], [1], [0, 0, 1, 1], [], []>} : vector<128x128xbf16>, vector<128x128xbf16>, vector<128x128xf32> -> vector<128x128xf32>
    %80 = arith.addf %75, %79 : vector<128x128xf32>
    %81 = vector.extract_strided_slice %1 {offsets = [16, 0], sizes = [128, 128], strides = [1, 1]} : vector<176x128xbf16> to vector<128x128xbf16>
    %c3 = arith.constant 3 : index
    %c0_37 = arith.constant 0 : index
    %c0_38 = arith.constant 0 : index
    %82 = vector.load %arg6[%c3, %c0_37, %c0_38] : memref<9x128x128xbf16, #tpu.memory_space<vmem>>, vector<1x128x128xbf16>
    %83 = vector.shape_cast %82 : vector<1x128x128xbf16> to vector<128x128xbf16>
    %cst_39 = arith.constant dense<0.000000e+00> : vector<128x128xf32>
    %84 = tpu.matmul %81, %83, %cst_39 {dimension_numbers = #tpu.dot_dimension_numbers<[1], [0], [0], [1], [0, 0, 1, 1], [], []>} : vector<128x128xbf16>, vector<128x128xbf16>, vector<128x128xf32> -> vector<128x128xf32>
    %85 = arith.addf %80, %84 : vector<128x128xf32>
    %86 = vector.extract_strided_slice %1 {offsets = [17, 0], sizes = [128, 128], strides = [1, 1]} : vector<176x128xbf16> to vector<128x128xbf16>
    %c4 = arith.constant 4 : index
    %c0_40 = arith.constant 0 : index
    %c0_41 = arith.constant 0 : index
    %87 = vector.load %arg6[%c4, %c0_40, %c0_41] : memref<9x128x128xbf16, #tpu.memory_space<vmem>>, vector<1x128x128xbf16>
    %88 = vector.shape_cast %87 : vector<1x128x128xbf16> to vector<128x128xbf16>
    %cst_42 = arith.constant dense<0.000000e+00> : vector<128x128xf32>
    %89 = tpu.matmul %86, %88, %cst_42 {dimension_numbers = #tpu.dot_dimension_numbers<[1], [0], [0], [1], [0, 0, 1, 1], [], []>} : vector<128x128xbf16>, vector<128x128xbf16>, vector<128x128xf32> -> vector<128x128xf32>
    %90 = arith.addf %85, %89 : vector<128x128xf32>
    %91 = vector.extract_strided_slice %1 {offsets = [18, 0], sizes = [128, 128], strides = [1, 1]} : vector<176x128xbf16> to vector<128x128xbf16>
    %c5 = arith.constant 5 : index
    %c0_43 = arith.constant 0 : index
    %c0_44 = arith.constant 0 : index
    %92 = vector.load %arg6[%c5, %c0_43, %c0_44] : memref<9x128x128xbf16, #tpu.memory_space<vmem>>, vector<1x128x128xbf16>
    %93 = vector.shape_cast %92 : vector<1x128x128xbf16> to vector<128x128xbf16>
    %cst_45 = arith.constant dense<0.000000e+00> : vector<128x128xf32>
    %94 = tpu.matmul %91, %93, %cst_45 {dimension_numbers = #tpu.dot_dimension_numbers<[1], [0], [0], [1], [0, 0, 1, 1], [], []>} : vector<128x128xbf16>, vector<128x128xbf16>, vector<128x128xf32> -> vector<128x128xf32>
    %95 = arith.addf %90, %94 : vector<128x128xf32>
    %96 = vector.extract_strided_slice %1 {offsets = [32, 0], sizes = [128, 128], strides = [1, 1]} : vector<176x128xbf16> to vector<128x128xbf16>
    %c6 = arith.constant 6 : index
    %c0_46 = arith.constant 0 : index
    %c0_47 = arith.constant 0 : index
    %97 = vector.load %arg6[%c6, %c0_46, %c0_47] : memref<9x128x128xbf16, #tpu.memory_space<vmem>>, vector<1x128x128xbf16>
    %98 = vector.shape_cast %97 : vector<1x128x128xbf16> to vector<128x128xbf16>
    %cst_48 = arith.constant dense<0.000000e+00> : vector<128x128xf32>
    %99 = tpu.matmul %96, %98, %cst_48 {dimension_numbers = #tpu.dot_dimension_numbers<[1], [0], [0], [1], [0, 0, 1, 1], [], []>} : vector<128x128xbf16>, vector<128x128xbf16>, vector<128x128xf32> -> vector<128x128xf32>
    %100 = arith.addf %95, %99 : vector<128x128xf32>
    %101 = vector.extract_strided_slice %1 {offsets = [33, 0], sizes = [128, 128], strides = [1, 1]} : vector<176x128xbf16> to vector<128x128xbf16>
    %c7 = arith.constant 7 : index
    %c0_49 = arith.constant 0 : index
    %c0_50 = arith.constant 0 : index
    %102 = vector.load %arg6[%c7, %c0_49, %c0_50] : memref<9x128x128xbf16, #tpu.memory_space<vmem>>, vector<1x128x128xbf16>
    %103 = vector.shape_cast %102 : vector<1x128x128xbf16> to vector<128x128xbf16>
    %cst_51 = arith.constant dense<0.000000e+00> : vector<128x128xf32>
    %104 = tpu.matmul %101, %103, %cst_51 {dimension_numbers = #tpu.dot_dimension_numbers<[1], [0], [0], [1], [0, 0, 1, 1], [], []>} : vector<128x128xbf16>, vector<128x128xbf16>, vector<128x128xf32> -> vector<128x128xf32>
    %105 = arith.addf %100, %104 : vector<128x128xf32>
    %106 = vector.extract_strided_slice %1 {offsets = [34, 0], sizes = [128, 128], strides = [1, 1]} : vector<176x128xbf16> to vector<128x128xbf16>
    %c8 = arith.constant 8 : index
    %c0_52 = arith.constant 0 : index
    %c0_53 = arith.constant 0 : index
    %107 = vector.load %arg6[%c8, %c0_52, %c0_53] : memref<9x128x128xbf16, #tpu.memory_space<vmem>>, vector<1x128x128xbf16>
    %108 = vector.shape_cast %107 : vector<1x128x128xbf16> to vector<128x128xbf16>
    %cst_54 = arith.constant dense<0.000000e+00> : vector<128x128xf32>
    %109 = tpu.matmul %106, %108, %cst_54 {dimension_numbers = #tpu.dot_dimension_numbers<[1], [0], [0], [1], [0, 0, 1, 1], [], []>} : vector<128x128xbf16>, vector<128x128xbf16>, vector<128x128xf32> -> vector<128x128xf32>
    %110 = arith.addf %105, %109 : vector<128x128xf32>
    %111 = vector.shape_cast %110 : vector<128x128xf32> to vector<8x16x128xf32>
    %112 = vector.extract_strided_slice %111 {offsets = [0, 0, 0], sizes = [8, 8, 128], strides = [1, 1, 1]} : vector<8x16x128xf32> to vector<8x8x128xf32>
    %cst_55 = arith.constant 1.000000e+00 : f32
    %113 = vector.broadcast %cst_55 : f32 to vector<1x128xf32>
    %cst_56 = arith.constant 1.000000e+00 : f32
    %114 = vector.broadcast %cst_56 : f32 to vector<1x128xf32>
    %115 = vector.shape_cast %113 : vector<1x128xf32> to vector<1x1x128xf32>
    %116 = vector.broadcast %115 : vector<1x1x128xf32> to vector<8x8x128xf32>
    %117 = arith.mulf %116, %112 : vector<8x8x128xf32>
    %118 = vector.shape_cast %114 : vector<1x128xf32> to vector<1x1x128xf32>
    %119 = vector.broadcast %118 : vector<1x1x128xf32> to vector<8x8x128xf32>
    %120 = arith.mulf %119, %62 : vector<8x8x128xf32>
    %121 = arith.addf %117, %120 : vector<8x8x128xf32>
    %122 = arith.negf %121 : vector<8x8x128xf32>
    %123 = math.exp %122 : vector<8x8x128xf32>
    %cst_57 = arith.constant 1.000000e+00 : f32
    %124 = vector.broadcast %cst_57 : f32 to vector<8x8x128xf32>
    %125 = arith.addf %124, %123 : vector<8x8x128xf32>
    %126 = arith.divf %124, %125 : vector<8x8x128xf32>
    %127 = arith.mulf %4, %126 : vector<8x8x128xf32>
    %128 = arith.truncf %127 : vector<8x8x128xf32> to vector<8x8x128xbf16>
    %c0_58 = arith.constant 0 : index
    %c0_59 = arith.constant 0 : index
    %c0_60 = arith.constant 0 : index
    %c0_61 = arith.constant 0 : index
    %129 = vector.load %arg9[%c0_58, %c0_59, %c0_60, %c0_61] : memref<1x8x8x128xbf16, #tpu.memory_space<vmem>>, vector<1x8x8x128xbf16>
    %130 = vector.shape_cast %129 : vector<1x8x8x128xbf16> to vector<8x8x128xbf16>
    %131 = vector.shape_cast %128 : vector<8x8x128xbf16> to vector<1x8x8x128xbf16>
    tpu.vector_store %arg9[%c0_58, %c0_59, %c0_60, %c0_61], %131 {strides = array<i32>} : memref<1x8x8x128xbf16, #tpu.memory_space<vmem>>, vector<1x8x8x128xbf16>,
    return
  }
  func.func @transform_0(%arg0: i32) -> (i32, i32, i32) {
    %c0_i32 = arith.constant 0 : i32
    %c0_i32_0 = arith.constant 0 : i32
    %c0_i32_1 = arith.constant 0 : i32
    return %arg0, %c0_i32, %c0_i32_0 : i32, i32, i32
  }
  func.func @transform_1(%arg0: i32) -> (i32, i32) {
    %c0_i32 = arith.constant 0 : i32
    %c0_i32_0 = arith.constant 0 : i32
    %c0_i32_1 = arith.constant 0 : i32
    return %c0_i32, %c0_i32_0 : i32, i32
  }
  func.func @transform_2(%arg0: i32) -> (i32, i32) {
    %c0_i32 = arith.constant 0 : i32
    %c0_i32_0 = arith.constant 0 : i32
    %c0_i32_1 = arith.constant 0 : i32
    return %c0_i32, %c0_i32_0 : i32, i32
  }
  func.func @transform_3(%arg0: i32) -> (i32, i32) {
    %c0_i32 = arith.constant 0 : i32
    %c0_i32_0 = arith.constant 0 : i32
    %c0_i32_1 = arith.constant 0 : i32
    return %c0_i32, %c0_i32_0 : i32, i32
  }
  func.func @transform_4(%arg0: i32) -> (i32, i32) {
    %c0_i32 = arith.constant 0 : i32
    %c0_i32_0 = arith.constant 0 : i32
    %c0_i32_1 = arith.constant 0 : i32
    return %c0_i32, %c0_i32_0 : i32, i32
  }
  func.func @transform_5(%arg0: i32) -> (i32, i32, i32) {
    %c0_i32 = arith.constant 0 : i32
    %c0_i32_0 = arith.constant 0 : i32
    %c0_i32_1 = arith.constant 0 : i32
    %c0_i32_2 = arith.constant 0 : i32
    return %c0_i32, %c0_i32_0, %c0_i32_1 : i32, i32, i32
  }
  func.func @transform_6(%arg0: i32) -> (i32, i32) {
    %c0_i32 = arith.constant 0 : i32
    %c0_i32_0 = arith.constant 0 : i32
    %c0_i32_1 = arith.constant 0 : i32
    return %c0_i32, %c0_i32_0 : i32, i32
  }
  func.func @transform_7(%arg0: i32) -> (i32, i32) {
    %c0_i32 = arith.constant 0 : i32
    %c0_i32_0 = arith.constant 0 : i32
    %c0_i32_1 = arith.constant 0 : i32
    return %c0_i32, %c0_i32_0 : i32, i32
  }
  func.func @transform_8(%arg0: i32) -> (i32, i32, i32, i32) {
    %c0_i32 = arith.constant 0 : i32
    %c0_i32_0 = arith.constant 0 : i32
    %c0_i32_1 = arith.constant 0 : i32
    %c0_i32_2 = arith.constant 0 : i32
    return %arg0, %c0_i32, %c0_i32_0, %c0_i32_1 : i32, i32, i32, i32
  }
}

module attributes {stable_mosaic.version = 11 : i64} {
  func.func @_mm_kernel(%arg0: i32, %arg1: i32, %arg2: memref<64x128xbf16, #tpu.memory_space<vmem>>, %arg3: memref<64x128xbf16, #tpu.memory_space<vmem>>, %arg4: memref<128x128xbf16, #tpu.memory_space<vmem>>, %arg5: memref<128x128xbf16, #tpu.memory_space<vmem>>, %arg6: memref<1x128xf32, #tpu.memory_space<vmem>>, %arg7: memref<1x128xf32, #tpu.memory_space<vmem>>, %arg8: memref<64x128xf32, #tpu.memory_space<vmem>>) attributes {dimension_semantics = [#tpu.dimension_semantics<parallel>, #tpu.dimension_semantics<parallel>], iteration_bounds = array<i64: 2, 1>, scalar_prefetch = 0 : i64, scratch_operands = 0 : i64, tpu.core_type = #tpu.core_type<tc>, window_params = [{transform_indices = @transform_0, window_bounds = array<i64: 64, 128>}, {transform_indices = @transform_1, window_bounds = array<i64: 64, 128>}, {transform_indices = @transform_2, window_bounds = array<i64: 128, 128>}, {transform_indices = @transform_3, window_bounds = array<i64: 128, 128>}, {transform_indices = @transform_4, window_bounds = array<i64: 1, 128>}, {transform_indices = @transform_5, window_bounds = array<i64: 1, 128>}, {transform_indices = @transform_6, window_bounds = array<i64: 64, 128>}]} {
    %cst = arith.constant 0.000000e+00 : f32
    %0 = vector.broadcast %cst : f32 to vector<64x128xf32>
    %c0 = arith.constant 0 : index
    %c0_0 = arith.constant 0 : index
    %1 = vector.load %arg2[%c0, %c0_0] : memref<64x128xbf16, #tpu.memory_space<vmem>>, vector<64x128xbf16>
    %c0_1 = arith.constant 0 : index
    %c0_2 = arith.constant 0 : index
    %2 = vector.load %arg4[%c0_1, %c0_2] : memref<128x128xbf16, #tpu.memory_space<vmem>>, vector<128x128xbf16>
    %cst_3 = arith.constant dense<0.000000e+00> : vector<64x128xf32>
    %3 = tpu.matmul %1, %2, %cst_3 {dimension_numbers = #tpu.dot_dimension_numbers<[1], [0], [0], [1], [0, 0, 1, 1], [], []>} : vector<64x128xbf16>, vector<128x128xbf16>, vector<64x128xf32> -> vector<64x128xf32>
    %4 = arith.addf %0, %3 : vector<64x128xf32>
    %c0_4 = arith.constant 0 : index
    %c0_5 = arith.constant 0 : index
    %5 = vector.load %arg3[%c0_4, %c0_5] : memref<64x128xbf16, #tpu.memory_space<vmem>>, vector<64x128xbf16>
    %c0_6 = arith.constant 0 : index
    %c0_7 = arith.constant 0 : index
    %6 = vector.load %arg5[%c0_6, %c0_7] : memref<128x128xbf16, #tpu.memory_space<vmem>>, vector<128x128xbf16>
    %cst_8 = arith.constant dense<0.000000e+00> : vector<64x128xf32>
    %7 = tpu.matmul %5, %6, %cst_8 {dimension_numbers = #tpu.dot_dimension_numbers<[1], [0], [0], [1], [0, 0, 1, 1], [], []>} : vector<64x128xbf16>, vector<128x128xbf16>, vector<64x128xf32> -> vector<64x128xf32>
    %8 = arith.addf %4, %7 : vector<64x128xf32>
    %c0_9 = arith.constant 0 : index
    %c0_10 = arith.constant 0 : index
    %9 = vector.load %arg6[%c0_9, %c0_10] : memref<1x128xf32, #tpu.memory_space<vmem>>, vector<1x128xf32>
    %10 = vector.broadcast %9 : vector<1x128xf32> to vector<64x128xf32>
    %11 = arith.mulf %8, %10 : vector<64x128xf32>
    %c0_11 = arith.constant 0 : index
    %c0_12 = arith.constant 0 : index
    %12 = vector.load %arg7[%c0_11, %c0_12] : memref<1x128xf32, #tpu.memory_space<vmem>>, vector<1x128xf32>
    %13 = vector.broadcast %12 : vector<1x128xf32> to vector<64x128xf32>
    %14 = arith.addf %11, %13 : vector<64x128xf32>
    %15 = arith.negf %14 : vector<64x128xf32>
    %16 = math.exp %15 : vector<64x128xf32>
    %cst_13 = arith.constant 1.000000e+00 : f32
    %17 = vector.broadcast %cst_13 : f32 to vector<64x128xf32>
    %18 = arith.addf %17, %16 : vector<64x128xf32>
    %19 = arith.divf %17, %18 : vector<64x128xf32>
    %20 = arith.mulf %14, %19 : vector<64x128xf32>
    %c0_14 = arith.constant 0 : index
    %c0_15 = arith.constant 0 : index
    %21 = vector.load %arg8[%c0_14, %c0_15] : memref<64x128xf32, #tpu.memory_space<vmem>>, vector<64x128xf32>
    tpu.vector_store %arg8[%c0_14, %c0_15], %20 {strides = array<i32>} : memref<64x128xf32, #tpu.memory_space<vmem>>, vector<64x128xf32>,
    return
  }
  func.func @transform_0(%arg0: i32, %arg1: i32) -> (i32, i32) {
    %c0_i32 = arith.constant 0 : i32
    %c0_i32_0 = arith.constant 0 : i32
    return %arg0, %c0_i32 : i32, i32
  }
  func.func @transform_1(%arg0: i32, %arg1: i32) -> (i32, i32) {
    %c0_i32 = arith.constant 0 : i32
    %c0_i32_0 = arith.constant 0 : i32
    return %arg0, %c0_i32 : i32, i32
  }
  func.func @transform_2(%arg0: i32, %arg1: i32) -> (i32, i32) {
    %c0_i32 = arith.constant 0 : i32
    %c0_i32_0 = arith.constant 0 : i32
    return %c0_i32, %arg1 : i32, i32
  }
  func.func @transform_3(%arg0: i32, %arg1: i32) -> (i32, i32) {
    %c0_i32 = arith.constant 0 : i32
    %c0_i32_0 = arith.constant 0 : i32
    return %c0_i32, %arg1 : i32, i32
  }
  func.func @transform_4(%arg0: i32, %arg1: i32) -> (i32, i32) {
    %c0_i32 = arith.constant 0 : i32
    %c0_i32_0 = arith.constant 0 : i32
    return %c0_i32, %arg1 : i32, i32
  }
  func.func @transform_5(%arg0: i32, %arg1: i32) -> (i32, i32) {
    %c0_i32 = arith.constant 0 : i32
    %c0_i32_0 = arith.constant 0 : i32
    return %c0_i32, %arg1 : i32, i32
  }
  func.func @transform_6(%arg0: i32, %arg1: i32) -> (i32, i32) {
    %c0_i32 = arith.constant 0 : i32
    return %arg0, %arg1 : i32, i32
  }
}

</mosaic_0001>

<bundles_post_ra>
// kernel: c2f_ema_forward.5
= control target key start
LH: loop header
LB: loop body
LE: loop exit
PB: predicated region body
PF: predicated region fallthrough
CT: control target
= control target key end

     0   :  { %s912_s15 = smov 0   ;;  %s914_s16 = smov 0   ;;  %s1004_s0 = inlined_call_operand.vmem [shape: bf16[128,128], index: 0, kind: input, shape index: {}]   ;;  %s1005_s1 = inlined_call_operand.vmem [shape: bf16[128,128], index: 1, kind: input, shape index: {}]   ;;  %s1006_s2 = inlined_call_operand.vmem [shape: f32[1,128], index: 2, kind: input, shape index: {}]   ;;  %s1007_s3 = inlined_call_operand.vmem [shape: f32[1,128], index: 3, kind: input, shape index: {}]   ;;  %s1008_s4 = inlined_call_operand.vmem [shape: bf16[128,128], index: 4, kind: output, shape index: {}]  }
   0x1   :  { %s916_s17 = smov 0  }
   0x2 LB: > { %s26_s18 = sadd.s32 1, %s881_s16  ;;  %p675_p0 = scmp.ge.s32.totalorder %s885_s17, 1  ;;  %s885_s17 = sphi %s916_s17, %s14_s17   ;;  %s881_s16 = sphi %s914_s16, %s1010_s16   ;;  %s877_s15 = sphi %s912_s15, %s1009_s15  }
   0x3   : > { %p28_p1 = scmp.ge.s32.totalorder %s26_s18, 2  ;;  %p202_p2 = scmp.lt.s32.totalorder %s885_s17, 3 }
   0x5   : > { %s1012_s18 = smov (%p28_p1, %s26_s18), 0  ;;  %p203_p3 = pnand %p675_p0, %p202_p2 }
   0x6   : > { %s676_s21 = sshll.u32 (!%p203_p3), %s877_s15, 3 }
   0x7   : > { %206 = sbr.rel (%p203_p3) target bundleno = 287 (0x11f), region = 36  ;;  %p242_p4 = scmp.lt.s32.totalorder (!%p203_p3), %s676_s21, 15 }
   0xc   : > { %v819_v0 = vld [vmem:[%s1005_s1 + $0x38] sm:$0xff]   ;;  %v820_v1 = vld [vmem:[%s1005_s1 + $0x30] sm:$0xff]   ;;  %s1014_s21 = smov (!%p242_p4, %s676_s21), 15  ;;  %v821_v2 = vld [vmem:[%s1005_s1 + $0x28] sm:$0xff]  }
   0xd   : > { %755 = vmatprep.subr.bf16.mxu0 %v819_v0  ;;  %779 = vmatprep.subr.bf16.mxu1 %v819_v0  ;;  %s677_s26 = sshll.u32 %s1014_s21, 2  ;;  %v822_v3 = vld [vmem:[%s1005_s1 + $0x20] sm:$0xff]   ;;  %v823_v6 = vld [vmem:[%s1005_s1 + $0x18] sm:$0xff]   ;;  %v824_v7 = vld [vmem:[%s1005_s1 + $0x10] sm:$0xff]  }
   0xe   : > { %756 = vmatpush3.bf16.msra.mxu0 %v819_v0  ;;  %787 = vmatpush3.bf16.msra.mxu1 %v819_v0  ;;  %s947_s29 = scalar_lea.vmem %s1004_s0, %s677_s26  ;;  %v825_v8 = vld [vmem:[%s1005_s1 + $0x8] sm:$0xff]   ;;  %v826_v9 = vld [vmem:[%s1005_s1] sm:$0xff]   ;;  %s264_s24 = scalar_lea.vmem %s1008_s4, %s677_s26 }
   0xf   : > { %757 = vmatprep.subr.bf16.mxu0 %v820_v1  ;;  %780 = vmatprep.subr.bf16.mxu1 %v820_v1  ;;  %v827_v4 = vld [vmem:[%s947_s29] sm:$0xff]   ;;  %v828_v5 = vld [vmem:[%s947_s29 + $0x10] sm:$0xff]   ;;  %v829_v10 = vld [vmem:[%s947_s29 + $0x8] sm:$0xff]  }
  0x10   : > { %771 = vmatprep.mubr.bf16.mxu0 %v827_v4  ;;  %775 = vmatprep.mubr.bf16.mxu1 %v828_v5  ;;  %v830_v11 = vld [vmem:[%s947_s29 + $0x18] sm:$0xff]   ;;  %v692_v12 = vld [vmem:[%s1006_s2] ss:$0 sm:$0xff] }
  0x11   : > { %v693_v14 = vld [vmem:[%s1007_s3] ss:$0 sm:$0xff] }
  0x12   : > { %758 = vmatpush3.bf16.msra.mxu0 %v820_v1  ;;  %788 = vmatpush3.bf16.msra.mxu1 %v820_v1 }
  0x13   : > { %759 = vmatprep.subr.bf16.mxu0 %v821_v2  ;;  %781 = vmatprep.subr.bf16.mxu1 %v821_v2 }
  0x16   : > { %760 = vmatpush3.bf16.msra.mxu0 %v821_v2  ;;  %789 = vmatpush3.bf16.msra.mxu1 %v821_v2 }
  0x17   : > { %761 = vmatprep.subr.bf16.mxu0 %v822_v3  ;;  %782 = vmatprep.subr.bf16.mxu1 %v822_v3 }
  0x1a   : > { %762 = vmatpush3.bf16.msra.mxu0 %v822_v3  ;;  %790 = vmatpush3.bf16.msra.mxu1 %v822_v3 }
  0x1b   : > { %763 = vmatprep.subr.bf16.mxu0 %v823_v6  ;;  %783 = vmatprep.subr.bf16.mxu1 %v823_v6 }
  0x1e   : > { %764 = vmatpush3.bf16.msra.mxu0 %v823_v6  ;;  %791 = vmatpush3.bf16.msra.mxu1 %v823_v6 }
  0x1f   : > { %765 = vmatprep.subr.bf16.mxu0 %v824_v7  ;;  %784 = vmatprep.subr.bf16.mxu1 %v824_v7 }
  0x22   : > { %766 = vmatpush3.bf16.msra.mxu0 %v824_v7  ;;  %792 = vmatpush3.bf16.msra.mxu1 %v824_v7 }
  0x23   : > { %767 = vmatprep.subr.bf16.mxu0 %v825_v8  ;;  %785 = vmatprep.subr.bf16.mxu1 %v825_v8 }
  0x26   : > { %768 = vmatpush3.bf16.msra.mxu0 %v825_v8  ;;  %793 = vmatpush3.bf16.msra.mxu1 %v825_v8 }
  0x27   : > { %769 = vmatprep.subr.bf16.mxu0 %v826_v9  ;;  %786 = vmatprep.subr.bf16.mxu1 %v826_v9 }
  0x2a   : > { %770 = vmatpush3.bf16.msra.mxu0 %v826_v9  ;;  %794 = vmatpush3.bf16.msra.mxu1 %v826_v9 }
  0x2d   : > { %772 = vmatmul.mubr.bf16.vlgmr.msra.gmra.mxu0 %v829_v10  ;;  %776 = vmatmul.mubr.bf16.vlgmr.msra.gmra.mxu1 %v830_v11 }
  0xed   : > { %v773_v13 = vpop.f32.mrf.mxu0  ;;  %v777_v15 = vpop.f32.mrf.mxu1 }
  0xee   : > { %v437_v16 = vmul.f32 %v773_v13, %v692_v12  ;;  %v441_v17 = vmul.f32 %v777_v15, %v692_v12 }
  0xef   : > { %v397_v18 = vpop.f32.mrf.mxu0  ;;  %v413_v19 = vpop.f32.mrf.mxu1 }
  0xf0   : > { %v974_v20 = vadd.f32 %v693_v14, %v437_v16  ;;  %v976_v21 = vadd.f32 %v693_v14, %v441_v17  ;;  %v435_v22 = vmul.f32 %v692_v12, %v397_v18  ;;  %v439_v23 = vmul.f32 %v692_v12, %v413_v19 }
  0xf1   : > { %v774_v24 = vpop.f32.mrf.mxu0  ;;  %v778_v25 = vpop.f32.mrf.mxu1 }
  0xf2   : > { %v696_v26 = vmul.f32 -1.442695, %v974_v20  ;;  %v700_v27 = vmul.f32 -1.442695, %v976_v21  ;;  %v980_v28 = vadd.f32 %v693_v14, %v435_v22  ;;  %v982_v29 = vadd.f32 %v693_v14, %v439_v23 }
  0xf3   : > { %v438_v30 = vmul.f32 %v774_v24, %v692_v12  ;;  %v442_v31 = vmul.f32 %v778_v25, %v692_v12  ;;  %v400_v32 = vpop.f32.mrf.mxu0  ;;  %v416_v33 = vpop.f32.mrf.mxu1 }
  0xf4   : > { %831 = vpow2.f32 %v696_v26  ;;  %v694_v34 = vmul.f32 -1.442695, %v980_v28  ;;  %v698_v35 = vmul.f32 -1.442695, %v982_v29  ;;  %v436_v36 = vmul.f32 %v692_v12, %v400_v32 }
  0xf5   : > { %833 = vpow2.f32 %v700_v27  ;;  %v453_v37 = vadd.f32 %v693_v14, %v438_v30  ;;  %v457_v38 = vadd.f32 %v693_v14, %v442_v31  ;;  %v440_v39 = vmul.f32 %v692_v12, %v416_v33 }
  0xf6   : > { %835 = vpow2.f32 %v694_v34  ;;  %v451_v40 = vadd.f32 %v693_v14, %v436_v36 }
  0xf7   : > { %837 = vpow2.f32 %v698_v35  ;;  %v697_v41 = vmul.f32 -1.442695, %v453_v37  ;;  %v701_v42 = vmul.f32 -1.442695, %v457_v38  ;;  %v455_v43 = vadd.f32 %v693_v14, %v440_v39 }
  0xf8   : > { %v695_v44 = vmul.f32 -1.442695, %v451_v40 }
  0xf9   : > { %839 = vpow2.f32 %v697_v41  ;;  %v699_v45 = vmul.f32 -1.442695, %v455_v43 }
  0xfa   : > { %841 = vpow2.f32 %v701_v42 }
  0xfb   : > { %843 = vpow2.f32 %v695_v44 }
  0xfc   : > { %845 = vpow2.f32 %v699_v45 }
 0x101   : > { %v832_v46 = vpop.eup %831 }
 0x102   : > { %v834_v47 = vpop.eup %833  ;;  %v484_v48 = vadd.f32 1.0, %v832_v46 }
 0x103   : > { %v836_v49 = vpop.eup %835  ;;  %v488_v50 = vadd.f32 1.0, %v834_v47 }
 0x104   : > { %v838_v51 = vpop.eup %837  ;;  %v482_v52 = vadd.f32 1.0, %v836_v49  ;;  %847 = vrcp.f32 %v484_v48 }
 0x105   : > { %v486_v53 = vadd.f32 1.0, %v838_v51  ;;  %849 = vrcp.f32 %v488_v50 }
 0x106   : > { %v840_v54 = vpop.eup %839  ;;  %851 = vrcp.f32 %v482_v52 }
 0x107   : > { %v842_v55 = vpop.eup %841  ;;  %v485_v56 = vadd.f32 1.0, %v840_v54  ;;  %853 = vrcp.f32 %v486_v53 }
 0x108   : > { %v844_v57 = vpop.eup %843  ;;  %v489_v58 = vadd.f32 1.0, %v842_v55 }
 0x109   : > { %v846_v59 = vpop.eup %845  ;;  %855 = vrcp.f32 %v485_v56  ;;  %v483_v60 = vadd.f32 1.0, %v844_v57 }
 0x10a   : > { %857 = vrcp.f32 %v489_v58  ;;  %v487_v61 = vadd.f32 1.0, %v846_v59 }
 0x10b   : > { %859 = vrcp.f32 %v483_v60 }
 0x10c   : > { %861 = vrcp.f32 %v487_v61 }
 0x111   : > { %v848_v62 = vpop.eup %847 }
 0x112   : > { %v850_v63 = vpop.eup %849  ;;  %v508_v4 = vmul.f32 %v848_v62, %v974_v20 }
 0x113   : > { %v852_v0 = vpop.eup %851  ;;  %v512_v7 = vmul.f32 %v850_v63, %v976_v21 }
 0x114   : > { %v854_v1 = vpop.eup %853  ;;  %v506_v10 = vmul.f32 %v852_v0, %v980_v28 }
 0x115   : > { %v510_v13 = vmul.f32 %v854_v1, %v982_v29 }
 0x116   : > { %v856_v2 = vpop.eup %855 }
 0x117   : > { %v858_v3 = vpop.eup %857  ;;  %v509_v5 = vmul.f32 %v856_v2, %v453_v37 }
 0x118   : > { %v860_v6 = vpop.eup %859  ;;  %v513_v8 = vmul.f32 %v858_v3, %v457_v38 }
 0x119   : > { %v862_v9 = vpop.eup %861  ;;  %v728_v11 = vpack.c.bf16 %v509_v5, %v508_v4  ;;  %v507_v12 = vmul.f32 %v860_v6, %v451_v40 }
 0x11a   : > { %v738_v14 = vpack.c.bf16 %v513_v8, %v512_v7  ;;  %v511_v15 = vmul.f32 %v862_v9, %v455_v43 }
 0x11b   : > { %740 = vst [vmem:[%s264_s24 + $0x8] sm:$0xff] %v728_v11   ;;  %v723_v16 = vpack.c.bf16 %v507_v12, %v506_v10 }
 0x11c   : > { %742 = vst [vmem:[%s264_s24 + $0x18] sm:$0xff] %v738_v14   ;;  %v733_v17 = vpack.c.bf16 %v511_v15, %v510_v13 }
 0x11d   : > { %724 = vst [vmem:[%s264_s24] sm:$0xff] %v723_v16  }
 0x11e   : > { %741 = vst [vmem:[%s264_s24 + $0x10] sm:$0xff] %v733_v17  }
 0x11f PF: > { %s14_s17 = sadd.s32 1, %s885_s17   ;;  %s1009_s15 = smov %s881_s16 }
 0x120   : > { %p11_p5 = scmp.ge.s32.totalorder %s14_s17, 4   ;;  %s1010_s16 = smov %s1012_s18 }
 0x122   :  { %13 = sbr.rel (!%p11_p5) target bundleno = 2 (0x2), region = 75 }

// kernel: c2f_ema_forward.6
= control target key start
LH: loop header
LB: loop body
LE: loop exit
PB: predicated region body
PF: predicated region fallthrough
CT: control target
= control target key end

     0   :  { %s2216_s15 = smov 0   ;;  %s2750_s0 = inlined_call_operand.vmem [shape: bf16[2,176,128], index: 0, kind: input, shape index: {}]   ;;  %s2751_s1 = inlined_call_operand.vmem [shape: bf16[1152,128], index: 1, kind: input, shape index: {}]   ;;  %s2752_s2 = inlined_call_operand.vmem [shape: f32[1,128], index: 2, kind: input, shape index: {}]   ;;  %s2753_s3 = inlined_call_operand.vmem [shape: f32[1,128], index: 3, kind: input, shape index: {}]   ;;  %s2754_s4 = inlined_call_operand.vmem [shape: bf16[2,8,8,128], index: 4, kind: output, shape index: {}]  }
   0x1 LB: > { %s1608_s16 = sadd.s32 4294967295, %s2189_s15   ;;  %p1612_p0 = scmp.ge.s32.totalorder %s2189_s15, 1  ;;  %s2189_s15 = sphi %s2216_s15, %s14_s15  }
   0x2   : > { %p162_p1 = scmp.lt.s32.totalorder %s2189_s15, 3 }
   0x4   : > { %p163_p2 = pnand %p1612_p0, %p162_p1 }
   0x5   : > { %p188_p3 = scmp.lt.s32.totalorder (!%p163_p2), %s1608_s16, 1 }
   0x6   : > { %166 = sbr.rel (%p163_p2) target bundleno = 422 (0x1a6), region = 36 }
   0xb   : > { %v2066_v0 = vld [vmem:[%s2751_s1 + $0x78] sm:$0xff]   ;;  %v2070_v4 = vld [vmem:[%s2751_s1 + $0x70] sm:$0xff]   ;;  %v2074_v8 = vld [vmem:[%s2751_s1 + $0x68] sm:$0xff]   ;;  %s2756_s16 = smov (!%p188_p3, %s1608_s16), 1  ;;  %vm271_vm0 = vsmask.f32 7424 }
   0xc   : > { %v2067_v1 = vld [vmem:[%s2751_s1 + $0xf8] sm:$0xff]   ;;  %1737 = vmatprep.subr.bf16.mxu0 %v2066_v0  ;;  %v2071_v5 = vld [vmem:[%s2751_s1 + $0xf0] sm:$0xff]   ;;  %v2075_v9 = vld [vmem:[%s2751_s1 + $0xe8] sm:$0xff]   ;;  %s2057_s23 = smul.u32 88, %s2756_s16  ;;  %vm348_vm1 = vcmask 1046528   ;;  %s1713_s27 = sshll.u32 %s2756_s16, 5 }
   0xd   : > { %v2068_v2 = vld [vmem:[%s2751_s1 + $0x38] sm:$0xff]   ;;  %1801 = vmatprep.subr.bf16.mxu1 %v2067_v1  ;;  %v2072_v6 = vld [vmem:[%s2751_s1 + $0x30] sm:$0xff]   ;;  %v2076_v10 = vld [vmem:[%s2751_s1 + $0x28] sm:$0xff]   ;;  %s197_s30 = scalar_lea.vmem %s2754_s4, %s1713_s27 }
   0xe   : > { %v2069_v3 = vld [vmem:[%s2751_s1 + $0xb8] sm:$0xff]   ;;  %1738 = vmatpush3.bf16.msra.mxu0 %v2068_v2  ;;  %v2073_v7 = vld [vmem:[%s2751_s1 + $0xb0] sm:$0xff]   ;;  %v2077_v11 = vld [vmem:[%s2751_s1 + $0xa8] sm:$0xff]   ;;  %s2327_s8 = scalar_lea.vmem %s2750_s0, %s2057_s23 }
   0xf   : > { %1802 = vmatpush3.bf16.msra.mxu1 %v2069_v3  ;;  %1739 = vmatprep.subr.bf16.mxu0 %v2070_v4  ;;  %v2078_v12 = vld [vmem:[%s2751_s1 + $0x60] sm:$0xff]   ;;  %v2082_v16 = vld [vmem:[%s2751_s1 + $0x58] sm:$0xff]   ;;  %v2086_v20 = vld [vmem:[%s2751_s1 + $0x50] sm:$0xff]  }
  0x10   : > { %1803 = vmatprep.subr.bf16.mxu1 %v2071_v5  ;;  %v2079_v13 = vld [vmem:[%s2751_s1 + $0xe0] sm:$0xff]   ;;  %v2083_v17 = vld [vmem:[%s2751_s1 + $0xd8] sm:$0xff]   ;;  %v2087_v21 = vld [vmem:[%s2751_s1 + $0xd0] sm:$0xff]  }
  0x11   : > { %v2080_v14 = vld [vmem:[%s2751_s1 + $0x20] sm:$0xff]   ;;  %v2084_v18 = vld [vmem:[%s2751_s1 + $0x18] sm:$0xff]   ;;  %v2088_v22 = vld [vmem:[%s2751_s1 + $0x10] sm:$0xff]  }
  0x12   : > { %1740 = vmatpush3.bf16.msra.mxu0 %v2072_v6  ;;  %v2081_v15 = vld [vmem:[%s2751_s1 + $0xa0] sm:$0xff]   ;;  %v2085_v19 = vld [vmem:[%s2751_s1 + $0x98] sm:$0xff]   ;;  %v2089_v23 = vld [vmem:[%s2751_s1 + $0x90] sm:$0xff]  }
  0x13   : > { %1804 = vmatpush3.bf16.msra.mxu1 %v2073_v7  ;;  %1741 = vmatprep.subr.bf16.mxu0 %v2074_v8  ;;  %v2090_v24 = vld [vmem:[%s2751_s1 + $0x48] sm:$0xff]   ;;  %v2094_v28 = vld [vmem:[%s2751_s1 + $0x40] sm:$0xff]   ;;  %v2100_v34 = vld [vmem:[%s2751_s1 + $0x178] sm:$0xff]  }
  0x14   : > { %1805 = vmatprep.subr.bf16.mxu1 %v2075_v9  ;;  %v2091_v25 = vld [vmem:[%s2751_s1 + $0xc8] sm:$0xff]   ;;  %v2095_v29 = vld [vmem:[%s2751_s1 + $0xc0] sm:$0xff]   ;;  %v2101_v40 = vld [vmem:[%s2751_s1 + $0x1f8] sm:$0xff]  }
  0x15   : > { %v2092_v26 = vld [vmem:[%s2751_s1 + $0x8] sm:$0xff]   ;;  %v2096_v30 = vld [vmem:[%s2751_s1] sm:$0xff]   ;;  %v2103_v43 = vld [vmem:[%s2751_s1 + $0x1b8] sm:$0xff]  }
  0x16   : > { %1742 = vmatpush3.bf16.msra.mxu0 %v2076_v10  ;;  %v2093_v27 = vld [vmem:[%s2751_s1 + $0x88] sm:$0xff]   ;;  %v2097_v31 = vld [vmem:[%s2751_s1 + $0x80] sm:$0xff]   ;;  %v2345_v46 = vld [vmem:[%s2327_s8 + $0x10] sm:$0xff]  }
  0x17   : > { %1806 = vmatpush3.bf16.msra.mxu1 %v2077_v11  ;;  %1743 = vmatprep.subr.bf16.mxu0 %v2078_v12  ;;  %v2098_v32 = vld [vmem:[%s2327_s8] sm:$0xff]   ;;  %v2099_v33 = vld [vmem:[%s2327_s8 + $0x8] sm:$0xff]   ;;  %v2102_v48 = vld [vmem:[%s2751_s1 + $0x138] sm:$0xff]   ;;  %v288_v51 = vshll.u32 %v2345_v46, 16  ;;  %v352_v52 = vrot.slane %v2345_v46, 1  ;;  %v292_v60 = vshrl.u32 %v2345_v46, 16 }
  0x18   : > { %1807 = vmatprep.subr.bf16.mxu1 %v2079_v13  ;;  %v273_v35 = vshrl.u32 %v2098_v32, 16  ;;  %v275_v36 = vshll.u32 %v2098_v32, 16  ;;  %v280_v37 = vshll.u32 %v2099_v33, 16  ;;  %1127 = vmatprep.mubr.bf16.mxu1 %v2099_v33  ;;  %v349_v38 = vrot.slane %v2098_v32, 1  ;;  %v2105_v53 = vld [vmem:[%s2751_s1 + $0x170] sm:$0xff]   ;;  %v2370_v59 = vld [vmem:[%s2327_s8 + $0x18] sm:$0xff]  }
  0x19   : > { %v350_v39 = vrot.slane %v2099_v33, 1  ;;  %v284_v47 = vshrl.u32 %v2099_v33, 16  ;;  %v2106_v54 = vld [vmem:[%s2751_s1 + $0x1f0] sm:$0xff]   ;;  %v290_v56 = vrot.slane %v288_v51, 1  ;;  %v2110_v62 = vld [vmem:[%s2751_s1 + $0x168] sm:$0xff]   ;;  %v296_v0 = vshll.u32 %v2370_v59, 16 }
  0x1a   : > { %1744 = vmatpush3.bf16.msra.mxu0 %v2080_v14  ;;  %v277_v41 = vrot.slane %v275_v36, 1  ;;  %v282_v42 = vrot.slane %v280_v37, 1  ;;  %v2107_v55 = vld [vmem:[%s2751_s1 + $0x130] sm:$0xff]   ;;  %v354_v1 = vrot.slane %v2370_v59, 1  ;;  %v2111_v2 = vld [vmem:[%s2751_s1 + $0x1e8] sm:$0xff]   ;;  %v2394_v6 = vld [vmem:[%s2327_s8 + $0x20] sm:$0xff]  }
  0x1b   : > { %1808 = vmatpush3.bf16.msra.mxu1 %v2081_v15  ;;  %1745 = vmatprep.subr.bf16.mxu0 %v2082_v16  ;;  %v351_v44 = vsel %vm348_vm1, %v349_v38, %v350_v39  ;;  %v2108_v57 = vld [vmem:[%s2751_s1 + $0x1b0] sm:$0xff]   ;;  %v2367_v58 = vsel %vm348_vm1, %v350_v39, %v352_v52  ;;  %v294_v63 = vor.u32 %v292_v60, %v290_v56  ;;  %v2112_v3 = vld [vmem:[%s2751_s1 + $0x128] sm:$0xff]   ;;  %v298_v4 = vrot.slane %v296_v0, 1  ;;  %v2115_v9 = vld [vmem:[%s2751_s1 + $0x160] sm:$0xff]  }
  0x1c   : > { %1809 = vmatprep.subr.bf16.mxu1 %v2083_v17  ;;  %v278_v45 = vor.u32 %v277_v41, %v273_v35  ;;  %v286_v50 = vor.u32 %v284_v47, %v282_v42  ;;  %v2113_v5 = vld [vmem:[%s2751_s1 + $0x1a8] sm:$0xff]   ;;  %v300_v7 = vshrl.u32 %v2370_v59, 16  ;;  %v304_v10 = vshll.u32 %v2394_v6, 16  ;;  %v2116_v11 = vld [vmem:[%s2751_s1 + $0x1e0] sm:$0xff]   ;;  %v2515_v60 = vld [vmem:[%s2751_s1 + $0x238] sm:$0xff]  }
  0x1d   : > { %v2398_v8 = vsel %vm271_vm0, %v294_v63, %v298_v4  ;;  %v2117_v12 = vld [vmem:[%s2751_s1 + $0x120] sm:$0xff]   ;;  %v2412_v13 = vsel %vm348_vm1, %v352_v52, %v354_v1  ;;  %v2418_v17 = vld [vmem:[%s2327_s8 + $0x28] sm:$0xff]  }
  0x1e   : > { %1746 = vmatpush3.bf16.msra.mxu0 %v2084_v18  ;;  %v283_v49 = vsel %vm271_vm0, %v278_v45, %v282_v42  ;;  %v2374_v61 = vsel %vm271_vm0, %v286_v50, %v290_v56  ;;  %v302_v14 = vor.u32 %v300_v7, %v298_v4  ;;  %v306_v15 = vrot.slane %v304_v10, 1  ;;  %v2118_v16 = vld [vmem:[%s2751_s1 + $0x1a0] sm:$0xff]   ;;  %v2130_v38 = vld [vmem:[%s2751_s1 + $0x148] sm:$0xff]   ;;  %v2483_v42 = vld [vmem:[%s2327_s8 + $0x38] sm:$0xff]  }
  0x1f   : > { %1810 = vmatpush3.bf16.msra.mxu1 %v2085_v19  ;;  %1747 = vmatprep.subr.bf16.mxu0 %v2086_v20  ;;  %v356_v18 = vrot.slane %v2394_v6, 1  ;;  %v2120_v19 = vld [vmem:[%s2751_s1 + $0x158] sm:$0xff]   ;;  %v308_v20 = vshrl.u32 %v2394_v6, 16  ;;  %v316_v35 = vshrl.u32 %v2418_v17, 16  ;;  %v2131_v39 = vld [vmem:[%s2751_s1 + $0x1c8] sm:$0xff]   ;;  %v2137_v52 = vld [vmem:[%s2751_s1 + $0x1c0] sm:$0xff]  }
  0x20   : > { %1811 = vmatprep.subr.bf16.mxu1 %v2087_v21  ;;  %1038 = vmatprep.mubr.bf16.mxu0 %v283_v49  ;;  %v312_v21 = vshll.u32 %v2418_v17, 16  ;;  %v216_v47 = vld [vmem:[%s2327_s8 + $0x44] sm:$0xf]  ;;  %v215_v49 = vld [vmem:[%s2327_s8 + $0x40] sm:$0xf]  ;;  %v2527_v4 = vrot.slane %v2483_v42, 1 }
  0x21   : > { %v2507_v56 = vcombine.low %v215_v49, %v216_v47  ;;  %v1624_v0 = vcombine.low %v215_v49, %v215_v49  ;;  %v218_v10 = vld [vmem:[%s2327_s8 + $0x4c] sm:$0xf] }
  0x22   : > { %1748 = vmatpush3.bf16.msra.mxu0 %v2088_v22  ;;  %v2121_v22 = vld [vmem:[%s2751_s1 + $0x1d8] sm:$0xff]  }
  0x23   : > { %1812 = vmatpush3.bf16.msra.mxu1 %v2089_v23  ;;  %1749 = vmatprep.subr.bf16.mxu0 %v2090_v24  ;;  %v2122_v23 = vld [vmem:[%s2751_s1 + $0x118] sm:$0xff]   ;;  %v2435_v24 = vsel %vm271_vm0, %v302_v14, %v306_v15 }
  0x24   : > { %1813 = vmatprep.subr.bf16.mxu1 %v2091_v25  ;;  %v2123_v25 = vld [vmem:[%s2751_s1 + $0x198] sm:$0xff]  }
  0x26   : > { %1750 = vmatpush3.bf16.msra.mxu0 %v2092_v26  ;;  %v2442_v26 = vld [vmem:[%s2327_s8 + $0x30] sm:$0xff]  }
  0x27   : > { %1814 = vmatpush3.bf16.msra.mxu1 %v2093_v27  ;;  %1751 = vmatprep.subr.bf16.mxu0 %v2094_v28  ;;  %v2446_v27 = vsel %vm348_vm1, %v354_v1, %v356_v18  ;;  %v2125_v28 = vld [vmem:[%s2751_s1 + $0x150] sm:$0xff]   ;;  %v320_v37 = vshll.u32 %v2442_v26, 16  ;;  %v360_v50 = vrot.slane %v2442_v26, 1  ;;  %v324_v51 = vshrl.u32 %v2442_v26, 16 }
  0x28   : > { %1815 = vmatprep.subr.bf16.mxu1 %v2095_v29  ;;  %v310_v29 = vor.u32 %v308_v20, %v306_v15 }
  0x29   : > { %v322_v45 = vrot.slane %v320_v37, 1 }
  0x2a   : > { %1752 = vmatpush3.bf16.msra.mxu0 %v2096_v30  ;;  %v314_v30 = vrot.slane %v312_v21, 1 }
  0x2b   : > { %1816 = vmatpush3.bf16.msra.mxu1 %v2097_v31  ;;  %1865 = vmatprep.subr.bf16.mxu0 %v2100_v34  ;;  %v2126_v31 = vld [vmem:[%s2751_s1 + $0x1d0] sm:$0xff]   ;;  %v358_v34 = vrot.slane %v2418_v17, 1  ;;  %v326_v1 = vor.u32 %v324_v51, %v322_v45  ;;  %v2142_v51 = vld [vmem:[%s2751_s1 + $0x228] sm:$0xff]  }
  0x2c   : > { %1929 = vmatprep.subr.bf16.mxu1 %v2101_v40  ;;  %v2465_v36 = vsel %vm271_vm0, %v310_v29, %v314_v30  ;;  %v2132_v40 = vld [vmem:[%s2751_s1 + $0x108] sm:$0xff]  }
  0x2d   : > { %1039 = vmatmul.mubr.bf16.vlgmr.msra.gmra.mxu0 %v2098_v32  ;;  %v2127_v32 = vld [vmem:[%s2751_s1 + $0x110] sm:$0xff]   ;;  %v2480_v41 = vsel %vm348_vm1, %v356_v18, %v358_v34  ;;  %v2521_v63 = vsel %vm348_vm1, %v358_v34, %v360_v50 }
  0x2e   : > { %1128 = vmatmul.mubr.bf16.vlgmr.msra.gmra.mxu1 %v351_v44  ;;  %1866 = vmatpush3.bf16.msra.mxu0 %v2102_v48  ;;  %v318_v44 = vor.u32 %v316_v35, %v314_v30  ;;  %v2136_v48 = vld [vmem:[%s2751_s1 + $0x140] sm:$0xff]  }
  0x2f   : > { %1930 = vmatpush3.bf16.msra.mxu1 %v2103_v43  ;;  %1134 = vmatprep.mubr.bf16.mxu1 %v2345_v46  ;;  %v2133_v43 = vld [vmem:[%s2751_s1 + $0x188] sm:$0xff]  }
  0x30   : > { %1931 = vmatprep.subr.bf16.mxu1 %v2106_v54  ;;  %1867 = vmatprep.subr.bf16.mxu0 %v2105_v53  ;;  %v2138_v53 = vld [vmem:[%s2751_s1 + $0x100] sm:$0xff]   ;;  %v2504_v54 = vsel %vm271_vm0, %v318_v44, %v322_v45  ;;  %v364_v45 = vrot.slane %v1624_v0, 1 }
  0x31   : > { %1045 = vmatprep.mubr.bf16.mxu0 %v2374_v61 }
  0x32   : > { %1868 = vmatpush3.bf16.msra.mxu0 %v2107_v55  ;;  %v328_v55 = vshll.u32 %v2483_v42, 16  ;;  %v365_v49 = vsel %vm348_vm1, %v2527_v4, %v364_v45 }
  0x33   : > { %1932 = vmatpush3.bf16.msra.mxu1 %v2108_v57  ;;  %1869 = vmatprep.subr.bf16.mxu0 %v2110_v62  ;;  %v2139_v57 = vld [vmem:[%s2751_s1 + $0x180] sm:$0xff]   ;;  %v382_v62 = vshll.u32 %v2507_v56, 16 }
  0x34   : > { %1933 = vmatprep.subr.bf16.mxu1 %v2111_v2  ;;  %v330_v2 = vrot.slane %v328_v55, 1 }
  0x35   : > { %1046 = vmatmul.mubr.bf16.gmra.mxu0 %v2099_v33  ;;  %v2128_v33 = vld [vmem:[%s2751_s1 + $0x190] sm:$0xff]   ;;  %v2531_v7 = vrot.slane %v382_v62, 1 }
  0x36   : > { %1135 = vmatmul.mubr.bf16.gmra.mxu1 %v2367_v58  ;;  %1052 = vmatprep.mubr.bf16.mxu0 %v2398_v8 }
  0x37   : > { %1141 = vmatprep.mubr.bf16.mxu1 %v2370_v59  ;;  %1934 = vmatpush3.bf16.msra.mxu1 %v2113_v5  ;;  %v332_v5 = vshrl.u32 %v2483_v42, 16 }
  0x38   : > { %1870 = vmatpush3.bf16.msra.mxu0 %v2112_v3  ;;  %1935 = vmatprep.subr.bf16.mxu1 %v2116_v11  ;;  %v386_v3 = vshrl.u32 %v2507_v56, 16  ;;  %v336_v11 = vshll.u32 %v1624_v0, 16 }
  0x39   : > { %1871 = vmatprep.subr.bf16.mxu0 %v2115_v9  ;;  %v217_v9 = vld [vmem:[%s2327_s8 + $0x48] sm:$0xf] }
  0x3a   : > { %v2539_v14 = vcombine.low %v217_v9, %v218_v10  ;;  %v1626_v15 = vcombine.low %v217_v9, %v217_v9  ;;  %v388_v18 = vor.u32 %v386_v3, %v2531_v7  ;;  %v338_v35 = vrot.slane %v336_v11, 1 }
  0x3b   : > { %1936 = vmatpush3.bf16.msra.mxu1 %v2118_v16  ;;  %v2542_v16 = vsel %vm271_vm0, %v326_v1, %v330_v2 }
  0x3c   : > { %1872 = vmatpush3.bf16.msra.mxu0 %v2117_v12  ;;  %1937 = vmatprep.subr.bf16.mxu1 %v2121_v22  ;;  %v2537_v12 = vrot.slane %v2507_v56, 1  ;;  %v410_v20 = vshll.u32 %v2539_v14, 16  ;;  %v398_v21 = vrot.slane %v1626_v15, 1  ;;  %v414_v22 = vshrl.u32 %v2539_v14, 16 }
  0x3d   : > { %1873 = vmatprep.subr.bf16.mxu0 %v2120_v19  ;;  %1053 = vmatmul.mubr.bf16.gmra.mxu0 %v2345_v46  ;;  %v2149_v19 = vld [vmem:[%s2327_s8 + $0x50] ss:$0 sps:$4 sm:$0xff]   ;;  %v424_v29 = vrot.slane %v2539_v14, 1 }
  0x3e   : > { %1142 = vmatmul.mubr.bf16.gmra.mxu1 %v2412_v13  ;;  %1059 = vmatprep.mubr.bf16.mxu0 %v2435_v24  ;;  %v426_v30 = vrot.slane %v2149_v19, 1 }
  0x3f   : > { %1148 = vmatprep.mubr.bf16.mxu1 %v2394_v6  ;;  %1938 = vmatpush3.bf16.msra.mxu1 %v2123_v25  ;;  %v2551_v25 = vsel %vm348_vm1, %v360_v50, %v2527_v4  ;;  %v2141_v50 = vld [vmem:[%s2751_s1 + $0x230] sm:$0xff]  }
  0x40   : > { %1874 = vmatpush3.bf16.msra.mxu0 %v2122_v23  ;;  %1939 = vmatprep.subr.bf16.mxu1 %v2126_v31  ;;  %v390_v23 = vshll.u32 %v1626_v15, 16  ;;  %v2555_v31 = vor.u32 %v332_v5, %v330_v2 }
  0x41   : > { %1875 = vmatprep.subr.bf16.mxu0 %v2125_v28  ;;  %v418_v28 = vshll.u32 %v2149_v19, 16 }
  0x42   : > { %v392_v34 = vrot.slane %v390_v23, 1 }
  0x43   : > { %1940 = vmatpush3.bf16.msra.mxu1 %v2128_v33  ;;  %v2559_v33 = vsel %vm348_vm1, %v2537_v12, %v398_v21  ;;  %v420_v37 = vrot.slane %v418_v28, 1 }
  0x44   : > { %1876 = vmatpush3.bf16.msra.mxu0 %v2127_v32  ;;  %1941 = vmatprep.subr.bf16.mxu1 %v2131_v39  ;;  %v412_v32 = vrot.slane %v410_v20, 1  ;;  %v2566_v39 = vsel %vm348_vm1, %v424_v29, %v426_v30  ;;  %v2572_v44 = vsel %vm271_vm0, %v388_v18, %v392_v34 }
  0x45   : > { %1060 = vmatmul.mubr.bf16.gmra.mxu0 %v2370_v59  ;;  %1877 = vmatprep.subr.bf16.mxu0 %v2130_v38  ;;  %v2563_v38 = vsel %vm348_vm1, %v2537_v12, %v424_v29 }
  0x46   : > { %1149 = vmatmul.mubr.bf16.gmra.mxu1 %v2446_v27  ;;  %1066 = vmatprep.mubr.bf16.mxu0 %v2465_v36 }
  0x47   : > { %1155 = vmatprep.mubr.bf16.mxu1 %v2418_v17  ;;  %1942 = vmatpush3.bf16.msra.mxu1 %v2133_v43  ;;  %v416_v43 = vor.u32 %v414_v22, %v412_v32 }
  0x48   : > { %1878 = vmatpush3.bf16.msra.mxu0 %v2132_v40  ;;  %1943 = vmatprep.subr.bf16.mxu1 %v2137_v52  ;;  %v2569_v40 = vsel %vm271_vm0, %v388_v18, %v412_v32 }
  0x49   : > { %1879 = vmatprep.subr.bf16.mxu0 %v2136_v48  ;;  %v2577_v47 = vsel %vm271_vm0, %v416_v43, %v420_v37  ;;  %v339_v48 = vsel %vm271_vm0, %v2555_v31, %v338_v35 }
  0x4b   : > { %1944 = vmatpush3.bf16.msra.mxu1 %v2139_v57 }
  0x4c   : > { %1880 = vmatpush3.bf16.msra.mxu0 %v2138_v53  ;;  %2041 = vmatprep.subr.bf16.mxu1 %v2515_v60 }
  0x4d   : > { %1067 = vmatmul.mubr.bf16.gmra.mxu0 %v2394_v6  ;;  %2009 = vmatprep.subr.bf16.mxu0 %v2515_v60 }
  0x4e   : > { %1156 = vmatmul.mubr.bf16.gmra.mxu1 %v2480_v41  ;;  %1073 = vmatprep.mubr.bf16.mxu0 %v2504_v54 }
  0x4f   : > { %1162 = vmatprep.mubr.bf16.mxu1 %v2442_v26 }
  0x55   : > { %1074 = vmatmul.mubr.bf16.gmra.mxu0 %v2418_v17 }
  0x56   : > { %1163 = vmatmul.mubr.bf16.gmra.mxu1 %v2521_v63  ;;  %1080 = vmatprep.mubr.bf16.mxu0 %v2542_v16 }
  0x57   : > { %1169 = vmatprep.mubr.bf16.mxu1 %v2483_v42 }
  0x5d   : > { %1081 = vmatmul.mubr.bf16.gmra.mxu0 %v2442_v26 }
  0x5e   : > { %1170 = vmatmul.mubr.bf16.gmra.mxu1 %v2551_v25  ;;  %1087 = vmatprep.mubr.bf16.mxu0 %v339_v48 }
  0x5f   : > { %1176 = vmatprep.mubr.bf16.mxu1 %v2507_v56 }
  0x65   : > { %1088 = vmatmul.mubr.bf16.gmra.mxu0 %v2483_v42 }
  0x66   : > { %1177 = vmatmul.mubr.bf16.gmra.mxu1 %v365_v49  ;;  %1216 = vmatprep.mubr.bf16.mxu0 %v2367_v58  ;;  %v2144_v58 = vld [vmem:[%s2751_s1 + $0x218] sm:$0xff]  }
  0x67   : > { %1305 = vmatprep.mubr.bf16.mxu1 %v2398_v8 }
  0x6d   : > { %1217 = vmatmul.mubr.bf16.vlgmr.msra.gmra.mxu0 %v2374_v61  ;;  %v2147_v61 = vld [vmem:[%s2751_s1 + $0x208] sm:$0xff]  }
  0x6e   : > { %1306 = vmatmul.mubr.bf16.vlgmr.msra.gmra.mxu1 %v2345_v46  ;;  %2010 = vmatpush3.bf16.msra.mxu0 %v2515_v60  ;;  %v2143_v46 = vld [vmem:[%s2751_s1 + $0x220] sm:$0xff]  }
  0x6f   : > { %2049 = vmatpush3.bf16.msra.mxu1 %v2515_v60  ;;  %1312 = vmatprep.mubr.bf16.mxu1 %v2435_v24 }
  0x70   : > { %2042 = vmatprep.subr.bf16.mxu1 %v2141_v50  ;;  %1223 = vmatprep.mubr.bf16.mxu0 %v2412_v13 }
  0x71   : > { %2011 = vmatprep.subr.bf16.mxu0 %v2141_v50 }
  0x72   : > { %2012 = vmatpush3.bf16.msra.mxu0 %v2141_v50 }
  0x73   : > { %2050 = vmatpush3.bf16.msra.mxu1 %v2141_v50  ;;  %2013 = vmatprep.subr.bf16.mxu0 %v2142_v51 }
  0x74   : > { %2043 = vmatprep.subr.bf16.mxu1 %v2142_v51 }
  0x75   : > { %1224 = vmatmul.mubr.bf16.gmra.mxu0 %v2398_v8  ;;  %v385_v8 = vsel %vm271_vm0, %v2555_v31, %v2531_v7 }
  0x76   : > { %1313 = vmatmul.mubr.bf16.gmra.mxu1 %v2370_v59  ;;  %1230 = vmatprep.mubr.bf16.mxu0 %v2446_v27  ;;  %v2145_v59 = vld [vmem:[%s2751_s1 + $0x210] sm:$0xff]  }
  0x77   : > { %1319 = vmatprep.mubr.bf16.mxu1 %v2465_v36  ;;  %2051 = vmatpush3.bf16.msra.mxu1 %v2142_v51 }
  0x78   : > { %2044 = vmatprep.subr.bf16.mxu1 %v2143_v46  ;;  %2014 = vmatpush3.bf16.msra.mxu0 %v2142_v51 }
  0x79   : > { %2015 = vmatprep.subr.bf16.mxu0 %v2143_v46 }
  0x7b   : > { %2052 = vmatpush3.bf16.msra.mxu1 %v2143_v46 }
  0x7c   : > { %2045 = vmatprep.subr.bf16.mxu1 %v2144_v58  ;;  %2016 = vmatpush3.bf16.msra.mxu0 %v2143_v46 }
  0x7d   : > { %2017 = vmatprep.subr.bf16.mxu0 %v2144_v58  ;;  %1231 = vmatmul.mubr.bf16.gmra.mxu0 %v2435_v24 }
  0x7e   : > { %1320 = vmatmul.mubr.bf16.gmra.mxu1 %v2394_v6  ;;  %1237 = vmatprep.mubr.bf16.mxu0 %v2480_v41  ;;  %v2150_v6 = vld [vmem:[%s2751_s1 + $0x200] sm:$0xff]  }
  0x7f   : > { %1326 = vmatprep.mubr.bf16.mxu1 %v2504_v54  ;;  %2053 = vmatpush3.bf16.msra.mxu1 %v2144_v58 }
  0x80   : > { %2046 = vmatprep.subr.bf16.mxu1 %v2145_v59  ;;  %2018 = vmatpush3.bf16.msra.mxu0 %v2144_v58 }
  0x81   : > { %2019 = vmatprep.subr.bf16.mxu0 %v2145_v59 }
  0x83   : > { %2054 = vmatpush3.bf16.msra.mxu1 %v2145_v59 }
  0x84   : > { %2047 = vmatprep.subr.bf16.mxu1 %v2147_v61  ;;  %2020 = vmatpush3.bf16.msra.mxu0 %v2145_v59 }
  0x85   : > { %2021 = vmatprep.subr.bf16.mxu0 %v2147_v61  ;;  %1238 = vmatmul.mubr.bf16.gmra.mxu0 %v2465_v36 }
  0x86   : > { %1327 = vmatmul.mubr.bf16.gmra.mxu1 %v2418_v17  ;;  %1244 = vmatprep.mubr.bf16.mxu0 %v2521_v63  ;;  %v397_v17 = vsel %vm348_vm1, %v2527_v4, %v2537_v12 }
  0x87   : > { %1333 = vmatprep.mubr.bf16.mxu1 %v2542_v16  ;;  %2055 = vmatpush3.bf16.msra.mxu1 %v2147_v61 }
  0x88   : > { %2048 = vmatprep.subr.bf16.mxu1 %v2150_v6  ;;  %2022 = vmatpush3.bf16.msra.mxu0 %v2147_v61 }
  0x89   : > { %2023 = vmatprep.subr.bf16.mxu0 %v2150_v6 }
  0x8b   : > { %2056 = vmatpush3.bf16.msra.mxu1 %v2150_v6 }
  0x8c   : > { %2024 = vmatpush3.bf16.msra.mxu0 %v2150_v6 }
  0x8d   : > { %1245 = vmatmul.mubr.bf16.gmra.mxu0 %v2504_v54 }
  0x8e   : > { %1334 = vmatmul.mubr.bf16.gmra.mxu1 %v2442_v26  ;;  %1251 = vmatprep.mubr.bf16.mxu0 %v2551_v25 }
  0x8f   : > { %1340 = vmatprep.mubr.bf16.mxu1 %v385_v8 }
  0x95   : > { %1252 = vmatmul.mubr.bf16.gmra.mxu0 %v2542_v16 }
  0x96   : > { %1341 = vmatmul.mubr.bf16.gmra.mxu1 %v2483_v42  ;;  %1258 = vmatprep.mubr.bf16.mxu0 %v397_v17 }
  0x97   : > { %1347 = vmatprep.mubr.bf16.mxu1 %v2569_v40 }
  0x9d   : > { %1259 = vmatmul.mubr.bf16.gmra.mxu0 %v385_v8 }
  0x9e   : > { %1348 = vmatmul.mubr.bf16.gmra.mxu1 %v2507_v56  ;;  %1265 = vmatprep.mubr.bf16.mxu0 %v2559_v33 }
  0x9f   : > { %1354 = vmatprep.mubr.bf16.mxu1 %v2577_v47 }
  0xa5   : > { %1266 = vmatmul.mubr.bf16.gmra.mxu0 %v2572_v44 }
  0xa6   : > { %1355 = vmatmul.mubr.bf16.gmra.mxu1 %v2539_v14  ;;  %2025 = vmatprep.mubr.bf16.mxu0 %v2412_v13 }
  0xa7   : > { %2033 = vmatprep.mubr.bf16.mxu1 %v2551_v25 }
  0xad   : > { %2026 = vmatmul.mubr.bf16.vlgmr.msra.gmra.mxu0 %v2446_v27 }
  0xae   : > { %2034 = vmatmul.mubr.bf16.vlgmr.msra.gmra.mxu1 %v397_v17  ;;  %2029 = vmatprep.mubr.bf16.mxu0 %v2480_v41 }
  0xaf   : > { %2037 = vmatprep.mubr.bf16.mxu1 %v2563_v38 }
  0xb5   : > { %2030 = vmatmul.mubr.bf16.gmra.mxu0 %v2521_v63 }
  0xb6   : > { %2038 = vmatmul.mubr.bf16.gmra.mxu1 %v2566_v39 }
  0xed   : > { %v1753_v42 = vpop.f32.mrf.mxu0 }
  0xee   : > { %v1817_v24 = vpop.f32.mrf.mxu1 }
  0xef   : > { %v1754_v53 = vpop.f32.mrf.mxu0 }
  0xf0   : > { %v1818_v26 = vpop.f32.mrf.mxu1  ;;  %v1755_v55 = vadd.f32 %v1754_v53, %v1753_v42 }
  0xf1   : > { %v1819_v36 = vadd.f32 %v1818_v26, %v1817_v24  ;;  %v1756_v13 = vpop.f32.mrf.mxu0 }
  0xf2   : > { %v1820_v52 = vpop.f32.mrf.mxu1 }
  0xf3   : > { %v2650_v57 = vadd.f32 %v1819_v36, %v1755_v55  ;;  %v1757_v60 = vpop.f32.mrf.mxu0 }
  0xf4   : > { %v1821_v54 = vpop.f32.mrf.mxu1 }
  0xf5   : > { %v1759_v41 = vpop.f32.mrf.mxu0 }
  0xf6   : > { %v1823_v56 = vpop.f32.mrf.mxu1 }
  0xf7   : > { %v1760_v1 = vpop.f32.mrf.mxu0 }
  0xf8   : > { %v1824_v27 = vpop.f32.mrf.mxu1  ;;  %v1761_v63 = vadd.f32 %v1760_v1, %v1759_v41 }
  0xf9   : > { %v1825_v62 = vadd.f32 %v1824_v27, %v1823_v56  ;;  %v1762_v3 = vpop.f32.mrf.mxu0 }
  0xfa   : > { %v1826_v0 = vpop.f32.mrf.mxu1 }
  0xfb   : > { %v2652_v5 = vadd.f32 %v1825_v62, %v1761_v63  ;;  %v1763_v7 = vpop.f32.mrf.mxu0 }
  0xfc   : > { %v1827_v2 = vpop.f32.mrf.mxu1 }
  0xfd   : > { %v1765_v11 = vpop.f32.mrf.mxu0 }
  0xfe   : > { %v1829_v4 = vpop.f32.mrf.mxu1 }
  0xff   : > { %v1766_v14 = vpop.f32.mrf.mxu0 }
 0x100   : > { %v1830_v9 = vpop.f32.mrf.mxu1  ;;  %v1767_v16 = vadd.f32 %v1766_v14, %v1765_v11 }
 0x101   : > { %v1831_v10 = vadd.f32 %v1830_v9, %v1829_v4  ;;  %v1768_v18 = vpop.f32.mrf.mxu0 }
 0x102   : > { %v1832_v12 = vpop.f32.mrf.mxu1 }
 0x103   : > { %v2654_v20 = vadd.f32 %v1831_v10, %v1767_v16  ;;  %v1769_v21 = vpop.f32.mrf.mxu0 }
 0x104   : > { %v1833_v15 = vpop.f32.mrf.mxu1 }
 0x105   : > { %v1771_v25 = vpop.f32.mrf.mxu0 }
 0x106   : > { %v1835_v19 = vpop.f32.mrf.mxu1 }
 0x107   : > { %v1772_v29 = vpop.f32.mrf.mxu0 }
 0x108   : > { %v1836_v22 = vpop.f32.mrf.mxu1  ;;  %v1773_v31 = vadd.f32 %v1772_v29, %v1771_v25 }
 0x109   : > { %v1837_v23 = vadd.f32 %v1836_v22, %v1835_v19  ;;  %v1774_v32 = vpop.f32.mrf.mxu0 }
 0x10a   : > { %v1838_v28 = vpop.f32.mrf.mxu1 }
 0x10b   : > { %v2656_v34 = vadd.f32 %v1837_v23, %v1773_v31  ;;  %v1775_v35 = vpop.f32.mrf.mxu0 }
 0x10c   : > { %v1839_v30 = vpop.f32.mrf.mxu1 }
 0x10d   : > { %v1777_v39 = vpop.f32.mrf.mxu0 }
 0x10e   : > { %v1841_v33 = vpop.f32.mrf.mxu1 }
 0x10f   : > { %v1778_v43 = vpop.f32.mrf.mxu0 }
 0x110   : > { %v1842_v37 = vpop.f32.mrf.mxu1  ;;  %v1779_v45 = vadd.f32 %v1778_v43, %v1777_v39 }
 0x111   : > { %v1843_v38 = vadd.f32 %v1842_v37, %v1841_v33  ;;  %v1780_v47 = vpop.f32.mrf.mxu0 }
 0x112   : > { %v1844_v40 = vpop.f32.mrf.mxu1 }
 0x113   : > { %v2658_v49 = vadd.f32 %v1843_v38, %v1779_v45  ;;  %v1781_v50 = vpop.f32.mrf.mxu0 }
 0x114   : > { %v1845_v44 = vpop.f32.mrf.mxu1 }
 0x115   : > { %v1783_v58 = vpop.f32.mrf.mxu0 }
 0x116   : > { %v1847_v48 = vpop.f32.mrf.mxu1 }
 0x117   : > { %v1784_v61 = vpop.f32.mrf.mxu0 }
 0x118   : > { %v1848_v51 = vpop.f32.mrf.mxu1  ;;  %v1785_v8 = vadd.f32 %v1784_v61, %v1783_v58 }
 0x119   : > { %v1849_v46 = vadd.f32 %v1848_v51, %v1847_v48  ;;  %v1786_v17 = vpop.f32.mrf.mxu0 }
 0x11a   : > { %v1850_v59 = vpop.f32.mrf.mxu1 }
 0x11b   : > { %v2660_v26 = vadd.f32 %v1849_v46, %v1785_v8  ;;  %v1787_v36 = vpop.f32.mrf.mxu0 }
 0x11c   : > { %v1851_v6 = vpop.f32.mrf.mxu1 }
 0x11d   : > { %v1789_v53 = vpop.f32.mrf.mxu0 }
 0x11e   : > { %v1853_v24 = vpop.f32.mrf.mxu1 }
 0x11f   : > { %v1790_v55 = vpop.f32.mrf.mxu0 }
 0x120   : > { %v1854_v42 = vpop.f32.mrf.mxu1  ;;  %v1791_v56 = vadd.f32 %v1790_v55, %v1789_v53 }
 0x121   : > { %v1855_v52 = vadd.f32 %v1854_v42, %v1853_v24  ;;  %v1792_v60 = vpop.f32.mrf.mxu0 }
 0x122   : > { %v1856_v54 = vpop.f32.mrf.mxu1 }
 0x123   : > { %v2662_v62 = vadd.f32 %v1855_v52, %v1791_v56  ;;  %v1793_v41 = vpop.f32.mrf.mxu0 }
 0x124   : > { %v1857_v13 = vpop.f32.mrf.mxu1 }
 0x125   : > { %v1795_v2 = vpop.f32.mrf.mxu0 }
 0x126   : > { %v1859_v27 = vpop.f32.mrf.mxu1 }
 0x127   : > { %v1796_v3 = vpop.f32.mrf.mxu0 }
 0x128   : > { %v1860_v0 = vpop.f32.mrf.mxu1  ;;  %v1797_v7 = vadd.f32 %v1796_v3, %v1795_v2 }
 0x129   : > { %v1861_v1 = vadd.f32 %v1860_v0, %v1859_v27  ;;  %v1798_v9 = vpop.f32.mrf.mxu0 }
 0x12a   : > { %v1862_v63 = vpop.f32.mrf.mxu1 }
 0x12b   : > { %v2664_v11 = vadd.f32 %v1861_v1, %v1797_v7  ;;  %v1799_v12 = vpop.f32.mrf.mxu0 }
 0x12c   : > { %v1863_v4 = vpop.f32.mrf.mxu1 }
 0x12d   : > { %v1881_v16 = vpop.f32.mrf.mxu0 }
 0x12e   : > { %v1945_v10 = vpop.f32.mrf.mxu1 }
 0x12f   : > { %v1882_v19 = vpop.f32.mrf.mxu0 }
 0x130   : > { %v1946_v14 = vpop.f32.mrf.mxu1  ;;  %v1883_v22 = vadd.f32 %v1882_v19, %v1881_v16 }
 0x131   : > { %v1947_v15 = vadd.f32 %v1946_v14, %v1945_v10  ;;  %v1884_v23 = vpop.f32.mrf.mxu0 }
 0x132   : > { %v1948_v18 = vpop.f32.mrf.mxu1  ;;  %v1219_v28 = vadd.f32 %v1883_v22, %v2650_v57 }
 0x133   : > { %v1885_v29 = vpop.f32.mrf.mxu0 }
 0x134   : > { %v1949_v21 = vpop.f32.mrf.mxu1  ;;  %v2671_v31 = vadd.f32 %v1947_v15, %v1219_v28 }
 0x135   : > { %v1887_v32 = vpop.f32.mrf.mxu0 }
 0x136   : > { %v2666_v25 = vpop.f32.mrf.mxu1 }
 0x137   : > { %v1888_v35 = vpop.f32.mrf.mxu0 }
 0x138   : > { %v2669_v30 = vpop.f32.mrf.mxu1  ;;  %v1889_v22 = vadd.f32 %v1888_v35, %v1887_v32  ;;  %v2691_v32 = vld [vmem:[%s2752_s2] ss:$0 sm:$0xff] }
 0x139   : > { %v1890_v38 = vpop.f32.mrf.mxu0  ;;  %v1953_v35 = vadd.f32 %v2669_v30, %v2666_v25 }
 0x13a   : > { %v1954_v33 = vpop.f32.mrf.mxu1 }
 0x13b   : > { %v1891_v40 = vpop.f32.mrf.mxu0 }
 0x13c   : > { %v1955_v37 = vpop.f32.mrf.mxu1 }
 0x13d   : > { %v2677_v44 = vpop.f32.mrf.mxu0 }
 0x13e   : > { %v2673_v39 = vpop.f32.mrf.mxu1 }
 0x13f   : > { %v2679_v47 = vpop.f32.mrf.mxu0 }
 0x140   : > { %v2675_v43 = vpop.f32.mrf.mxu1 }
 0x141   : > { %v1896_v48 = vpop.f32.mrf.mxu0 }
 0x142   : > { %v1960_v45 = vpop.f32.mrf.mxu1 }
 0x143   : > { %v1897_v51 = vpop.f32.mrf.mxu0  ;;  %v1226_v45 = vadd.f32 %v1889_v22, %v2652_v5  ;;  %v2698_v5 = vld [vmem:[%s2753_s3] ss:$0 sm:$0xff] }
 0x144   : > { %v1961_v57 = vpop.f32.mrf.mxu1 }
 0x145   : > { %v1899_v58 = vpop.f32.mrf.mxu0 }
 0x146   : > { %v2681_v50 = vpop.f32.mrf.mxu1 }
 0x147   : > { %v1900_v61 = vpop.f32.mrf.mxu0 }
 0x148   : > { %v2683_v46 = vpop.f32.mrf.mxu1 }
 0x149   : > { %v1902_v8 = vpop.f32.mrf.mxu0 }
 0x14a   : > { %v1966_v59 = vpop.f32.mrf.mxu1 }
 0x14b   : > { %v1903_v24 = vpop.f32.mrf.mxu0 }
 0x14c   : > { %v1967_v6 = vpop.f32.mrf.mxu1  ;;  %v1901_v24 = vadd.f32 %v1900_v61, %v1899_v58 }
 0x14d   : > { %v1905_v42 = vpop.f32.mrf.mxu0 }
 0x14e   : > { %v1969_v17 = vpop.f32.mrf.mxu1 }
 0x14f   : > { %v1906_v53 = vpop.f32.mrf.mxu0 }
 0x150   : > { %v1970_v36 = vpop.f32.mrf.mxu1  ;;  %v1907_v18 = vadd.f32 %v1906_v53, %v1905_v42 }
 0x151   : > { %v1908_v55 = vpop.f32.mrf.mxu0  ;;  %v1971_v57 = vadd.f32 %v1970_v36, %v1969_v17  ;;  %v1315_v36 = vadd.f32 %v1953_v35, %v1226_v45 }
 0x152   : > { %v1972_v52 = vpop.f32.mrf.mxu1  ;;  %v1247_v33 = vadd.f32 %v1907_v18, %v2658_v49 }
 0x153   : > { %v1909_v56 = vpop.f32.mrf.mxu0 }
 0x154   : > { %v1973_v54 = vpop.f32.mrf.mxu1  ;;  %v1336_v8 = vadd.f32 %v1971_v57, %v1247_v33 }
 0x155   : > { %v1911_v27 = vpop.f32.mrf.mxu0  ;;  %v1895_v54 = vadd.f32 %v2679_v47, %v2677_v44 }
 0x156   : > { %v1975_v13 = vpop.f32.mrf.mxu1 }
 0x157   : > { %v1912_v0 = vpop.f32.mrf.mxu0 }
 0x158   : > { %v1976_v60 = vpop.f32.mrf.mxu1  ;;  %v1913_v14 = vadd.f32 %v1912_v0, %v1911_v27 }
 0x159   : > { %v1914_v2 = vpop.f32.mrf.mxu0  ;;  %v1977_v37 = vadd.f32 %v1976_v60, %v1975_v13  ;;  %v1240_v60 = vadd.f32 %v1901_v24, %v2656_v34 }
 0x15a   : > { %v1978_v41 = vpop.f32.mrf.mxu1  ;;  %v1254_v23 = vadd.f32 %v1913_v14, %v2660_v26  ;;  %v1233_v2 = vadd.f32 %v1895_v54, %v2654_v20 }
 0x15b   : > { %v1915_v3 = vpop.f32.mrf.mxu0 }
 0x15c   : > { %v1979_v1 = vpop.f32.mrf.mxu1  ;;  %v1343_v48 = vadd.f32 %v1977_v37, %v1254_v23  ;;  %v1965_v3 = vadd.f32 %v2683_v46, %v2681_v50 }
 0x15d   : > { %v1917_v7 = vpop.f32.mrf.mxu0 }
 0x15e   : > { %v1981_v63 = vpop.f32.mrf.mxu1  ;;  %v1329_v20 = vadd.f32 %v1965_v3, %v1240_v60 }
 0x15f   : > { %v1918_v10 = vpop.f32.mrf.mxu0 }
 0x160   : > { %v1982_v4 = vpop.f32.mrf.mxu1  ;;  %v1919_v51 = vadd.f32 %v1918_v10, %v1917_v7 }
 0x161   : > { %v1920_v15 = vpop.f32.mrf.mxu0  ;;  %v1983_v27 = vadd.f32 %v1982_v4, %v1981_v63 }
 0x162   : > { %v1984_v9 = vpop.f32.mrf.mxu1  ;;  %v1261_v55 = vadd.f32 %v1919_v51, %v2662_v62 }
 0x163   : > { %v1921_v19 = vpop.f32.mrf.mxu0 }
 0x164   : > { %v1985_v12 = vpop.f32.mrf.mxu1  ;;  %v1350_v4 = vadd.f32 %v1983_v27, %v1261_v55 }
 0x165   : > { %v1923_v28 = vpop.f32.mrf.mxu0  ;;  %v1959_v12 = vadd.f32 %v2675_v43, %v2673_v39 }
 0x166   : > { %v1987_v16 = vpop.f32.mrf.mxu1 }
 0x167   : > { %v1924_v38 = vpop.f32.mrf.mxu0  ;;  %v1322_v22 = vadd.f32 %v1959_v12, %v1233_v2 }
 0x168   : > { %v1988_v21 = vpop.f32.mrf.mxu1  ;;  %v1925_v59 = vadd.f32 %v1924_v38, %v1923_v28 }
 0x169   : > { %v1926_v6 = vpop.f32.mrf.mxu0  ;;  %v1989_v41 = vadd.f32 %v1988_v21, %v1987_v16 }
 0x16a   : > { %v1990_v29 = vpop.f32.mrf.mxu1  ;;  %v1268_v25 = vadd.f32 %v1925_v59, %v2664_v11 }
 0x16b   : > { %v1927_v42 = vpop.f32.mrf.mxu0 }
 0x16c   : > { %v1991_v40 = vpop.f32.mrf.mxu1  ;;  %v1357_v34 = vadd.f32 %v1989_v41, %v1268_v25 }
 0x16d   : > { %v2027_v30 = vpop.f32.mrf.mxu0 }
 0x16e   : > { %v2035_v26 = vpop.f32.mrf.mxu1  ;;  %v1404_v61 = vadd.f32 %v2027_v30, %v1315_v36 }
 0x16f   : > { %v1432_v49 = vadd.f32 %v2035_v26, %v1343_v48  ;;  %v1396_v0 = vpop.f32.mrf.mxu0 }
 0x170   : > { %v1424_v17 = vpop.f32.mrf.mxu1  ;;  %v1459_v44 = vmul.f32 %v2691_v32, %v1404_v61  ;;  %v1397_v11 = vadd.f32 %v1396_v0, %v2671_v31 }
 0x171   : > { %v1463_v52 = vmul.f32 %v2691_v32, %v1432_v49  ;;  %v1425_v53 = vadd.f32 %v1424_v17, %v1336_v8  ;;  %v2028_v7 = vpop.f32.mrf.mxu0 }
 0x172   : > { %v2036_v58 = vpop.f32.mrf.mxu1  ;;  %v2720_v9 = vadd.f32 %v2698_v5, %v1459_v44  ;;  %v1458_v10 = vmul.f32 %v2691_v32, %v1397_v11 }
 0x173   : > { %v2706_v13 = vadd.f32 %v2698_v5, %v1463_v52  ;;  %v1462_v56 = vmul.f32 %v2691_v32, %v1425_v53  ;;  %v1399_v14 = vpop.f32.mrf.mxu0 }
 0x174   : > { %v1427_v1 = vpop.f32.mrf.mxu1  ;;  %v1704_v50 = vmul.f32 -1.442695, %v2720_v9  ;;  %v2728_v46 = vadd.f32 %v2698_v5, %v1458_v10 }
 0x175   : > { %v1708_v62 = vmul.f32 -1.442695, %v2706_v13  ;;  %v2714_v47 = vadd.f32 %v2698_v5, %v1462_v56  ;;  %v2031_v19 = vpop.f32.mrf.mxu0 }
 0x176   : > { %v2039_v63 = vpop.f32.mrf.mxu1  ;;  %v1703_v28 = vmul.f32 -1.442695, %v2728_v46  ;;  %v1418_v39 = vadd.f32 %v2031_v19, %v1329_v20 }
 0x177   : > { %2151 = vpow2.f32 %v1708_v62  ;;  %v1707_v31 = vmul.f32 -1.442695, %v2714_v47  ;;  %v1446_v15 = vadd.f32 %v2039_v63, %v1357_v34  ;;  %v1410_v33 = vpop.f32.mrf.mxu0 }
 0x178   : > { %v1438_v16 = vpop.f32.mrf.mxu1  ;;  %v1461_v38 = vmul.f32 %v2691_v32, %v1418_v39  ;;  %v1411_v40 = vadd.f32 %v1410_v33, %v1322_v22 }
 0x179   : > { %2153 = vpow2.f32 %v1707_v31  ;;  %v1439_v18 = vadd.f32 %v1438_v16, %v1350_v4  ;;  %v1465_v21 = vmul.f32 %v2691_v32, %v1446_v15  ;;  %v2032_v48 = vpop.f32.mrf.mxu0 }
 0x17a   : > { %v2040_v23 = vpop.f32.mrf.mxu1  ;;  %2155 = vpow2.f32 %v1704_v50  ;;  %v1476_v51 = vadd.f32 %v2698_v5, %v1461_v38  ;;  %v1460_v59 = vmul.f32 %v2691_v32, %v1411_v40 }
 0x17b   : > { %v1464_v43 = vmul.f32 %v2691_v32, %v1439_v18  ;;  %v1480_v29 = vadd.f32 %v2698_v5, %v1465_v21  ;;  %2157 = vpow2.f32 %v1703_v28  ;;  %v1413_v26 = vpop.f32.mrf.mxu0 }
 0x17c   : > { %v1441_v37 = vpop.f32.mrf.mxu1  ;;  %v1706_v35 = vmul.f32 -1.442695, %v1476_v51  ;;  %v1475_v49 = vadd.f32 %v2698_v5, %v1460_v59 }
 0x17d   : > { %v1479_v45 = vadd.f32 %v2698_v5, %v1464_v43  ;;  %v1710_v57 = vmul.f32 -1.442695, %v1480_v29 }
 0x17e   : > { %v1705_v8 = vmul.f32 -1.442695, %v1475_v49 }
 0x17f   : > { %v1709_v6 = vmul.f32 -1.442695, %v1479_v45  ;;  %2159 = vpow2.f32 %v1710_v57 }
 0x181   : > { %2161 = vpow2.f32 %v1709_v6 }
 0x182   : > { %2163 = vpow2.f32 %v1706_v35 }
 0x183   : > { %2165 = vpow2.f32 %v1705_v8 }
 0x184   : > { %v2152_v24 = vpop.eup %2151 }
 0x185   : > { %v1510_v42 = vadd.f32 1.0, %v2152_v24 }
 0x186   : > { %v2154_v17 = vpop.eup %2153 }
 0x187   : > { %2167 = vrcp.f32 %v1510_v42  ;;  %v1509_v36 = vadd.f32 1.0, %v2154_v17  ;;  %v2156_v52 = vpop.eup %2155 }
 0x188   : > { %v1506_v53 = vadd.f32 1.0, %v2156_v52  ;;  %v2158_v54 = vpop.eup %2157 }
 0x189   : > { %2169 = vrcp.f32 %v1509_v36  ;;  %v1505_v32 = vadd.f32 1.0, %v2158_v54 }
 0x18a   : > { %2171 = vrcp.f32 %v1506_v53 }
 0x18b   : > { %2173 = vrcp.f32 %v1505_v32 }
 0x18c   : > { %v2160_v55 = vpop.eup %2159 }
 0x18d   : > { %v1512_v5 = vadd.f32 1.0, %v2160_v55 }
 0x18e   : > { %v2162_v25 = vpop.eup %2161 }
 0x18f   : > { %v1511_v30 = vadd.f32 1.0, %v2162_v25  ;;  %v2164_v58 = vpop.eup %2163  ;;  %2175 = vrcp.f32 %v1512_v5 }
 0x190   : > { %v1508_v61 = vadd.f32 1.0, %v2164_v58  ;;  %v2166_v56 = vpop.eup %2165 }
 0x191   : > { %2177 = vrcp.f32 %v1511_v30  ;;  %v1507_v60 = vadd.f32 1.0, %v2166_v56 }
 0x192   : > { %2179 = vrcp.f32 %v1508_v61 }
 0x193   : > { %2181 = vrcp.f32 %v1507_v60 }
 0x194   : > { %v2168_v27 = vpop.eup %2167 }
 0x195   : > { %v1534_v0 = vmul.f32 %v2168_v27, %v2706_v13 }
 0x196   : > { %v2170_v41 = vpop.eup %2169 }
 0x197   : > { %v1533_v1 = vmul.f32 %v2170_v41, %v2714_v47  ;;  %v2172_v44 = vpop.eup %2171 }
 0x198   : > { %v2174_v11 = vpop.eup %2173  ;;  %v1530_v2 = vmul.f32 %v2172_v44, %v2720_v9 }
 0x199   : > { %v1727_v62 = vpack.c.bf16 %v1534_v0, %v1533_v1  ;;  %v1529_v3 = vmul.f32 %v2174_v11, %v2728_v46 }
 0x19b   : > { %1735 = vst [vmem:[%s197_s30 + $0x10] sm:$0xff] %v1727_v62   ;;  %v1717_v34 = vpack.c.bf16 %v1530_v2, %v1529_v3 }
 0x19c   : > { %v2176_v7 = vpop.eup %2175 }
 0x19d   : > { %1718 = vst [vmem:[%s197_s30] sm:$0xff] %v1717_v34   ;;  %v1536_v4 = vmul.f32 %v2176_v7, %v1480_v29 }
 0x19e   : > { %v2178_v63 = vpop.eup %2177 }
 0x19f   : > { %v1535_v13 = vmul.f32 %v2178_v63, %v1479_v45  ;;  %v2180_v10 = vpop.eup %2179 }
 0x1a0   : > { %v2182_v31 = vpop.eup %2181  ;;  %v1532_v12 = vmul.f32 %v2180_v10, %v1476_v51 }
 0x1a1   : > { %v1732_v47 = vpack.c.bf16 %v1536_v4, %v1535_v13  ;;  %v1531_v14 = vmul.f32 %v2182_v31, %v1475_v49 }
 0x1a3   : > { %1736 = vst [vmem:[%s197_s30 + $0x18] sm:$0xff] %v1732_v47   ;;  %v1722_v20 = vpack.c.bf16 %v1532_v12, %v1531_v14 }
 0x1a5   : > { %1734 = vst [vmem:[%s197_s30 + $0x8] sm:$0xff] %v1722_v20  }
 0x1a6 PF: > { %s14_s15 = sadd.s32 1, %s2189_s15  }
 0x1a7   : > { %p11_p4 = scmp.ge.s32.totalorder %s14_s15, 4  }
 0x1a9   :  { %13 = sbr.rel (!%p11_p4) target bundleno = 1 (0x1), region = 66 }

// kernel: c2f_ema_forward.9
= control target key start
LH: loop header
LB: loop body
LE: loop exit
PB: predicated region body
PF: predicated region fallthrough
CT: control target
= control target key end

     0   :  { %s1179_s21 = smov 0   ;;  %s1181_s22 = smov 0   ;;  %s1301_s0 = inlined_call_operand.vmem [shape: bf16[128,128], index: 0, kind: input, shape index: {}]   ;;  %s1302_s1 = inlined_call_operand.vmem [shape: bf16[128,128], index: 1, kind: input, shape index: {}]   ;;  %s1303_s2 = inlined_call_operand.vmem [shape: bf16[128,128], index: 2, kind: input, shape index: {}]   ;;  %s1304_s3 = inlined_call_operand.vmem [shape: bf16[128,128], index: 3, kind: input, shape index: {}]   ;;  %s1305_s4 = inlined_call_operand.vmem [shape: f32[1,128], index: 4, kind: input, shape index: {}]   ;;  %s1306_s5 = inlined_call_operand.vmem [shape: f32[1,128], index: 5, kind: input, shape index: {}]   ;;  %s1307_s6 = inlined_call_operand.vmem [shape: f32[128,128], index: 6, kind: output, shape index: {}]  }
   0x1   :  { %s1183_s23 = smov 0  }
   0x2 LB: > { %s28_s24 = sadd.s32 1, %s1138_s22  ;;  %p925_p0 = scmp.ge.s32.totalorder %s1142_s23, 1  ;;  %s1142_s23 = sphi %s1183_s23, %s16_s23   ;;  %s1138_s22 = sphi %s1181_s22, %s1309_s22   ;;  %s1134_s21 = sphi %s1179_s21, %s1308_s21  }
   0x3   : > { %p30_p1 = scmp.ge.s32.totalorder %s28_s24, 2  ;;  %p272_p2 = scmp.lt.s32.totalorder %s1142_s23, 3 }
   0x5   : > { %s1311_s24 = smov (%p30_p1, %s28_s24), 0  ;;  %p273_p3 = pnand %p925_p0, %p272_p2 }
   0x6   : > { %s926_s27 = sshll.u32 (!%p273_p3), %s1134_s21, 3 }
   0x7   : > { %276 = sbr.rel (%p273_p3) target bundleno = 294 (0x126), region = 44  ;;  %p325_p4 = scmp.lt.s32.totalorder (!%p273_p3), %s926_s27, 15 }
   0xc   : > { %v1064_v0 = vld [vmem:[%s1304_s3 + $0x38] sm:$0xff]   ;;  %v1066_v2 = vld [vmem:[%s1304_s3 + $0x30] sm:$0xff]   ;;  %v1068_v4 = vld [vmem:[%s1304_s3 + $0x28] sm:$0xff]   ;;  %s1313_s27 = smov (!%p325_p4, %s926_s27), 15 }
   0xd   : > { %v1065_v1 = vld [vmem:[%s1303_s2 + $0x38] sm:$0xff]   ;;  %992 = vmatprep.subr.bf16.mxu0 %v1064_v0  ;;  %v1067_v3 = vld [vmem:[%s1303_s2 + $0x30] sm:$0xff]   ;;  %v1069_v5 = vld [vmem:[%s1303_s2 + $0x28] sm:$0xff]   ;;  %s927_s18 = sshll.u32 %s1313_s27, 2 }
   0xe   : > { %1016 = vmatprep.subr.bf16.mxu1 %v1065_v1  ;;  %993 = vmatpush3.bf16.msra.mxu0 %v1064_v0  ;;  %v1070_v6 = vld [vmem:[%s1304_s3 + $0x20] sm:$0xff]   ;;  %v1072_v8 = vld [vmem:[%s1304_s3 + $0x18] sm:$0xff]   ;;  %s1233_s29 = scalar_lea.vmem %s1302_s1, %s927_s18  ;;  %v1074_v10 = vld [vmem:[%s1304_s3 + $0x10] sm:$0xff]   ;;  %s1241_s10 = scalar_lea.vmem %s1301_s0, %s927_s18 }
   0xf   : > { %1017 = vmatpush3.bf16.msra.mxu1 %v1065_v1  ;;  %994 = vmatprep.subr.bf16.mxu0 %v1066_v2  ;;  %v1071_v7 = vld [vmem:[%s1303_s2 + $0x20] sm:$0xff]   ;;  %v1073_v9 = vld [vmem:[%s1303_s2 + $0x18] sm:$0xff]   ;;  %v1075_v11 = vld [vmem:[%s1303_s2 + $0x10] sm:$0xff]  }
  0x10   : > { %1018 = vmatprep.subr.bf16.mxu1 %v1067_v3  ;;  %v1080_v12 = vld [vmem:[%s1233_s29] sm:$0xff]   ;;  %v1076_v14 = vld [vmem:[%s1304_s3 + $0x8] sm:$0xff]   ;;  %v1084_v20 = vld [vmem:[%s1233_s29 + $0x10] sm:$0xff]  }
  0x11   : > { %v1081_v13 = vld [vmem:[%s1241_s10] sm:$0xff]   ;;  %1008 = vmatprep.mubr.bf16.mxu0 %v1080_v12  ;;  %v1077_v15 = vld [vmem:[%s1303_s2 + $0x8] sm:$0xff]   ;;  %v1085_v21 = vld [vmem:[%s1241_s10 + $0x10] sm:$0xff]  }
  0x12   : > { %995 = vmatpush3.bf16.msra.mxu0 %v1066_v2  ;;  %1032 = vmatprep.mubr.bf16.mxu1 %v1081_v13  ;;  %v1078_v16 = vld [vmem:[%s1304_s3] sm:$0xff]   ;;  %v1082_v18 = vld [vmem:[%s1233_s29 + $0x8] sm:$0xff]   ;;  %v1086_v22 = vld [vmem:[%s1233_s29 + $0x18] sm:$0xff]   ;;  %s931_s29 = sshll.u32 %s1313_s27, 3 }
  0x13   : > { %1019 = vmatpush3.bf16.msra.mxu1 %v1067_v3  ;;  %996 = vmatprep.subr.bf16.mxu0 %v1068_v4  ;;  %v1079_v17 = vld [vmem:[%s1303_s2] sm:$0xff]   ;;  %v1083_v19 = vld [vmem:[%s1241_s10 + $0x8] sm:$0xff]   ;;  %v1087_v23 = vld [vmem:[%s1241_s10 + $0x18] sm:$0xff]   ;;  %s357_s8 = scalar_lea.vmem %s1307_s6, %s931_s29 }
  0x14   : > { %1020 = vmatprep.subr.bf16.mxu1 %v1069_v5  ;;  %v956_v26 = vld [vmem:[%s1305_s4] ss:$0 sm:$0xff] }
  0x15   : > { %v957_v29 = vld [vmem:[%s1306_s5] ss:$0 sm:$0xff] }
  0x16   : > { %997 = vmatpush3.bf16.msra.mxu0 %v1068_v4 }
  0x17   : > { %1021 = vmatpush3.bf16.msra.mxu1 %v1069_v5  ;;  %998 = vmatprep.subr.bf16.mxu0 %v1070_v6 }
  0x18   : > { %1022 = vmatprep.subr.bf16.mxu1 %v1071_v7 }
  0x1a   : > { %999 = vmatpush3.bf16.msra.mxu0 %v1070_v6 }
  0x1b   : > { %1023 = vmatpush3.bf16.msra.mxu1 %v1071_v7  ;;  %1000 = vmatprep.subr.bf16.mxu0 %v1072_v8 }
  0x1c   : > { %1024 = vmatprep.subr.bf16.mxu1 %v1073_v9 }
  0x1e   : > { %1001 = vmatpush3.bf16.msra.mxu0 %v1072_v8 }
  0x1f   : > { %1025 = vmatpush3.bf16.msra.mxu1 %v1073_v9  ;;  %1002 = vmatprep.subr.bf16.mxu0 %v1074_v10 }
  0x20   : > { %1026 = vmatprep.subr.bf16.mxu1 %v1075_v11 }
  0x22   : > { %1003 = vmatpush3.bf16.msra.mxu0 %v1074_v10 }
  0x23   : > { %1027 = vmatpush3.bf16.msra.mxu1 %v1075_v11  ;;  %1004 = vmatprep.subr.bf16.mxu0 %v1076_v14 }
  0x24   : > { %1028 = vmatprep.subr.bf16.mxu1 %v1077_v15 }
  0x26   : > { %1005 = vmatpush3.bf16.msra.mxu0 %v1076_v14 }
  0x27   : > { %1029 = vmatpush3.bf16.msra.mxu1 %v1077_v15  ;;  %1006 = vmatprep.subr.bf16.mxu0 %v1078_v16 }
  0x28   : > { %1030 = vmatprep.subr.bf16.mxu1 %v1079_v17 }
  0x2a   : > { %1007 = vmatpush3.bf16.msra.mxu0 %v1078_v16 }
  0x2b   : > { %1031 = vmatpush3.bf16.msra.mxu1 %v1079_v17 }
  0x2d   : > { %1009 = vmatmul.mubr.bf16.vlgmr.msra.gmra.mxu0 %v1082_v18 }
  0x2e   : > { %1033 = vmatmul.mubr.bf16.vlgmr.msra.gmra.mxu1 %v1083_v19  ;;  %1012 = vmatprep.mubr.bf16.mxu0 %v1084_v20 }
  0x2f   : > { %1036 = vmatprep.mubr.bf16.mxu1 %v1085_v21 }
  0x35   : > { %1013 = vmatmul.mubr.bf16.gmra.mxu0 %v1086_v22 }
  0x36   : > { %1037 = vmatmul.mubr.bf16.gmra.mxu1 %v1087_v23 }
  0xed   : > { %v1010_v24 = vpop.f32.mrf.mxu0 }
  0xee   : > { %v1034_v25 = vpop.f32.mrf.mxu1 }
  0xef   : > { %v660_v27 = vadd.f32 %v1034_v25, %v1010_v24  ;;  %v514_v28 = vpop.f32.mrf.mxu0 }
  0xf0   : > { %v651_v30 = vpop.f32.mrf.mxu1 }
  0xf1   : > { %v691_v31 = vmul.f32 %v956_v26, %v660_v27  ;;  %v652_v32 = vadd.f32 %v651_v30, %v514_v28  ;;  %v1011_v33 = vpop.f32.mrf.mxu0 }
  0xf2   : > { %v1035_v34 = vpop.f32.mrf.mxu1 }
  0xf3   : > { %v1272_v35 = vadd.f32 %v957_v29, %v691_v31  ;;  %v689_v36 = vmul.f32 %v956_v26, %v652_v32  ;;  %v663_v37 = vadd.f32 %v1035_v34, %v1011_v33  ;;  %v517_v38 = vpop.f32.mrf.mxu0 }
  0xf4   : > { %v654_v39 = vpop.f32.mrf.mxu1 }
  0xf5   : > { %v960_v40 = vmul.f32 -1.442695, %v1272_v35  ;;  %v1275_v41 = vadd.f32 %v957_v29, %v689_v36  ;;  %v692_v42 = vmul.f32 %v956_v26, %v663_v37  ;;  %v655_v43 = vadd.f32 %v654_v39, %v517_v38  ;;  %v1014_v44 = vpop.f32.mrf.mxu0 }
  0xf6   : > { %v1038_v45 = vpop.f32.mrf.mxu1 }
  0xf7   : > { %1088 = vpow2.f32 %v960_v40  ;;  %v958_v46 = vmul.f32 -1.442695, %v1275_v41  ;;  %v1278_v47 = vadd.f32 %v957_v29, %v692_v42  ;;  %v690_v48 = vmul.f32 %v956_v26, %v655_v43  ;;  %v530_v49 = vpop.f32.mrf.mxu0 }
  0xf8   : > { %v676_v50 = vadd.f32 %v1038_v45, %v1014_v44  ;;  %v667_v51 = vpop.f32.mrf.mxu1 }
  0xf9   : > { %1090 = vpow2.f32 %v958_v46  ;;  %v961_v52 = vmul.f32 -1.442695, %v1278_v47  ;;  %v1281_v53 = vadd.f32 %v957_v29, %v690_v48  ;;  %v668_v54 = vadd.f32 %v667_v51, %v530_v49  ;;  %v1015_v55 = vpop.f32.mrf.mxu0 }
  0xfa   : > { %v695_v56 = vmul.f32 %v956_v26, %v676_v50  ;;  %v1039_v57 = vpop.f32.mrf.mxu1 }
  0xfb   : > { %1092 = vpow2.f32 %v961_v52  ;;  %v959_v58 = vmul.f32 -1.442695, %v1281_v53  ;;  %v693_v59 = vmul.f32 %v956_v26, %v668_v54  ;;  %v679_v60 = vadd.f32 %v1039_v57, %v1015_v55  ;;  %v533_v61 = vpop.f32.mrf.mxu0 }
  0xfc   : > { %v710_v62 = vadd.f32 %v957_v29, %v695_v56  ;;  %v670_v63 = vpop.f32.mrf.mxu1 }
  0xfd   : > { %1094 = vpow2.f32 %v959_v58  ;;  %v708_v0 = vadd.f32 %v957_v29, %v693_v59  ;;  %v696_v1 = vmul.f32 %v956_v26, %v679_v60  ;;  %v671_v2 = vadd.f32 %v670_v63, %v533_v61 }
  0xfe   : > { %v964_v3 = vmul.f32 -1.442695, %v710_v62 }
  0xff   : > { %v962_v4 = vmul.f32 -1.442695, %v708_v0  ;;  %v711_v5 = vadd.f32 %v957_v29, %v696_v1  ;;  %v694_v6 = vmul.f32 %v956_v26, %v671_v2 }
 0x100   : > { %1096 = vpow2.f32 %v964_v3 }
 0x101   : > { %1098 = vpow2.f32 %v962_v4  ;;  %v965_v7 = vmul.f32 -1.442695, %v711_v5  ;;  %v709_v8 = vadd.f32 %v957_v29, %v694_v6 }
 0x103   : > { %1100 = vpow2.f32 %v965_v7  ;;  %v963_v9 = vmul.f32 -1.442695, %v709_v8 }
 0x104   : > { %v1089_v10 = vpop.eup %1088 }
 0x105   : > { %v738_v11 = vadd.f32 1.0, %v1089_v10  ;;  %1102 = vpow2.f32 %v963_v9 }
 0x106   : > { %v1091_v12 = vpop.eup %1090 }
 0x107   : > { %1104 = vrcp.f32 %v738_v11  ;;  %v736_v13 = vadd.f32 1.0, %v1091_v12 }
 0x108   : > { %v1093_v14 = vpop.eup %1092 }
 0x109   : > { %1106 = vrcp.f32 %v736_v13  ;;  %v739_v15 = vadd.f32 1.0, %v1093_v14 }
 0x10a   : > { %v1095_v16 = vpop.eup %1094 }
 0x10b   : > { %1108 = vrcp.f32 %v739_v15  ;;  %v737_v17 = vadd.f32 1.0, %v1095_v16 }
 0x10d   : > { %v1097_v18 = vpop.eup %1096  ;;  %1110 = vrcp.f32 %v737_v17 }
 0x10e   : > { %v1099_v19 = vpop.eup %1098  ;;  %v742_v20 = vadd.f32 1.0, %v1097_v18 }
 0x10f   : > { %v740_v21 = vadd.f32 1.0, %v1099_v19 }
 0x110   : > { %v1101_v22 = vpop.eup %1100  ;;  %1112 = vrcp.f32 %v742_v20 }
 0x111   : > { %1114 = vrcp.f32 %v740_v21  ;;  %v743_v23 = vadd.f32 1.0, %v1101_v22 }
 0x112   : > { %v1103_v24 = vpop.eup %1102 }
 0x113   : > { %1116 = vrcp.f32 %v743_v23  ;;  %v741_v25 = vadd.f32 1.0, %v1103_v24 }
 0x114   : > { %v1105_v26 = vpop.eup %1104 }
 0x115   : > { %v762_v27 = vmul.f32 %v1105_v26, %v1272_v35  ;;  %1118 = vrcp.f32 %v741_v25 }
 0x116   : > { %v1107_v28 = vpop.eup %1106 }
 0x117   : > { %770 = vst [vmem:[%s357_s8 + $0x10] sm:$0xff] %v762_v27  ;;  %v760_v29 = vmul.f32 %v1107_v28, %v1275_v41 }
 0x118   : > { %v1109_v30 = vpop.eup %1108 }
 0x119   : > { %768 = vst [vmem:[%s357_s8] sm:$0xff] %v760_v29  ;;  %v763_v31 = vmul.f32 %v1109_v30, %v1278_v47 }
 0x11a   : > { %v1111_v32 = vpop.eup %1110 }
 0x11b   : > { %771 = vst [vmem:[%s357_s8 + $0x18] sm:$0xff] %v763_v31  ;;  %v761_v33 = vmul.f32 %v1111_v32, %v1281_v53 }
 0x11d   : > { %v1113_v34 = vpop.eup %1112  ;;  %769 = vst [vmem:[%s357_s8 + $0x8] sm:$0xff] %v761_v33 }
 0x11e   : > { %v1115_v36 = vpop.eup %1114  ;;  %v766_v37 = vmul.f32 %v1113_v34, %v710_v62 }
 0x11f   : > { %v764_v38 = vmul.f32 %v1115_v36, %v708_v0 }
 0x120   : > { %v1117_v39 = vpop.eup %1116  ;;  %774 = vst [vmem:[%s357_s8 + $0x30] sm:$0xff] %v766_v37 }
 0x121   : > { %772 = vst [vmem:[%s357_s8 + $0x20] sm:$0xff] %v764_v38  ;;  %v767_v35 = vmul.f32 %v1117_v39, %v711_v5 }
 0x122   : > { %v1119_v40 = vpop.eup %1118 }
 0x123   : > { %775 = vst [vmem:[%s357_s8 + $0x38] sm:$0xff] %v767_v35  ;;  %v765_v41 = vmul.f32 %v1119_v40, %v709_v8 }
 0x125   : > { %773 = vst [vmem:[%s357_s8 + $0x28] sm:$0xff] %v765_v41 }
 0x126 PF: > { %s16_s23 = sadd.s32 1, %s1142_s23   ;;  %s1308_s21 = smov %s1138_s22 }
 0x127   : > { %p13_p5 = scmp.ge.s32.totalorder %s16_s23, 4   ;;  %s1309_s22 = smov %s1311_s24 }
 0x129   :  { %15 = sbr.rel (!%p13_p5) target bundleno = 2 (0x2), region = 89 }

// kernel: c2f_ema_forward.7
= control target key start
LH: loop header
LB: loop body
LE: loop exit
PB: predicated region body
PF: predicated region fallthrough
CT: control target
= control target key end

     0   :  { %s4089_s27 = smov 0   ;;  %s5111_s0 = inlined_call_operand.vmem [shape: bf16[2,176,128], index: 0, kind: input, shape index: {}]   ;;  %s5112_s1 = inlined_call_operand.vmem [shape: bf16[128,128], index: 1, kind: input, shape index: {}]   ;;  %s5113_s2 = inlined_call_operand.vmem [shape: f32[1,128], index: 2, kind: input, shape index: {}]   ;;  %s5114_s3 = inlined_call_operand.vmem [shape: f32[1,128], index: 3, kind: input, shape index: {}]   ;;  %s5115_s4 = inlined_call_operand.vmem [shape: f32[1,128], index: 4, kind: input, shape index: {}]   ;;  %s5116_s5 = inlined_call_operand.vmem [shape: bf16[9,128,128], index: 5, kind: input, shape index: {}]   ;;  %s5117_s6 = inlined_call_operand.vmem [shape: f32[1,128], index: 6, kind: input, shape index: {}]   ;;  %s5118_s7 = inlined_call_operand.vmem [shape: bf16[128,128], index: 7, kind: input, shape index: {}]   ;;  %s5119_s8 = inlined_call_operand.vmem [shape: bf16[2,8,8,128], index: 8, kind: output, shape index: {}]  }
   0x1 LB: > { %s3095_s28 = sadd.s32 4294967295, %s4039_s27   ;;  %p3099_p0 = scmp.ge.s32.totalorder %s4039_s27, 1  ;;  %s4039_s27 = sphi %s4089_s27, %s18_s27  }
   0x2   : > { %p262_p1 = scmp.lt.s32.totalorder %s4039_s27, 3 }
   0x4   : > { %p263_p2 = pnand %p3099_p0, %p262_p1 }
   0x6   : > { %266 = sbr.rel (%p263_p2) target bundleno = 485 (0x1e5), region = 52 }
   0xb   : > { %v3891_v0 = vld [vmem:[%s5112_s1 + $0x38] sm:$0xff]   ;;  %v4041_v1 = vmov 0.0   ;;  %v3892_v2 = vld [vmem:[%s5112_s1 + $0x30] sm:$0xff]   ;;  %p296_p3 = scmp.lt.s32.totalorder %s3095_s28, 1  ;;  %vm4042_vm0 = vmmov 0   ;;  %v3893_v3 = vld [vmem:[%s5112_s1 + $0x28] sm:$0xff]  }
   0xc   : > { %3555 = vmatprep.subr.bf16.mxu1 %v4041_v1  ;;  %3535 = vmatprep.subr.bf16.mxu0 %v4041_v1  ;;  %v3894_v4 = vld [vmem:[%s5112_s1 + $0x20] sm:$0xff]   ;;  %vm454_vm1 = vcmask 1047553   ;;  %vm470_vm2 = vcmask 1040384   ;;  %vm364_vm3 = vcmask 1046528   ;;  %v3895_v29 = vld [vmem:[%s5112_s1 + $0x18] sm:$0xff]   ;;  %v3896_v42 = vld [vmem:[%s5112_s1 + $0x10] sm:$0xff]  }
   0xd   : > { %3556 = vmatpush3.bf16.msra.mxu1 %v3891_v0  ;;  %3536 = vmatpush3.bf16.msra.mxu0 %v3891_v0  ;;  %s5147_s28 = smov (!%p296_p3, %s3095_s28), 1  ;;  %v3897_v59 = vld [vmem:[%s5112_s1 + $0x8] sm:$0xff]   ;;  %vm534_vm4 = vcmask 1041409   ;;  %vm536_vm5 = vcmask 1042434   ;;  %vm538_vm6 = vcmask 1043459   ;;  %vm540_vm7 = vcmask 1044484  }
   0xe   : > { %3557 = vmatprep.subr.bf16.mxu1 %v4041_v1  ;;  %3537 = vmatprep.subr.bf16.mxu0 %v4041_v1  ;;  %s3879_s12 = smul.u32 88, %s5147_s28  ;;  %vm542_vm8 = vcmask 1045509   ;;  %vm544_vm9 = vcmask 1046534   ;;  %vm1279_vm10 = vsmask.f32 7424  ;;  %vm546_vm11 = vcmask 1047559  }
   0xf   : > { %3571 = vmatprep.mubr.msk.bf16.mxu1 %vm4042_vm0, %v4041_v1  ;;  %3551 = vmatprep.mubr.msk.bf16.mxu0 %vm4042_vm0, %v4041_v1  ;;  %vm2909_vm12 = vsmask.f32 3328  ;;  %vm2910_vm13 = vsmask.f32 7440  ;;  %s3356_s16 = sshll.u32 %s5147_s28, 5 }
  0x10   : > { %s4123_s17 = scalar_lea.vmem %s5111_s0, %s3879_s12  ;;  %vm5063_vm14 = vmor %vm2909_vm12, %vm2910_vm13  ;;  %s5070_s20 = scalar_lea.vmem %s5119_s8, %s3356_s16 }
  0x11   : > { %3558 = vmatpush3.bf16.msra.mxu1 %v3892_v2  ;;  %3538 = vmatpush3.bf16.msra.mxu0 %v3892_v2  ;;  %v4126_v5 = vld [vmem:[%s4123_s17 + $0x8] sm:$0xff]   ;;  %v4129_v6 = vld [vmem:[%s4123_s17 + $0x10] sm:$0xff]   ;;  %v4132_v7 = vld [vmem:[%s4123_s17 + $0x18] sm:$0xff]  }
  0x12   : > { %3559 = vmatprep.subr.bf16.mxu1 %v4041_v1  ;;  %3539 = vmatprep.subr.bf16.mxu0 %v4041_v1  ;;  %v4135_v8 = vld [vmem:[%s4123_s17 + $0x20] sm:$0xff]   ;;  %v4138_v9 = vld [vmem:[%s4123_s17 + $0x28] sm:$0xff]   ;;  %v4141_v10 = vld [vmem:[%s4123_s17 + $0x30] sm:$0xff]   ;;  %v4144_v11 = vunpack.c.l.bf16 %v4126_v5  ;;  %v4147_v12 = vunpack.c.h.bf16 %v4126_v5  ;;  %v4150_v13 = vunpack.c.l.bf16 %v4129_v6  ;;  %v4164_v17 = vunpack.c.h.bf16 %v4129_v6 }
  0x13   : > { %v4155_v14 = vld [vmem:[%s4123_s17 + $0x38] sm:$0xff]   ;;  %v4158_v15 = vld [vmem:[%s4123_s17 + $0x40] sm:$0xf]  ;;  %v4161_v16 = vld [vmem:[%s4123_s17 + $0x44] sm:$0xf]  ;;  %v4167_v18 = vunpack.c.l.bf16 %v4132_v7  ;;  %v4170_v19 = vunpack.c.h.bf16 %v4132_v7  ;;  %v4173_v20 = vunpack.c.l.bf16 %v4135_v8  ;;  %v4176_v21 = vunpack.c.h.bf16 %v4135_v8 }
  0x14   : > { %5128 = vst [vmem:[#allocation2_spill] sm:$0xff] %v4144_v11  ;;  %5129 = vst [vmem:[#allocation3_spill] sm:$0xff] %v4147_v12  ;;  %v4179_v22 = vunpack.c.l.bf16 %v4138_v9  ;;  %v4182_v23 = vunpack.c.h.bf16 %v4138_v9  ;;  %v4185_v24 = vunpack.c.l.bf16 %v4141_v10  ;;  %v4188_v25 = vunpack.c.h.bf16 %v4141_v10 }
  0x15   : > { %3560 = vmatpush3.bf16.msra.mxu1 %v3893_v3  ;;  %3540 = vmatpush3.bf16.msra.mxu0 %v3893_v3  ;;  %5130 = vst [vmem:[#allocation4_spill] sm:$0xff] %v4167_v18  ;;  %5131 = vst [vmem:[#allocation5_spill] sm:$0xff] %v4170_v19  ;;  %v4191_v26 = vunpack.c.l.bf16 %v4155_v14  ;;  %v4194_v27 = vunpack.c.h.bf16 %v4155_v14  ;;  %v4197_v28 = vunpack.c.l.bf16 %v4158_v15  ;;  %v4203_v30 = vunpack.c.l.bf16 %v4161_v16 }
  0x16   : > { %3561 = vmatprep.subr.bf16.mxu1 %v4041_v1  ;;  %3541 = vmatprep.subr.bf16.mxu0 %v4041_v1  ;;  %5132 = vst [vmem:[#allocation6_spill] sm:$0xff] %v4173_v20  ;;  %5133 = vst [vmem:[#allocation7_spill] sm:$0xff] %v4176_v21  ;;  %v455_v31 = vsel %vm454_vm1, %v4144_v11, 0.0  ;;  %v456_v32 = vsel %vm454_vm1, %v4150_v13, 0.0  ;;  %v458_v33 = vsel %vm454_vm1, %v4167_v18, 0.0  ;;  %v460_v35 = vsel %vm454_vm1, %v4173_v20, 0.0 }
  0x17   : > { %5134 = vst [vmem:[#allocation8_spill] sm:$0xff] %v4191_v26  ;;  %5135 = vst [vmem:[#allocation9_spill] sm:$0xff] %v4194_v27  ;;  %v457_v34 = vadd.f32 %v456_v32, %v455_v31  ;;  %v462_v36 = vsel %vm454_vm1, %v4179_v22, 0.0  ;;  %v464_v37 = vsel %vm454_vm1, %v4185_v24, 0.0  ;;  %v466_v38 = vsel %vm454_vm1, %v4191_v26, 0.0 }
  0x18   : > { %v471_v39 = vsel %vm470_vm2, %v4147_v12, 0.0  ;;  %v472_v40 = vsel %vm470_vm2, %v4164_v17, 0.0  ;;  %v474_v41 = vsel %vm470_vm2, %v4170_v19, 0.0  ;;  %v468_v44 = vsel %vm454_vm1, %v4197_v28, 0.0 }
  0x19   : > { %3562 = vmatpush3.bf16.msra.mxu1 %v3894_v4  ;;  %3542 = vmatpush3.bf16.msra.mxu0 %v3894_v4  ;;  %v459_v43 = vadd.f32 %v458_v33, %v457_v34  ;;  %v473_v45 = vadd.f32 %v472_v40, %v471_v39  ;;  %v476_v46 = vsel %vm470_vm2, %v4176_v21, 0.0  ;;  %v478_v47 = vsel %vm470_vm2, %v4182_v23, 0.0  ;;  %v3898_v34 = vld [vmem:[%s5112_s1] sm:$0xff]  }
  0x1a   : > { %3563 = vmatprep.subr.bf16.mxu1 %v4041_v1  ;;  %3543 = vmatprep.subr.bf16.mxu0 %v4041_v1  ;;  %v480_v48 = vsel %vm470_vm2, %v4188_v25, 0.0  ;;  %v482_v49 = vsel %vm470_vm2, %v4194_v27, 0.0  ;;  %v484_v50 = vsel %vm470_vm2, %v4203_v30, 0.0  ;;  %v365_v53 = vrot.slane %v4144_v11, 1 }
  0x1b   : > { %v461_v51 = vadd.f32 %v460_v35, %v459_v43  ;;  %v475_v52 = vadd.f32 %v474_v41, %v473_v45  ;;  %v366_v54 = vrot.slane %v4147_v12, 1  ;;  %v368_v55 = vrot.slane %v4150_v13, 1  ;;  %v4278_v43 = vld [vmem:[%s5116_s5 + $0x38] sm:$0xff]  }
  0x1c   : > { %v369_v56 = vrot.slane %v4164_v17, 1  ;;  %v371_v57 = vrot.slane %v4167_v18, 1  ;;  %v372_v58 = vrot.slane %v4170_v19, 1  ;;  %v374_v63 = vrot.slane %v4173_v20, 1 }
  0x1d   : > { %3564 = vmatpush3.bf16.msra.mxu1 %v3895_v29  ;;  %3544 = vmatpush3.bf16.msra.mxu0 %v3895_v29  ;;  %v463_v60 = vadd.f32 %v462_v36, %v461_v51  ;;  %v477_v61 = vadd.f32 %v476_v46, %v475_v52  ;;  %v367_v62 = vsel %vm364_vm3, %v365_v53, %v366_v54  ;;  %v375_v3 = vrot.slane %v4176_v21, 1 }
  0x1e   : > { %3565 = vmatprep.subr.bf16.mxu1 %v4041_v1  ;;  %3545 = vmatprep.subr.bf16.mxu0 %v4041_v1  ;;  %v370_v0 = vsel %vm364_vm3, %v368_v55, %v369_v56  ;;  %v373_v2 = vsel %vm364_vm3, %v371_v57, %v372_v58  ;;  %v377_v4 = vrot.slane %v4179_v22, 1  ;;  %v378_v32 = vrot.slane %v4182_v23, 1 }
  0x1f   : > { %v465_v29 = vadd.f32 %v464_v37, %v463_v60  ;;  %v479_v31 = vadd.f32 %v478_v47, %v477_v61  ;;  %v380_v33 = vrot.slane %v4185_v24, 1  ;;  %v376_v35 = vsel %vm364_vm3, %v374_v63, %v375_v3  ;;  %v4273_v37 = vld [vmem:[%s5116_s5 + $0x78] sm:$0xff]  }
  0x20   : > { %v381_v36 = vrot.slane %v4188_v25, 1  ;;  %v383_v39 = vrot.slane %v4191_v26, 1  ;;  %v384_v40 = vrot.slane %v4194_v27, 1  ;;  %v379_v45 = vsel %vm364_vm3, %v377_v4, %v378_v32 }
  0x21   : > { %3566 = vmatpush3.bf16.msra.mxu1 %v3896_v42  ;;  %3546 = vmatpush3.bf16.msra.mxu0 %v3896_v42  ;;  %v467_v41 = vadd.f32 %v466_v38, %v465_v29  ;;  %v481_v42 = vadd.f32 %v480_v48, %v479_v31  ;;  %v386_v46 = vrot.slane %v4197_v28, 1  ;;  %v387_v52 = vrot.slane %v4203_v30, 1 }
  0x22   : > { %3567 = vmatprep.subr.bf16.mxu1 %v4041_v1  ;;  %3547 = vmatprep.subr.bf16.mxu0 %v4041_v1  ;;  %v382_v47 = vsel %vm364_vm3, %v380_v33, %v381_v36  ;;  %v385_v51 = vsel %vm364_vm3, %v383_v39, %v384_v40  ;;  %v397_v53 = vrot.slane %v367_v62, 4  ;;  %v403_v54 = vrot.slane %v370_v0, 4 }
  0x23   : > { %v469_v38 = vadd.f32 %v468_v44, %v467_v41  ;;  %v483_v48 = vadd.f32 %v482_v49, %v481_v42  ;;  %v409_v55 = vrot.slane %v373_v2, 4  ;;  %v388_v56 = vsel %vm364_vm3, %v386_v46, %v387_v52 }
  0x24   : > { %v398_v57 = vadd.f32 %v397_v53, %v367_v62  ;;  %v415_v58 = vrot.slane %v376_v35, 4  ;;  %v404_v63 = vadd.f32 %v403_v54, %v370_v0  ;;  %v427_v32 = vrot.slane %v382_v47, 4 }
  0x25   : > { %3568 = vmatpush3.bf16.msra.mxu1 %v3897_v59  ;;  %3548 = vmatpush3.bf16.msra.mxu0 %v3897_v59  ;;  %v421_v59 = vrot.slane %v379_v45, 4  ;;  %v485_v60 = vadd.f32 %v484_v50, %v483_v48  ;;  %v486_v61 = vmul.f32 0.125, %v469_v38  ;;  %v410_v3 = vadd.f32 %v409_v55, %v373_v2 }
  0x26   : > { %3569 = vmatprep.subr.bf16.mxu1 %v4041_v1  ;;  %3549 = vmatprep.subr.bf16.mxu0 %v4041_v1  ;;  %v399_v4 = vrot.slane %v398_v57, 2  ;;  %v416_v29 = vadd.f32 %v415_v58, %v376_v35  ;;  %v405_v44 = vrot.slane %v404_v63, 2  ;;  %v433_v62 = vrot.slane %v385_v51, 4 }
  0x27   : > { %v422_v31 = vadd.f32 %v421_v59, %v379_v45  ;;  %v487_v1 = vmul.f32 0.125, %v485_v60  ;;  %v411_v49 = vrot.slane %v410_v3, 2  ;;  %v428_v39 = vadd.f32 %v427_v32, %v382_v47 }
  0x28   : > { %v400_v33 = vadd.f32 %v399_v4, %v398_v57  ;;  %v417_v36 = vrot.slane %v416_v29, 2  ;;  %v406_v2 = vadd.f32 %v405_v44, %v404_v63 }
  0x29   : > { %3570 = vmatpush3.bf16.msra.mxu1 %v3898_v34  ;;  %3550 = vmatpush3.bf16.msra.mxu0 %v3898_v34  ;;  %v423_v50 = vrot.slane %v422_v31, 2  ;;  %v638_v0 = vpack.c.bf16 %v487_v1, %v486_v61  ;;  %v412_v40 = vadd.f32 %v411_v49, %v410_v3  ;;  %v434_v34 = vadd.f32 %v433_v62, %v385_v51 }
  0x2a   : > { %3607 = vmatprep.subr.bf16.mxu1 %v4273_v37  ;;  %3575 = vmatprep.subr.bf16.mxu0 %v4278_v43  ;;  %v401_v41 = vrot.slane %v400_v33, 1  ;;  %v418_v35 = vadd.f32 %v417_v36, %v416_v29  ;;  %v429_v45 = vrot.slane %v428_v39, 2  ;;  %v407_v53 = vrot.slane %v406_v2, 1  ;;  %v3901_v29 = vld [vmem:[%s5116_s5 + $0x70] sm:$0xff]  }
  0x2b   : > { %v424_v42 = vadd.f32 %v423_v50, %v422_v31  ;;  %v640_v46 = vshrl.u32 %v638_v0, 16  ;;  %v642_v52 = vshll.u32 %v638_v0, 16  ;;  %v413_v38 = vrot.slane %v412_v40, 1 }
  0x2c   : > { %v402_v48 = vadd.f32 %v401_v41, %v400_v33  ;;  %v419_v54 = vrot.slane %v418_v35, 1  ;;  %v430_v57 = vadd.f32 %v429_v45, %v428_v39  ;;  %v408_v58 = vadd.f32 %v407_v53, %v406_v2 }
  0x2d   : > { %v425_v55 = vrot.slane %v424_v42, 1  ;;  %v644_v47 = vrot.slane %v642_v52, 1  ;;  %v414_v59 = vadd.f32 %v413_v38, %v412_v40  ;;  %v435_v60 = vrot.slane %v434_v34, 2 }
  0x2e   : > { %v420_v51 = vadd.f32 %v419_v54, %v418_v35  ;;  %v431_v63 = vrot.slane %v430_v57, 1  ;;  %v439_v3 = vrot.slane %v388_v56, 4  ;;  %v446_v32 = vmul.f32 0.125, %v402_v48 }
  0x2f   : > { %v426_v61 = vadd.f32 %v425_v55, %v424_v42  ;;  %v645_v4 = vor.u32 %v644_v47, %v640_v46  ;;  %v436_v31 = vadd.f32 %v435_v60, %v434_v34  ;;  %v447_v1 = vmul.f32 0.125, %v408_v58  ;;  %v3903_v34 = vld [vmem:[%s5116_s5 + $0x68] sm:$0xff]  }
  0x30   : > { %v432_v44 = vadd.f32 %v431_v63, %v430_v57  ;;  %v440_v49 = vadd.f32 %v439_v3, %v388_v56  ;;  %v448_v62 = vmul.f32 0.125, %v414_v59  ;;  %v449_v33 = vmul.f32 0.125, %v420_v51  ;;  %v4299_v57 = vld [vmem:[%s4123_s17] sm:$0xff]  }
  0x31   : > { %3572 = vmatmul.mubr.bf16.vlgmr.msra.gmra.mxu1 %v645_v4  ;;  %v437_v36 = vrot.slane %v436_v31, 1  ;;  %v450_v50 = vmul.f32 0.125, %v426_v61  ;;  %v488_v39 = vpack.c.bf16 %v446_v32, %v446_v32  ;;  %v489_v0 = vpack.c.bf16 %v447_v1, %v447_v1  ;;  %v3905_v61 = vld [vmem:[%s5116_s5 + $0x60] sm:$0xff]  }
  0x32   : > { %3608 = vmatpush3.bf16.msra.mxu1 %v4273_v37  ;;  %v441_v2 = vrot.slane %v440_v49, 2  ;;  %v451_v40 = vmul.f32 0.125, %v432_v44  ;;  %v490_v41 = vpack.c.bf16 %v448_v62, %v448_v62  ;;  %v491_v35 = vpack.c.bf16 %v449_v33, %v449_v33 }
  0x33   : > { %3609 = vmatprep.subr.bf16.mxu1 %v3901_v29  ;;  %v438_v56 = vadd.f32 %v437_v36, %v436_v31  ;;  %v492_v42 = vpack.c.bf16 %v450_v50, %v450_v50  ;;  %v526_v45 = vunpack.c.l.b16 %v488_v39  ;;  %v527_v46 = vunpack.c.l.b16 %v489_v0 }
  0x34   : > { %v442_v52 = vadd.f32 %v441_v2, %v440_v49  ;;  %v493_v53 = vpack.c.bf16 %v451_v40, %v451_v40  ;;  %v528_v38 = vunpack.c.l.b16 %v490_v41  ;;  %v529_v48 = vunpack.c.l.b16 %v491_v35  ;;  %v3907_v49 = vld [vmem:[%s5116_s5 + $0x58] sm:$0xff]   ;;  %v3909_v2 = vld [vmem:[%s5116_s5 + $0x50] sm:$0xff]  }
  0x35   : > { %v452_v54 = vmul.f32 0.125, %v438_v56  ;;  %v530_v37 = vunpack.c.l.b16 %v492_v42  ;;  %v535_v55 = vsel %vm534_vm4, %v527_v46, %v526_v45  ;;  %v1281_v4 = vshrl.u32 %v4299_v57, 16  ;;  %v3911_v56 = vld [vmem:[%s5116_s5 + $0x48] sm:$0xff]  }
  0x36   : > { %3610 = vmatpush3.bf16.msra.mxu1 %v3901_v29  ;;  %v443_v47 = vrot.slane %v442_v52, 1  ;;  %v531_v58 = vunpack.c.l.b16 %v493_v53  ;;  %v537_v59 = vsel %vm536_vm5, %v528_v38, %v535_v55  ;;  %v1283_v29 = vshll.u32 %v4299_v57, 16  ;;  %v3906_v42 = vld [vmem:[%s5116_s5 + $0x28] sm:$0xff]  }
  0x37   : > { %v494_v60 = vpack.c.bf16 %v452_v54, %v452_v54  ;;  %v539_v51 = vsel %vm538_vm6, %v529_v48, %v537_v59  ;;  %3611 = vmatprep.subr.bf16.mxu1 %v3903_v34  ;;  %v1288_v32 = vshll.u32 %v4126_v5, 16  ;;  %v1296_v45 = vshll.u32 %v4129_v6, 16  ;;  %v3908_v54 = vld [vmem:[%s5116_s5 + $0x20] sm:$0xff]  }
  0x38   : > { %v444_v63 = vadd.f32 %v443_v47, %v442_v52  ;;  %v541_v3 = vsel %vm540_vm7, %v530_v37, %v539_v51  ;;  %v1285_v62 = vrot.slane %v1283_v29, 1  ;;  %v1292_v46 = vshrl.u32 %v4126_v5, 16  ;;  %v3913_v52 = vld [vmem:[%s5116_s5 + $0x40] sm:$0xff]   ;;  %v3910_v47 = vld [vmem:[%s5116_s5 + $0x18] sm:$0xff]  }
  0x39   : > { %v532_v31 = vunpack.c.l.b16 %v494_v60  ;;  %v543_v44 = vsel %vm542_vm8, %v531_v58, %v541_v3  ;;  %v1290_v33 = vrot.slane %v1288_v32, 1  ;;  %v1300_v53 = vshrl.u32 %v4129_v6, 16  ;;  %v3918_v58 = vld [vmem:[%s5116_s5 + $0xf8] sm:$0xff]  }
  0x3a   : > { %v453_v1 = vmul.f32 0.125, %v444_v63  ;;  %3612 = vmatpush3.bf16.msra.mxu1 %v3903_v34  ;;  %v1286_v39 = vor.u32 %v1285_v62, %v1281_v4  ;;  %v3904_v34 = vld [vmem:[%s5116_s5 + $0x30] sm:$0xff]   ;;  %v1336_v38 = vshll.u32 %v4155_v14, 16  ;;  %v4337_v48 = vcombine.low %v4158_v15, %v4161_v16 }
  0x3b   : > { %3613 = vmatprep.subr.bf16.mxu1 %v3905_v61  ;;  %v545_v50 = vsel %vm544_vm9, %v532_v31, %v543_v44  ;;  %v1298_v37 = vrot.slane %v1296_v45, 1  ;;  %v1294_v55 = vor.u32 %v1292_v46, %v1290_v33  ;;  %v1340_v51 = vshrl.u32 %v4155_v14, 16  ;;  %v3912_v62 = vld [vmem:[%s5116_s5 + $0x10] sm:$0xff]   ;;  %v3919_v46 = vld [vmem:[%s5116_s5] sm:$0xff]  }
  0x3c   : > { %v495_v36 = vpack.c.bf16 %v453_v1, %v453_v1  ;;  %v1291_v40 = vsel %vm1279_vm10, %v1286_v39, %v1290_v33  ;;  %v1338_v60 = vrot.slane %v1336_v38, 1  ;;  %v1312_v63 = vshll.u32 %v4135_v8, 16  ;;  %v3924_v39 = vld [vmem:[%s5116_s5 + $0xe8] sm:$0xff]   ;;  %v3930_v38 = vld [vmem:[%s5116_s5 + $0xd8] sm:$0xff]  }
  0x3d   : > { %3623 = vmatprep.mubr.bf16.mxu1 %v1291_v40  ;;  %v1302_v59 = vor.u32 %v1300_v53, %v1298_v37  ;;  %v4354_v3 = vsel %vm1279_vm10, %v1294_v55, %v1298_v37  ;;  %v1308_v4 = vshrl.u32 %v4132_v7, 16  ;;  %v1876_v31 = vshll.u32 %v4337_v48, 16  ;;  %v3914_v40 = vld [vmem:[%s5116_s5 + $0x8] sm:$0xff]   ;;  %v3921_v37 = vld [vmem:[%s5116_s5 + $0xb8] sm:$0xff]  }
  0x3e   : > { %v533_v0 = vunpack.c.l.b16 %v495_v36  ;;  %3614 = vmatpush3.bf16.msra.mxu1 %v3905_v61  ;;  %v3920_v61 = vld [vmem:[%s5116_s5 + $0xf0] sm:$0xff]   ;;  %v1316_v32 = vshrl.u32 %v4135_v8, 16  ;;  %v1320_v1 = vshll.u32 %v4138_v9, 16  ;;  %v1342_v44 = vor.u32 %v1340_v51, %v1338_v60  ;;  %v3927_v51 = vld [vmem:[%s5116_s5 + $0xa8] sm:$0xff]  }
  0x3f   : > { %3615 = vmatprep.subr.bf16.mxu1 %v3907_v49  ;;  %v1314_v33 = vrot.slane %v1312_v63, 1  ;;  %v1332_v45 = vshrl.u32 %v4141_v10, 16  ;;  %v3937_v63 = vld [vmem:[%s5116_s5 + $0xc0] sm:$0xff]  }
  0x40   : > { %v547_v41 = vsel %vm546_vm11, %v533_v0, %v545_v50 }
  0x41   : > { %v548_v35 = vpack.c.b16 %v547_v41, %v547_v41  ;;  %v1318_v0 = vor.u32 %v1316_v32, %v1314_v33  ;;  %v1328_v41 = vshll.u32 %v4141_v10, 16  ;;  %v3933_v32 = vld [vmem:[%s5116_s5 + $0x98] sm:$0xff]  }
  0x42   : > { %3616 = vmatpush3.bf16.msra.mxu1 %v3907_v49  ;;  %v4363_v49 = vrot.slane %v1876_v31, 1  ;;  %v3939_v31 = vld [vmem:[%s5116_s5 + $0x178] sm:$0xff]  }
  0x43   : > { %3552 = vmatmul.mubr.bf16.vlgmr.msra.gmra.mxu0 %v548_v35  ;;  %3617 = vmatprep.subr.bf16.mxu1 %v3909_v2 }
  0x44   : > { %3576 = vmatpush3.bf16.msra.mxu0 %v4278_v43  ;;  %3591 = vmatprep.mubr.bf16.mxu0 %v4299_v57  ;;  %v1304_v43 = vshll.u32 %v4132_v7, 16  ;;  %v4372_v50 = vsel %vm1279_vm10, %v1342_v44, %v4363_v49 }
  0x45   : > { %3577 = vmatprep.subr.bf16.mxu0 %v3904_v34 }
  0x46   : > { %3618 = vmatpush3.bf16.msra.mxu1 %v3909_v2  ;;  %v1306_v16 = vrot.slane %v1304_v43, 1  ;;  %v1322_v2 = vrot.slane %v1320_v1, 1  ;;  %v4399_v43 = vcombine.low %v4158_v15, %v4158_v15  ;;  %v3932_v15 = vld [vmem:[%s5116_s5 + $0xd0] sm:$0xff]  }
  0x47   : > { %3619 = vmatprep.subr.bf16.mxu1 %v3911_v56  ;;  %v3941_v1 = vld [vmem:[%s5116_s5 + $0x170] sm:$0xff]  }
  0x48   : > { %3578 = vmatpush3.bf16.msra.mxu0 %v3904_v34  ;;  %v4359_v29 = vsel %vm1279_vm10, %v1302_v59, %v1306_v16  ;;  %v1310_v36 = vor.u32 %v1308_v4, %v1306_v16  ;;  %v1324_v34 = vshrl.u32 %v4138_v9, 16  ;;  %v3925_v59 = vld [vmem:[%s5116_s5 + $0xb0] sm:$0xff]   ;;  %v3931_v4 = vld [vmem:[%s5116_s5 + $0xa0] sm:$0xff]  }
  0x49   : > { %3579 = vmatprep.subr.bf16.mxu0 %v3906_v42 }
  0x4a   : > { %3620 = vmatpush3.bf16.msra.mxu1 %v3911_v56  ;;  %v4382_v35 = vsel %vm1279_vm10, %v1310_v36, %v1314_v33  ;;  %v3926_v56 = vld [vmem:[%s5116_s5 + $0xe0] sm:$0xff]   ;;  %v1326_v53 = vor.u32 %v1324_v34, %v1322_v2  ;;  %v3938_v33 = vld [vmem:[%s5116_s5 + $0x88] sm:$0xff]   ;;  %v1519_v36 = vrot.slane %v4299_v57, 1  ;;  %v1522_v57 = vrot.slane %v4129_v6, 1 }
  0x4b   : > { %3621 = vmatprep.subr.bf16.mxu1 %v3913_v52  ;;  %v1524_v34 = vrot.slane %v4132_v7, 1 }
  0x4c   : > { %3580 = vmatpush3.bf16.msra.mxu0 %v3906_v42  ;;  %v4389_v42 = vsel %vm1279_vm10, %v1318_v0, %v1322_v2  ;;  %v3945_v0 = vld [vmem:[%s5116_s5 + $0x160] sm:$0xff]  }
  0x4d   : > { %3581 = vmatprep.subr.bf16.mxu0 %v3908_v54  ;;  %v3940_v2 = vld [vmem:[%s5116_s5 + $0x80] sm:$0xff]  }
  0x4e   : > { %3622 = vmatpush3.bf16.msra.mxu1 %v3913_v52  ;;  %v1330_v52 = vrot.slane %v1328_v41, 1  ;;  %v3942_v41 = vld [vmem:[%s5116_s5 + $0x138] sm:$0xff]  }
  0x4f   : > { %3671 = vmatprep.subr.bf16.mxu1 %v3918_v58 }
  0x50   : > { %3582 = vmatpush3.bf16.msra.mxu0 %v3908_v54  ;;  %v1334_v54 = vor.u32 %v1332_v45, %v1330_v52  ;;  %v4408_v55 = vsel %vm1279_vm10, %v1326_v53, %v1330_v52  ;;  %v4490_v52 = vsel %vm364_vm3, %v1522_v57, %v1524_v34  ;;  %v3952_v53 = vld [vmem:[%s5116_s5 + $0x148] sm:$0xff]  }
  0x51   : > { %3583 = vmatprep.subr.bf16.mxu0 %v3910_v47  ;;  %3624 = vmatmul.mubr.bf16.vlgmr.msra.gmra.mxu1 %v4354_v3 }
  0x52   : > { %3672 = vmatpush3.bf16.msra.mxu1 %v3918_v58  ;;  %3627 = vmatprep.mubr.bf16.mxu1 %v4359_v29  ;;  %v4415_v58 = vsel %vm1279_vm10, %v1334_v54, %v1338_v60  ;;  %v3935_v60 = vld [vmem:[%s5116_s5 + $0xc8] sm:$0xff]  }
  0x53   : > { %3673 = vmatprep.subr.bf16.mxu1 %v3920_v61  ;;  %v3946_v54 = vld [vmem:[%s5116_s5 + $0x128] sm:$0xff]  }
  0x54   : > { %3584 = vmatpush3.bf16.msra.mxu0 %v3910_v47  ;;  %v1344_v47 = vshll.u32 %v4399_v43, 16 }
  0x55   : > { %3585 = vmatprep.subr.bf16.mxu0 %v3912_v62 }
  0x56   : > { %3674 = vmatpush3.bf16.msra.mxu1 %v3920_v61  ;;  %v1346_v16 = vrot.slane %v1344_v47, 1  ;;  %v3954_v47 = vld [vmem:[%s5116_s5 + $0x140] sm:$0xff]  }
  0x57   : > { %3675 = vmatprep.subr.bf16.mxu1 %v3924_v39 }
  0x58   : > { %3586 = vmatpush3.bf16.msra.mxu0 %v3912_v62  ;;  %v1347_v61 = vsel %vm1279_vm10, %v1342_v44, %v1346_v16  ;;  %v3936_v44 = vld [vmem:[%s5116_s5 + $0x90] sm:$0xff]   ;;  %v3943_v62 = vld [vmem:[%s5116_s5 + $0x168] sm:$0xff]  }
  0x59   : > { %3587 = vmatprep.subr.bf16.mxu0 %v3914_v40  ;;  %3628 = vmatmul.mubr.bf16.gmra.mxu1 %v4382_v35 }
  0x5a   : > { %3676 = vmatpush3.bf16.msra.mxu1 %v3924_v39  ;;  %3631 = vmatprep.mubr.bf16.mxu1 %v4389_v42  ;;  %v1520_v39 = vrot.slane %v4126_v5, 1 }
  0x5b   : > { %3677 = vmatprep.subr.bf16.mxu1 %v3926_v56 }
  0x5c   : > { %3588 = vmatpush3.bf16.msra.mxu0 %v3914_v40  ;;  %v1521_v40 = vsel %vm364_vm3, %v1519_v36, %v1520_v39  ;;  %v1523_v45 = vsel %vm364_vm3, %v1520_v39, %v1522_v57  ;;  %v3962_v36 = vld [vmem:[%s5116_s5 + $0x1e0] sm:$0xff]  }
  0x5d   : > { %3589 = vmatprep.subr.bf16.mxu0 %v3919_v46 }
  0x5e   : > { %3678 = vmatpush3.bf16.msra.mxu1 %v3926_v56  ;;  %v3949_v56 = vld [vmem:[%s5116_s5 + $0x150] sm:$0xff]  }
  0x5f   : > { %3679 = vmatprep.subr.bf16.mxu1 %v3930_v38 }
  0x60   : > { %3590 = vmatpush3.bf16.msra.mxu0 %v3919_v46  ;;  %v3944_v46 = vld [vmem:[%s5116_s5 + $0x130] sm:$0xff]  }
  0x61   : > { %3639 = vmatprep.subr.bf16.mxu0 %v3921_v37  ;;  %3632 = vmatmul.mubr.bf16.gmra.mxu1 %v4408_v55 }
  0x62   : > { %3680 = vmatpush3.bf16.msra.mxu1 %v3930_v38  ;;  %3635 = vmatprep.mubr.bf16.mxu1 %v4415_v58  ;;  %v1526_v38 = vrot.slane %v4135_v8, 1 }
  0x63   : > { %3592 = vmatmul.mubr.bf16.vlgmr.msra.gmra.mxu0 %v4126_v5  ;;  %3681 = vmatprep.subr.bf16.mxu1 %v3932_v15 }
  0x64   : > { %3640 = vmatpush3.bf16.msra.mxu0 %v3921_v37  ;;  %3595 = vmatprep.mubr.bf16.mxu0 %v4129_v6  ;;  %v1528_v37 = vrot.slane %v4138_v9, 1 }
  0x65   : > { %3641 = vmatprep.subr.bf16.mxu0 %v3925_v59 }
  0x66   : > { %3682 = vmatpush3.bf16.msra.mxu1 %v3932_v15  ;;  %v4507_v15 = vsel %vm364_vm3, %v1524_v34, %v1526_v38  ;;  %v4513_v16 = vsel %vm364_vm3, %v1526_v38, %v1528_v37  ;;  %v3972_v38 = vld [vmem:[%s5116_s5 + $0x1c0] sm:$0xff]  }
  0x67   : > { %3683 = vmatprep.subr.bf16.mxu1 %v3935_v60 }
  0x68   : > { %3642 = vmatpush3.bf16.msra.mxu0 %v3925_v59  ;;  %v3948_v59 = vld [vmem:[%s5116_s5 + $0x120] sm:$0xff]  }
  0x69   : > { %3643 = vmatprep.subr.bf16.mxu0 %v3927_v51  ;;  %3636 = vmatmul.mubr.bf16.gmra.mxu1 %v1347_v61  ;;  %v3950_v61 = vld [vmem:[%s5116_s5 + $0x118] sm:$0xff]  }
  0x6a   : > { %3684 = vmatpush3.bf16.msra.mxu1 %v3935_v60  ;;  %3687 = vmatprep.mubr.bf16.mxu1 %v4126_v5  ;;  %v3947_v5 = vld [vmem:[%s5116_s5 + $0x158] sm:$0xff]  }
  0x6b   : > { %3596 = vmatmul.mubr.bf16.gmra.mxu0 %v4132_v7  ;;  %3685 = vmatprep.subr.bf16.mxu1 %v3937_v63  ;;  %v3956_v60 = vld [vmem:[%s5116_s5 + $0x1f8] sm:$0xff]  }
  0x6c   : > { %3644 = vmatpush3.bf16.msra.mxu0 %v3927_v51  ;;  %3599 = vmatprep.mubr.bf16.mxu0 %v4135_v8  ;;  %v1530_v51 = vrot.slane %v4141_v10, 1 }
  0x6d   : > { %3645 = vmatprep.subr.bf16.mxu0 %v3931_v4 }
  0x6e   : > { %3686 = vmatpush3.bf16.msra.mxu1 %v3937_v63  ;;  %v1532_v63 = vrot.slane %v4155_v14, 1 }
  0x6f   : > { %3735 = vmatprep.subr.bf16.mxu1 %v3939_v31 }
  0x70   : > { %3646 = vmatpush3.bf16.msra.mxu0 %v3931_v4  ;;  %v3958_v4 = vld [vmem:[%s5116_s5 + $0x1f0] sm:$0xff]  }
  0x71   : > { %3647 = vmatprep.subr.bf16.mxu0 %v3933_v32  ;;  %3688 = vmatmul.mubr.bf16.vlgmr.msra.gmra.mxu1 %v4129_v6 }
  0x72   : > { %3736 = vmatpush3.bf16.msra.mxu1 %v3939_v31  ;;  %3691 = vmatprep.mubr.bf16.mxu1 %v4132_v7  ;;  %v4530_v31 = vsel %vm364_vm3, %v1528_v37, %v1530_v51  ;;  %v3974_v37 = vld [vmem:[%s5116_s5 + $0x238] sm:$0xff]  }
  0x73   : > { %3600 = vmatmul.mubr.bf16.gmra.mxu0 %v4138_v9  ;;  %3737 = vmatprep.subr.bf16.mxu1 %v3941_v1 }
  0x74   : > { %3648 = vmatpush3.bf16.msra.mxu0 %v3933_v32  ;;  %3603 = vmatprep.mubr.bf16.mxu0 %v4141_v10  ;;  %v3953_v32 = vld [vmem:[%s5116_s5 + $0x110] sm:$0xff]  }
  0x75   : > { %3649 = vmatprep.subr.bf16.mxu0 %v3936_v44 }
  0x76   : > { %3738 = vmatpush3.bf16.msra.mxu1 %v3941_v1  ;;  %v4536_v1 = vsel %vm364_vm3, %v1530_v51, %v1532_v63 }
  0x77   : > { %3739 = vmatprep.subr.bf16.mxu1 %v3943_v62 }
  0x78   : > { %3650 = vmatpush3.bf16.msra.mxu0 %v3936_v44  ;;  %v3960_v44 = vld [vmem:[%s5116_s5 + $0x1e8] sm:$0xff]  }
  0x79   : > { %3651 = vmatprep.subr.bf16.mxu0 %v3938_v33  ;;  %3692 = vmatmul.mubr.bf16.gmra.mxu1 %v4135_v8 }
  0x7a   : > { %3740 = vmatpush3.bf16.msra.mxu1 %v3943_v62  ;;  %3695 = vmatprep.mubr.bf16.mxu1 %v4138_v9  ;;  %v1534_v62 = vrot.slane %v4399_v43, 1  ;;  %v3957_v43 = vld [vmem:[%s5116_s5 + $0x100] sm:$0xff]  }
  0x7b   : > { %3604 = vmatmul.mubr.bf16.gmra.mxu0 %v4155_v14  ;;  %3741 = vmatprep.subr.bf16.mxu1 %v3945_v0 }
  0x7c   : > { %3652 = vmatpush3.bf16.msra.mxu0 %v3938_v33  ;;  %3655 = vmatprep.mubr.bf16.mxu0 %v1521_v40  ;;  %v3955_v33 = vld [vmem:[%s5116_s5 + $0x108] sm:$0xff]   ;;  %v1535_v39 = vsel %vm364_vm3, %v1532_v63, %v1534_v62 }
  0x7d   : > { %3653 = vmatprep.subr.bf16.mxu0 %v3940_v2  ;;  %v325_v40 = vld [vmem:[%s4123_s17 + $0x48] sm:$0xf] }
  0x7e   : > { %3742 = vmatpush3.bf16.msra.mxu1 %v3945_v0  ;;  %v3964_v0 = vld [vmem:[%s5116_s5 + $0x1d8] sm:$0xff]   ;;  %v3223_v57 = vcombine.low %v325_v40, %v325_v40 }
  0x7f   : > { %3743 = vmatprep.subr.bf16.mxu1 %v3947_v5 }
  0x80   : > { %3654 = vmatpush3.bf16.msra.mxu0 %v3940_v2  ;;  %v4562_v2 = vrot.slane %v4337_v48, 1  ;;  %v1884_v51 = vshll.u32 %v3223_v57, 16 }
  0x81   : > { %3703 = vmatprep.subr.bf16.mxu0 %v3942_v41  ;;  %3696 = vmatmul.mubr.bf16.gmra.mxu1 %v4141_v10 }
  0x82   : > { %3744 = vmatpush3.bf16.msra.mxu1 %v3947_v5  ;;  %3699 = vmatprep.mubr.bf16.mxu1 %v4155_v14  ;;  %v3959_v5 = vld [vmem:[%s5116_s5 + $0x1b8] sm:$0xff]   ;;  %v4574_v34 = vsel %vm364_vm3, %v1532_v63, %v4562_v2 }
  0x83   : > { %3656 = vmatmul.mubr.bf16.vlgmr.msra.gmra.mxu0 %v1523_v45  ;;  %3745 = vmatprep.subr.bf16.mxu1 %v3949_v56 }
  0x84   : > { %3704 = vmatpush3.bf16.msra.mxu0 %v3942_v41  ;;  %3659 = vmatprep.mubr.bf16.mxu0 %v4490_v52  ;;  %v3966_v41 = vld [vmem:[%s5116_s5 + $0x1d0] sm:$0xff]  }
  0x85   : > { %3705 = vmatprep.subr.bf16.mxu0 %v3944_v46 }
  0x86   : > { %3746 = vmatpush3.bf16.msra.mxu1 %v3949_v56  ;;  %v2054_v56 = vrot.slane %v3223_v57, 1  ;;  %v3982_v57 = vld [vmem:[%s5116_s5 + $0x208] sm:$0xff]  }
  0x87   : > { %3747 = vmatprep.subr.bf16.mxu1 %v3952_v53 }
  0x88   : > { %3706 = vmatpush3.bf16.msra.mxu0 %v3944_v46  ;;  %v3963_v46 = vld [vmem:[%s5116_s5 + $0x1a8] sm:$0xff]  }
  0x89   : > { %3707 = vmatprep.subr.bf16.mxu0 %v3946_v54  ;;  %3700 = vmatmul.mubr.bf16.gmra.mxu1 %v4337_v48 }
  0x8a   : > { %3748 = vmatpush3.bf16.msra.mxu1 %v3952_v53  ;;  %3751 = vmatprep.mubr.bf16.mxu1 %v1523_v45  ;;  %v3970_v45 = vld [vmem:[%s5116_s5 + $0x1c8] sm:$0xff]   ;;  %v2055_v53 = vsel %vm364_vm3, %v4562_v2, %v2054_v56 }
  0x8b   : > { %3660 = vmatmul.mubr.bf16.gmra.mxu0 %v4507_v15  ;;  %3749 = vmatprep.subr.bf16.mxu1 %v3954_v47 }
  0x8c   : > { %3708 = vmatpush3.bf16.msra.mxu0 %v3946_v54  ;;  %3663 = vmatprep.mubr.bf16.mxu0 %v4513_v16  ;;  %v3965_v54 = vld [vmem:[%s5116_s5 + $0x1a0] sm:$0xff]  }
  0x8d   : > { %3709 = vmatprep.subr.bf16.mxu0 %v3948_v59 }
  0x8e   : > { %3750 = vmatpush3.bf16.msra.mxu1 %v3954_v47  ;;  %v3967_v47 = vld [vmem:[%s5116_s5 + $0x198] sm:$0xff]  }
  0x8f   : > { %3799 = vmatprep.subr.bf16.mxu1 %v3956_v60 }
  0x90   : > { %3710 = vmatpush3.bf16.msra.mxu0 %v3948_v59  ;;  %v326_v59 = vld [vmem:[%s4123_s17 + $0x4c] sm:$0xf] }
  0x91   : > { %3711 = vmatprep.subr.bf16.mxu0 %v3950_v61  ;;  %3752 = vmatmul.mubr.bf16.vlgmr.msra.gmra.mxu1 %v4490_v52  ;;  %v4617_v63 = vcombine.low %v325_v40, %v326_v59 }
  0x92   : > { %3800 = vmatpush3.bf16.msra.mxu1 %v3956_v60  ;;  %3755 = vmatprep.mubr.bf16.mxu1 %v4507_v15  ;;  %v1880_v60 = vshrl.u32 %v4337_v48, 16 }
  0x93   : > { %3664 = vmatmul.mubr.bf16.gmra.mxu0 %v4530_v31  ;;  %3801 = vmatprep.subr.bf16.mxu1 %v3958_v4  ;;  %v2390_v62 = vshll.u32 %v4617_v63, 16 }
  0x94   : > { %3712 = vmatpush3.bf16.msra.mxu0 %v3950_v61  ;;  %3667 = vmatprep.mubr.bf16.mxu0 %v4536_v1  ;;  %v3971_v61 = vld [vmem:[%s5116_s5 + $0x190] sm:$0xff]  }
  0x95   : > { %3713 = vmatprep.subr.bf16.mxu0 %v3953_v32 }
  0x96   : > { %3802 = vmatpush3.bf16.msra.mxu1 %v3958_v4  ;;  %v3977_v4 = vld [vmem:[%s5116_s5 + $0x228] sm:$0xff]  }
  0x97   : > { %3803 = vmatprep.subr.bf16.mxu1 %v3960_v44 }
  0x98   : > { %3714 = vmatpush3.bf16.msra.mxu0 %v3953_v32  ;;  %v1882_v32 = vor.u32 %v1880_v60, %v4363_v49  ;;  %v3975_v49 = vld [vmem:[%s5116_s5 + $0x180] sm:$0xff]  }
  0x99   : > { %3715 = vmatprep.subr.bf16.mxu0 %v3955_v33  ;;  %3756 = vmatmul.mubr.bf16.gmra.mxu1 %v4513_v16 }
  0x9a   : > { %3804 = vmatpush3.bf16.msra.mxu1 %v3960_v44  ;;  %3759 = vmatprep.mubr.bf16.mxu1 %v4530_v31  ;;  %v1886_v44 = vrot.slane %v1884_v51, 1  ;;  %v4043_v51 = vmov 1966171168  }
  0x9b   : > { %3668 = vmatmul.mubr.bf16.gmra.mxu0 %v1535_v39  ;;  %3805 = vmatprep.subr.bf16.mxu1 %v3962_v36  ;;  %v3979_v39 = vld [vmem:[%s5116_s5 + $0x218] sm:$0xff]  }
  0x9c   : > { %3716 = vmatpush3.bf16.msra.mxu0 %v3955_v33  ;;  %3719 = vmatprep.mubr.bf16.mxu0 %v4354_v3  ;;  %v3961_v3 = vld [vmem:[%s5116_s5 + $0x1b0] sm:$0xff]   ;;  %v1887_v33 = vsel %vm1279_vm10, %v1882_v32, %v1886_v44 }
  0x9d   : > { %3717 = vmatprep.subr.bf16.mxu0 %v3957_v43 }
  0x9e   : > { %3806 = vmatpush3.bf16.msra.mxu1 %v3962_v36  ;;  %v3981_v36 = vld [vmem:[%s4123_s17 + $0x50] ss:$0 sps:$4 sm:$0xff]  }
  0x9f   : > { %3807 = vmatprep.subr.bf16.mxu1 %v3964_v0  ;;  %v2398_v40 = vshll.u32 %v3981_v36, 16 }
  0xa0   : > { %3718 = vmatpush3.bf16.msra.mxu0 %v3957_v43  ;;  %v2392_v43 = vrot.slane %v2390_v62, 1 }
  0xa1   : > { %3767 = vmatprep.subr.bf16.mxu0 %v3959_v5  ;;  %3760 = vmatmul.mubr.bf16.gmra.mxu1 %v4536_v1 }
  0xa2   : > { %3808 = vmatpush3.bf16.msra.mxu1 %v3964_v0  ;;  %3763 = vmatprep.mubr.bf16.mxu1 %v4574_v34  ;;  %v2394_v0 = vshrl.u32 %v4617_v63, 16 }
  0xa3   : > { %3720 = vmatmul.mubr.bf16.vlgmr.msra.gmra.mxu0 %v4359_v29  ;;  %3809 = vmatprep.subr.bf16.mxu1 %v3966_v41 }
  0xa4   : > { %3768 = vmatpush3.bf16.msra.mxu0 %v3959_v5  ;;  %3723 = vmatprep.mubr.bf16.mxu0 %v4382_v35  ;;  %v2396_v5 = vor.u32 %v2394_v0, %v2392_v43 }
  0xa5   : > { %3769 = vmatprep.subr.bf16.mxu0 %v3961_v3 }
  0xa6   : > { %3810 = vmatpush3.bf16.msra.mxu1 %v3966_v41 }
  0xa7   : > { %3811 = vmatprep.subr.bf16.mxu1 %v3970_v45 }
  0xa8   : > { %3770 = vmatpush3.bf16.msra.mxu0 %v3961_v3  ;;  %v2568_v3 = vrot.slane %v3981_v36, 1 }
  0xa9   : > { %3771 = vmatprep.subr.bf16.mxu0 %v3963_v46  ;;  %3764 = vmatmul.mubr.bf16.gmra.mxu1 %v2055_v53 }
  0xaa   : > { %3812 = vmatpush3.bf16.msra.mxu1 %v3970_v45  ;;  %3815 = vmatprep.mubr.bf16.mxu1 %v4359_v29  ;;  %v3976_v29 = vld [vmem:[%s5116_s5 + $0x230] sm:$0xff]  }
  0xab   : > { %3724 = vmatmul.mubr.bf16.gmra.mxu0 %v4389_v42  ;;  %3813 = vmatprep.subr.bf16.mxu1 %v3972_v38 }
  0xac   : > { %3772 = vmatpush3.bf16.msra.mxu0 %v3963_v46  ;;  %3727 = vmatprep.mubr.bf16.mxu0 %v4408_v55 }
  0xad   : > { %3773 = vmatprep.subr.bf16.mxu0 %v3965_v54 }
  0xae   : > { %3814 = vmatpush3.bf16.msra.mxu1 %v3972_v38 }
  0xaf   : > { %3863 = vmatprep.subr.bf16.mxu1 %v3974_v37 }
  0xb0   : > { %3774 = vmatpush3.bf16.msra.mxu0 %v3965_v54 }
  0xb1   : > { %3775 = vmatprep.subr.bf16.mxu0 %v3967_v47  ;;  %3816 = vmatmul.mubr.bf16.vlgmr.msra.gmra.mxu1 %v4382_v35  ;;  %v3973_v35 = vld [vmem:[%s5116_s5 + $0x188] sm:$0xff]  }
  0xb2   : > { %3871 = vmatpush3.bf16.msra.mxu1 %v3974_v37  ;;  %3819 = vmatprep.mubr.bf16.mxu1 %v4389_v42  ;;  %v3978_v42 = vld [vmem:[%s5116_s5 + $0x220] sm:$0xff]  }
  0xb3   : > { %3728 = vmatmul.mubr.bf16.gmra.mxu0 %v4415_v58  ;;  %3864 = vmatprep.subr.bf16.mxu1 %v3976_v29 }
  0xb4   : > { %3776 = vmatpush3.bf16.msra.mxu0 %v3967_v47  ;;  %3731 = vmatprep.mubr.bf16.mxu0 %v4372_v50 }
  0xb5   : > { %3777 = vmatprep.subr.bf16.mxu0 %v3971_v61 }
  0xb6   : > { %3872 = vmatpush3.bf16.msra.mxu1 %v3976_v29 }
  0xb7   : > { %3865 = vmatprep.subr.bf16.mxu1 %v3977_v4 }
  0xb8   : > { %3778 = vmatpush3.bf16.msra.mxu0 %v3971_v61  ;;  %v696_v61 = vunpack.c.l.s4 %v4043_v51 }
  0xb9   : > { %3779 = vmatprep.subr.bf16.mxu0 %v3973_v35  ;;  %3820 = vmatmul.mubr.bf16.gmra.mxu1 %v4408_v55  ;;  %v3980_v55 = vld [vmem:[%s5116_s5 + $0x210] sm:$0xff]  }
  0xba   : > { %3873 = vmatpush3.bf16.msra.mxu1 %v3977_v4  ;;  %3823 = vmatprep.mubr.bf16.mxu1 %v4415_v58  ;;  %v2393_v58 = vsel %vm1279_vm10, %v1882_v32, %v2392_v43 }
  0xbb   : > { %3732 = vmatmul.mubr.bf16.gmra.mxu0 %v1887_v33  ;;  %3866 = vmatprep.subr.bf16.mxu1 %v3978_v42  ;;  %v4682_v33 = vld [vmem:[%s5117_s6] ss:$0 sm:$0xff] }
  0xbc   : > { %3780 = vmatpush3.bf16.msra.mxu0 %v3973_v35  ;;  %3783 = vmatprep.mubr.bf16.mxu0 %v4129_v6  ;;  %v2400_v6 = vrot.slane %v2398_v40, 1  ;;  %v697_v35 = vunpack.c.0.s8 %v696_v61 }
  0xbd   : > { %3781 = vmatprep.subr.bf16.mxu0 %v3975_v49 }
  0xbe   : > { %3874 = vmatpush3.bf16.msra.mxu1 %v3978_v42  ;;  %v2401_v41 = vsel %vm1279_vm10, %v2396_v5, %v2400_v6 }
  0xbf   : > { %3867 = vmatprep.subr.bf16.mxu1 %v3979_v39 }
  0xc0   : > { %3782 = vmatpush3.bf16.msra.mxu0 %v3975_v49 }
  0xc1   : > { %3831 = vmatprep.subr.bf16.mxu0 %v3974_v37  ;;  %3824 = vmatmul.mubr.bf16.gmra.mxu1 %v4372_v50  ;;  %v3983_v50 = vld [vmem:[%s5116_s5 + $0x200] sm:$0xff]  }
  0xc2   : > { %3875 = vmatpush3.bf16.msra.mxu1 %v3979_v39  ;;  %3827 = vmatprep.mubr.bf16.mxu1 %v2393_v58 }
  0xc3   : > { %3784 = vmatmul.mubr.bf16.vlgmr.msra.gmra.mxu0 %v4132_v7  ;;  %3868 = vmatprep.subr.bf16.mxu1 %v3980_v55  ;;  %v2566_v7 = vrot.slane %v4617_v63, 1 }
  0xc4   : > { %3832 = vmatpush3.bf16.msra.mxu0 %v3974_v37  ;;  %3787 = vmatprep.mubr.bf16.mxu0 %v4135_v8 }
  0xc5   : > { %3833 = vmatprep.subr.bf16.mxu0 %v3976_v29  ;;  %v2567_v8 = vsel %vm364_vm3, %v4562_v2, %v2566_v7  ;;  %v3103_v2 = vld [vmem:[%s5113_s2] ss:$0 sm:$0xff] }
  0xc6   : > { %3876 = vmatpush3.bf16.msra.mxu1 %v3980_v55 }
  0xc7   : > { %3869 = vmatprep.subr.bf16.mxu1 %v3982_v57 }
  0xc8   : > { %3834 = vmatpush3.bf16.msra.mxu0 %v3976_v29 }
  0xc9   : > { %3835 = vmatprep.subr.bf16.mxu0 %v3977_v4  ;;  %3828 = vmatmul.mubr.bf16.gmra.mxu1 %v2401_v41 }
  0xca   : > { %3877 = vmatpush3.bf16.msra.mxu1 %v3982_v57  ;;  %3855 = vmatprep.mubr.bf16.mxu1 %v4536_v1 }
  0xcb   : > { %3788 = vmatmul.mubr.bf16.gmra.mxu0 %v4138_v9  ;;  %3870 = vmatprep.subr.bf16.mxu1 %v3983_v50  ;;  %v2569_v9 = vsel %vm364_vm3, %v2566_v7, %v2568_v3 }
  0xcc   : > { %3836 = vmatpush3.bf16.msra.mxu0 %v3977_v4  ;;  %3791 = vmatprep.mubr.bf16.mxu0 %v4141_v10 }
  0xcd   : > { %3837 = vmatprep.subr.bf16.mxu0 %v3978_v42 }
  0xce   : > { %3878 = vmatpush3.bf16.msra.mxu1 %v3983_v50 }
  0xd0   : > { %3838 = vmatpush3.bf16.msra.mxu0 %v3978_v42 }
  0xd1   : > { %3839 = vmatprep.subr.bf16.mxu0 %v3979_v39  ;;  %3856 = vmatmul.mubr.bf16.vlgmr.msra.gmra.mxu1 %v4574_v34 }
  0xd2   : > { %3859 = vmatprep.mubr.bf16.mxu1 %v2567_v8 }
  0xd3   : > { %3792 = vmatmul.mubr.bf16.gmra.mxu0 %v4155_v14 }
  0xd4   : > { %3840 = vmatpush3.bf16.msra.mxu0 %v3979_v39  ;;  %3795 = vmatprep.mubr.bf16.mxu0 %v4337_v48 }
  0xd5   : > { %3841 = vmatprep.subr.bf16.mxu0 %v3980_v55 }
  0xd8   : > { %3842 = vmatpush3.bf16.msra.mxu0 %v3980_v55 }
  0xd9   : > { %3843 = vmatprep.subr.bf16.mxu0 %v3982_v57  ;;  %3860 = vmatmul.mubr.bf16.gmra.mxu1 %v2569_v9 }
  0xdb   : > { %3796 = vmatmul.mubr.bf16.gmra.mxu0 %v4617_v63  ;;  %v698_v63 = vlaneseq }
  0xdc   : > { %3844 = vmatpush3.bf16.msra.mxu0 %v3982_v57  ;;  %3847 = vmatprep.mubr.bf16.mxu0 %v4490_v52 }
  0xdd   : > { %3845 = vmatprep.subr.bf16.mxu0 %v3983_v50  ;;  %v699_v42 = vshrl.u32 %v698_v63, 7 }
  0xdf   : > { %v700_v36 = vsub.s32 %v697_v35, %v699_v42 }
  0xe0   : > { %3846 = vmatpush3.bf16.msra.mxu0 %v3983_v50  ;;  %v745_v50 = vsub.s32 0, %v699_v42 }
  0xe3   : > { %3848 = vmatmul.mubr.bf16.vlgmr.msra.gmra.mxu0 %v4507_v15 }
  0xe4   : > { %3851 = vmatprep.mubr.bf16.mxu0 %v4513_v16 }
  0xeb   : > { %3852 = vmatmul.mubr.bf16.gmra.mxu0 %v4530_v31 }
  0xf1   : > { %v681_v10 = vpop.f32.mrf.mxu1 }
  0xf2   : > { %v682_v45 = vadd.f32 %v3103_v2, %v681_v10 }
  0xf3   : > { %v3573_v14 = vpop.f32.mrf.mxu1 }
  0xf4   : > { %v3113_v15 = vmul.f32 -1.442695, %v682_v45 }
  0xf5   : > { %v684_v48 = vpop.f32.mrf.mxu1 }
  0xf7   : > { %v3574_v1 = vpop.f32.mrf.mxu1 }
 0x103   : > { %v632_v34 = vpop.f32.mrf.mxu0 }
 0x104   : > { %v633_v56 = vadd.f32 %v3103_v2, %v632_v34 }
 0x105   : > { %v3553_v52 = vpop.f32.mrf.mxu0 }
 0x106   : > { %v3112_v46 = vmul.f32 -1.442695, %v633_v56 }
 0x107   : > { %v635_v53 = vpop.f32.mrf.mxu0 }
 0x108   : > { %3991 = vpow2.f32 %v3112_v46 }
 0x109   : > { %v3554_v38 = vpop.f32.mrf.mxu0  ;;  %3993 = vpow2.f32 %v3113_v15 }
 0x111   : > { %v3625_v16 = vpop.f32.mrf.mxu1 }
 0x113   : > { %v1438_v31 = vpop.f32.mrf.mxu1 }
 0x115   : > { %v3992_v54 = vpop.eup %3991  ;;  %v3626_v37 = vpop.f32.mrf.mxu1 }
 0x116   : > { %v690_v47 = vadd.f32 1.0, %v3992_v54  ;;  %v3994_v60 = vpop.eup %3993 }
 0x117   : > { %v1441_v29 = vpop.f32.mrf.mxu1  ;;  %v802_v32 = vadd.f32 1.0, %v3994_v60 }
 0x118   : > { %3995 = vrcp.f32 %v690_v47 }
 0x119   : > { %v4675_v59 = vpop.f32.mrf.mxu1  ;;  %3997 = vrcp.f32 %v802_v32 }
 0x11b   : > { %v4677_v4 = vpop.f32.mrf.mxu1 }
 0x11d   : > { %v3630_v44 = vpop.f32.mrf.mxu1 }
 0x11f   : > { %v1455_v62 = vpop.f32.mrf.mxu1 }
 0x121   : > { %v4684_v49 = vpop.f32.mrf.mxu1 }
 0x123   : > { %v3593_v39 = vpop.f32.mrf.mxu0  ;;  %v4686_v43 = vpop.f32.mrf.mxu1 }
 0x124   : > { %v1252_v0 = vadd.f32 %v3593_v39, %v4682_v33 }
 0x125   : > { %v3996_v40 = vpop.eup %3995  ;;  %v1196_v55 = vpop.f32.mrf.mxu0 }
 0x126   : > { %v3634_v58 = vpop.f32.mrf.mxu1  ;;  %v694_v5 = vcombine.high %v3996_v40, %v3996_v40  ;;  %v701_v6 = vrot.slane %v3996_v40, %v700_v36  ;;  %v1251_v57 = vadd.f32 %v4682_v33, %v1196_v55  ;;  %v4690_v41 = vadd.f32 %v3625_v16, %v1252_v0  ;;  %v3998_v29 = vpop.eup %3997 }
 0x127   : > { %v3594_v7 = vpop.f32.mrf.mxu0  ;;  %v806_v40 = vrot.slane %v3998_v29, 7 }
 0x128   : > { %v1469_v8 = vpop.f32.mrf.mxu1  ;;  %v708_v3 = vrot.slane %v694_v5, %v700_v36  ;;  %v709_v9 = vcombine.high %v701_v6, %v701_v6  ;;  %v717_v10 = vrot.slane %v701_v6, %v700_v36  ;;  %v4692_v14 = vadd.f32 %v1438_v31, %v1251_v57 }
 0x129   : > { %v1199_v48 = vpop.f32.mrf.mxu0 }
 0x12a   : > { %v4694_v1 = vpop.f32.mrf.mxu1  ;;  %v710_v2 = vcombine.high %v708_v3, %v708_v3  ;;  %v724_v34 = vrot.slane %v708_v3, %v700_v36  ;;  %v731_v56 = vrot.slane %v709_v9, %v700_v36  ;;  %v739_v45 = vcombine.high %v717_v10, %v717_v10 }
 0x12b   : > { %v746_v52 = vrot.slane %v717_v10, %v745_v50  ;;  %v4696_v46 = vpop.f32.mrf.mxu0 }
 0x12c   : > { %v4698_v53 = vpop.f32.mrf.mxu1  ;;  %v738_v15 = vrot.slane %v710_v2, %v700_v36  ;;  %v740_v38 = vcombine.high %v724_v34, %v724_v34  ;;  %v741_v16 = vcombine.high %v731_v56, %v731_v56  ;;  %v750_v54 = vrot.slane %v731_v56, %v745_v50 }
 0x12d   : > { %v754_v37 = vrot.slane %v739_v45, %v745_v50  ;;  %v4700_v47 = vpop.f32.mrf.mxu0  ;;  %v762_v61 = vrot.slane %v724_v34, %v745_v50  ;;  %v783_v63 = vmul.f32 %v746_v52, %v4144_v11  ;;  %v784_v32 = vmul.f32 %v746_v52, %v4147_v12 }
 0x12e   : > { %v3638_v31 = vpop.f32.mrf.mxu1  ;;  %v742_v60 = vcombine.high %v738_v15, %v738_v15  ;;  %v758_v51 = vrot.slane %v741_v16, %v745_v50  ;;  %v785_v44 = vmul.f32 %v750_v54, %v4150_v13  ;;  %v786_v35 = vmul.f32 %v750_v54, %v4164_v17 }
 0x12f   : > { %v3598_v42 = vpop.f32.mrf.mxu0  ;;  %v766_v36 = vrot.slane %v738_v15, %v745_v50  ;;  %v770_v39 = vrot.slane %v740_v38, %v745_v50  ;;  %v787_v0 = vmul.f32 %v754_v37, %v4167_v18  ;;  %v788_v55 = vmul.f32 %v754_v37, %v4170_v19 }
 0x130   : > { %v1483_v62 = vpop.f32.mrf.mxu1  ;;  %v789_v58 = vmul.f32 %v758_v51, %v4173_v20  ;;  %v790_v5 = vmul.f32 %v758_v51, %v4176_v21  ;;  %v774_v7 = vrot.slane %v742_v60, %v745_v50  ;;  %v791_v8 = vmul.f32 %v762_v61, %v4179_v22 }
 0x131   : > { %v1213_v6 = vpop.f32.mrf.mxu0  ;;  %v792_v3 = vmul.f32 %v762_v61, %v4182_v23  ;;  %v4714_v9 = vmul.f32 %v806_v40, %v783_v63  ;;  %v4716_v10 = vmul.f32 %v806_v40, %v784_v32  ;;  %v4718_v48 = vmul.f32 %v806_v40, %v785_v44 }
 0x132   : > { %v4710_v57 = vpop.f32.mrf.mxu1  ;;  %v4720_v2 = vmul.f32 %v806_v40, %v786_v35  ;;  %v793_v45 = vmul.f32 %v766_v36, %v4185_v24  ;;  %v794_v52 = vmul.f32 %v766_v36, %v4188_v25  ;;  %v795_v50 = vmul.f32 %v770_v39, %v4191_v26 }
 0x133   : > { %v3601_v34 = vpop.f32.mrf.mxu0  ;;  %v4727_v15 = vmul.f32 %v806_v40, %v787_v0  ;;  %v796_v38 = vmul.f32 %v770_v39, %v4194_v27  ;;  %v4730_v16 = vmul.f32 %v806_v40, %v788_v55  ;;  %v4732_v54 = vmul.f32 %v806_v40, %v789_v58 }
 0x134   : > { %v4722_v56 = vpop.f32.mrf.mxu1  ;;  %v4734_v37 = vmul.f32 %v806_v40, %v790_v5  ;;  %v797_v60 = vmul.f32 %v774_v7, %v4197_v28  ;;  %v798_v51 = vmul.f32 %v774_v7, %v4203_v30  ;;  %v4738_v61 = vmul.f32 %v806_v40, %v791_v8 }
 0x135   : > { %v1224_v31 = vpop.f32.mrf.mxu0  ;;  %v4740_v63 = vmul.f32 %v806_v40, %v792_v3  ;;  %v840_v32 = vrot.slane %v4714_v9, 1  ;;  %v841_v44 = vrot.slane %v4716_v10, 1  ;;  %v843_v35 = vrot.slane %v4718_v48, 1 }
 0x136   : > { %v3690_v29 = vpop.f32.mrf.mxu1  ;;  %v844_v42 = vrot.slane %v4720_v2, 1  ;;  %v4746_v39 = vmul.f32 %v806_v40, %v793_v45  ;;  %v846_v0 = vrot.slane %v4727_v15, 1  ;;  %v847_v58 = vrot.slane %v4730_v16, 1 }
 0x137   : > { %v3602_v62 = vpop.f32.mrf.mxu0  ;;  %v849_v5 = vrot.slane %v4732_v54, 1  ;;  %v850_v6 = vrot.slane %v4734_v37, 1  ;;  %v4755_v3 = vmul.f32 %v806_v40, %v794_v52  ;;  %v4757_v29 = vmul.f32 %v806_v40, %v795_v50 }
 0x138   : > { %v1795_v36 = vpop.f32.mrf.mxu1  ;;  %v845_v55 = vsel %vm364_vm3, %v843_v35, %v844_v42  ;;  %v4759_v62 = vmul.f32 %v806_v40, %v796_v38  ;;  %v4761_v45 = vmul.f32 %v806_v40, %v797_v60  ;;  %v842_v35 = vsel %vm364_vm3, %v840_v32, %v841_v44 }
 0x139   : > { %v1227_v7 = vpop.f32.mrf.mxu0  ;;  %v4763_v36 = vmul.f32 %v806_v40, %v798_v51  ;;  %v852_v42 = vrot.slane %v4738_v61, 1  ;;  %v853_v19 = vrot.slane %v4740_v63, 1  ;;  %v855_v52 = vrot.slane %v4746_v39, 1 }
 0x13a   : > { %v4753_v8 = vpop.f32.mrf.mxu1  ;;  %v872_v21 = vadd.f32 %v845_v55, %v842_v35  ;;  %v1254_v50 = vadd.f32 %v4696_v46, %v4682_v33  ;;  %v1253_v38 = vadd.f32 %v4682_v33, %v4700_v47  ;;  %v848_v40 = vsel %vm364_vm3, %v846_v0, %v847_v58 }
 0x13b   : > { %v3605_v18 = vpop.f32.mrf.mxu0  ;;  %v851_v60 = vsel %vm364_vm3, %v849_v5, %v850_v6  ;;  %v1256_v51 = vadd.f32 %v3601_v34, %v4682_v33  ;;  %v1255_v32 = vadd.f32 %v4682_v33, %v1224_v31  ;;  %v856_v35 = vrot.slane %v4755_v3, 1 }
 0x13c   : > { %v4768_v7 = vpop.f32.mrf.mxu1  ;;  %v873_v27 = vadd.f32 %v872_v21, %v848_v40  ;;  %v1258_v26 = vadd.f32 %v3605_v18, %v4682_v33  ;;  %v1496_v46 = vadd.f32 %v4675_v59, %v1254_v50  ;;  %v1495_v0 = vadd.f32 %v4677_v4, %v1253_v38 }
 0x13d   : > { %v1238_v44 = vpop.f32.mrf.mxu0  ;;  %v1498_v58 = vadd.f32 %v4684_v49, %v1256_v51  ;;  %v1497_v34 = vadd.f32 %v4686_v43, %v1255_v32  ;;  %v854_v21 = vsel %vm364_vm3, %v852_v42, %v853_v19  ;;  %v858_v59 = vrot.slane %v4757_v29, 1 }
 0x13e   : > { %v3694_v20 = vpop.f32.mrf.mxu1  ;;  %v1257_v55 = vadd.f32 %v4682_v33, %v1238_v44  ;;  %v874_v31 = vadd.f32 %v873_v27, %v851_v60  ;;  %v859_v33 = vrot.slane %v4759_v62, 1  ;;  %v857_v49 = vsel %vm364_vm3, %v855_v52, %v856_v35 }
 0x13f   : > { %v3606_v47 = vpop.f32.mrf.mxu0  ;;  %v4787_v20 = vadd.f32 %v4694_v1, %v1258_v26  ;;  %v861_v43 = vrot.slane %v4761_v45, 1  ;;  %v862_v27 = vrot.slane %v4763_v36, 1 }
 0x140   : > { %v1809_v12 = vpop.f32.mrf.mxu1  ;;  %v4790_v18 = vadd.f32 %v4698_v53, %v1257_v55  ;;  %v875_v4 = vadd.f32 %v874_v31, %v854_v21  ;;  %v860_v19 = vsel %vm364_vm3, %v858_v59, %v859_v33 }
 0x141   : > { %v1241_v12 = vpop.f32.mrf.mxu0  ;;  %v863_v52 = vsel %vm364_vm3, %v861_v43, %v862_v27 }
 0x142   : > { %v3697_v5 = vpop.f32.mrf.mxu1  ;;  %v876_v6 = vadd.f32 %v875_v4, %v857_v49 }
 0x143   : > { %v3657_v26 = vpop.f32.mrf.mxu0 }
 0x144   : > { %v1820_v1 = vpop.f32.mrf.mxu1  ;;  %v1682_v53 = vadd.f32 %v3657_v26, %v4690_v41  ;;  %v877_v38 = vadd.f32 %v876_v6, %v860_v19 }
 0x145   : > { %v1626_v42 = vpop.f32.mrf.mxu0 }
 0x146   : > { %v3698_v50 = vpop.f32.mrf.mxu1  ;;  %v1681_v40 = vadd.f32 %v1626_v42, %v4692_v14  ;;  %v4802_v60 = vadd.f32 %v4710_v57, %v1682_v53  ;;  %v878_v44 = vadd.f32 %v877_v38, %v863_v52 }
 0x147   : > { %v3658_v51 = vpop.f32.mrf.mxu0 }
 0x148   : > { %v1823_v32 = vpop.f32.mrf.mxu1  ;;  %v4806_v55 = vadd.f32 %v4722_v56, %v1681_v40  ;;  %v879_v47 = vrot.slane %v878_v44, 4 }
 0x149   : > { %v1629_v35 = vpop.f32.mrf.mxu0 }
 0x14a   : > { %v3701_v41 = vpop.f32.mrf.mxu1  ;;  %v880_v59 = vadd.f32 %v879_v47, %v878_v44 }
 0x14b   : > { %v3661_v31 = vpop.f32.mrf.mxu0 }
 0x14c   : > { %v1834_v21 = vpop.f32.mrf.mxu1  ;;  %v1684_v33 = vadd.f32 %v3661_v31, %v1496_v46  ;;  %v881_v4 = vrot.slane %v880_v59, 2 }
 0x14d   : > { %v1640_v12 = vpop.f32.mrf.mxu0 }
 0x14e   : > { %v3702_v14 = vpop.f32.mrf.mxu1  ;;  %v1683_v57 = vadd.f32 %v1640_v12, %v1495_v0  ;;  %v4809_v49 = vadd.f32 %v4753_v8, %v1684_v33  ;;  %v882_v26 = vadd.f32 %v881_v4, %v880_v59 }
 0x14f   : > { %v3662_v43 = vpop.f32.mrf.mxu0 }
 0x150   : > { %v1837_v27 = vpop.f32.mrf.mxu1  ;;  %v4812_v56 = vadd.f32 %v4768_v7, %v1683_v57  ;;  %v883_v19 = vrot.slane %v882_v26, 1 }
 0x151   : > { %v1643_v6 = vpop.f32.mrf.mxu0 }
 0x152   : > { %v4814_v53 = vpop.f32.mrf.mxu1  ;;  %v884_v46 = vadd.f32 %v883_v19, %v882_v26 }
 0x153   : > { %v3665_v42 = vpop.f32.mrf.mxu0 }
 0x154   : > { %v4816_v50 = vpop.f32.mrf.mxu1  ;;  %v1686_v38 = vadd.f32 %v3665_v42, %v1498_v58  ;;  %v886_v52 = vmul.f32 0.015625, %v884_v46 }
 0x155   : > { %v1654_v40 = vpop.f32.mrf.mxu0 }
 0x156   : > { %v3754_v0 = vpop.f32.mrf.mxu1  ;;  %v4818_v8 = vadd.f32 %v3697_v5, %v1686_v38  ;;  %v1685_v51 = vadd.f32 %v1654_v40, %v1497_v34  ;;  %v4821_v7 = vsub.f32 %v4714_v9, %v886_v52  ;;  %v4824_v35 = vsub.f32 %v4716_v10, %v886_v52 }
 0x157   : > { %v3666_v32 = vpop.f32.mrf.mxu0  ;;  %v4827_v47 = vsub.f32 %v4718_v48, %v886_v52  ;;  %v4830_v31 = vsub.f32 %v4720_v2, %v886_v52  ;;  %v4835_v5 = vsub.f32 %v4727_v15, %v886_v52  ;;  %v4838_v34 = vsub.f32 %v4730_v16, %v886_v52 }
 0x158   : > { %v2143_v44 = vpop.f32.mrf.mxu1  ;;  %v903_v9 = vmul.f32 %v4821_v7, %v4821_v7  ;;  %v904_v10 = vmul.f32 %v4824_v35, %v4824_v35  ;;  %v4851_v14 = vadd.f32 %v1820_v1, %v1685_v51  ;;  %v4854_v16 = vsub.f32 %v4732_v54, %v886_v52 }
 0x159   : > { %v1657_v58 = vpop.f32.mrf.mxu0  ;;  %v905_v2 = vmul.f32 %v4827_v47, %v4827_v47  ;;  %v906_v12 = vmul.f32 %v4830_v31, %v4830_v31  ;;  %v4857_v43 = vsub.f32 %v4734_v37, %v886_v52  ;;  %v4860_v27 = vsub.f32 %v4738_v61, %v886_v52 }
 0x15a   : > { %v4832_v59 = vpop.f32.mrf.mxu1  ;;  %v4866_v19 = vsub.f32 %v4740_v63, %v886_v52  ;;  %v935_v54 = vrot.slane %v903_v9, 1  ;;  %v936_v1 = vrot.slane %v904_v10, 1  ;;  %v908_v37 = vmul.f32 %v4838_v34, %v4838_v34 }
 0x15b   : > { %v3669_v48 = vpop.f32.mrf.mxu0  ;;  %v938_v38 = vrot.slane %v905_v2, 1  ;;  %v939_v61 = vrot.slane %v906_v12, 1  ;;  %v4877_v63 = vsub.f32 %v4746_v39, %v886_v52  ;;  %v4880_v0 = vsub.f32 %v4755_v3, %v886_v52 }
 0x15c   : > { %v4844_v33 = vpop.f32.mrf.mxu1  ;;  %v1688_v15 = vadd.f32 %v3669_v48, %v4787_v20  ;;  %v907_v20 = vmul.f32 %v4835_v5, %v4835_v5  ;;  %v4883_v51 = vsub.f32 %v4757_v29, %v886_v52  ;;  %v909_v32 = vmul.f32 %v4854_v16, %v4854_v16 }
 0x15d   : > { %v1668_v4 = vpop.f32.mrf.mxu0  ;;  %v910_v44 = vmul.f32 %v4857_v43, %v4857_v43  ;;  %v4892_v9 = vsub.f32 %v4759_v62, %v886_v52  ;;  %v911_v39 = vmul.f32 %v4860_v27, %v4860_v27  ;;  %v912_v3 = vmul.f32 %v4866_v19, %v4866_v19 }
 0x15e   : > { %v3758_v57 = vpop.f32.mrf.mxu1  ;;  %v1687_v26 = vadd.f32 %v1668_v4, %v4790_v18  ;;  %v4863_v6 = vadd.f32 %v3701_v41, %v1688_v15  ;;  %v937_v29 = vsel %vm364_vm3, %v935_v54, %v936_v1  ;;  %v940_v48 = vsel %vm364_vm3, %v938_v38, %v939_v61 }
 0x15f   : > { %v3670_v42 = vpop.f32.mrf.mxu0  ;;  %v941_v2 = vrot.slane %v907_v20, 1  ;;  %v942_v12 = vrot.slane %v908_v37, 1  ;;  %v4902_v15 = vsub.f32 %v4761_v45, %v886_v52  ;;  %v4905_v62 = vsub.f32 %v4763_v36, %v886_v52 }
 0x160   : > { %v2157_v46 = vpop.f32.mrf.mxu1  ;;  %v4872_v40 = vadd.f32 %v1834_v21, %v1687_v26  ;;  %v913_v26 = vmul.f32 %v4877_v63, %v4877_v63  ;;  %v914_v54 = vmul.f32 %v4880_v0, %v4880_v0  ;;  %v944_v20 = vrot.slane %v909_v32, 1 }
 0x161   : > { %v1671_v18 = vpop.f32.mrf.mxu0  ;;  %v945_v42 = vrot.slane %v910_v44, 1  ;;  %v915_v36 = vmul.f32 %v4883_v51, %v4883_v51  ;;  %v916_v52 = vmul.f32 %v4892_v9, %v4892_v9  ;;  %v967_v37 = vadd.f32 %v940_v48, %v937_v29 }
 0x162   : > { %v4874_v41 = vpop.f32.mrf.mxu1  ;;  %v943_v61 = vsel %vm364_vm3, %v941_v2, %v942_v12  ;;  %v948_v18 = vrot.slane %v912_v3, 1  ;;  %v950_v32 = vrot.slane %v913_v26, 1  ;;  %v951_v44 = vrot.slane %v914_v54, 1 }
 0x163   : > { %v3721_v21 = vpop.f32.mrf.mxu0  ;;  %v946_v29 = vsel %vm364_vm3, %v944_v20, %v945_v42  ;;  %v953_v12 = vrot.slane %v915_v36, 1  ;;  %v954_v26 = vrot.slane %v916_v52, 1 }
 0x164   : > { %v4889_v58 = vpop.f32.mrf.mxu1  ;;  %v2028_v10 = vadd.f32 %v3721_v21, %v4802_v60 }
 0x165   : > { %v1972_v4 = vpop.f32.mrf.mxu0 }
 0x166   : > { %v3762_v57 = vpop.f32.mrf.mxu1  ;;  %v2027_v60 = vadd.f32 %v1972_v4, %v4806_v55  ;;  %v4913_v1 = vadd.f32 %v4814_v53, %v2028_v10  ;;  %v947_v55 = vrot.slane %v911_v39, 1  ;;  %v968_v10 = vadd.f32 %v967_v37, %v943_v61 }
 0x167   : > { %v3722_v45 = vpop.f32.mrf.mxu0  ;;  %v917_v4 = vmul.f32 %v4902_v15, %v4902_v15  ;;  %v918_v57 = vmul.f32 %v4905_v62, %v4905_v62 }
 0x168   : > { %v2171_v46 = vpop.f32.mrf.mxu1  ;;  %v4920_v38 = vadd.f32 %v4816_v50, %v2027_v60  ;;  %v969_v2 = vadd.f32 %v968_v10, %v946_v29  ;;  %v949_v3 = vsel %vm364_vm3, %v947_v55, %v948_v18  ;;  %v952_v45 = vsel %vm364_vm3, %v950_v32, %v951_v44 }
 0x169   : > { %v1975_v53 = vpop.f32.mrf.mxu0  ;;  %v956_v20 = vrot.slane %v917_v4, 1  ;;  %v957_v42 = vrot.slane %v918_v57, 1  ;;  %v955_v55 = vsel %vm364_vm3, %v953_v12, %v954_v26 }
 0x16a   : > { %v4923_v21 = vpop.f32.mrf.mxu1  ;;  %v970_v46 = vadd.f32 %v969_v2, %v949_v3 }
 0x16b   : > { %v3725_v50 = vpop.f32.mrf.mxu0  ;;  %v958_v29 = vsel %vm364_vm3, %v956_v20, %v957_v42 }
 0x16c   : > { %v4930_v48 = vpop.f32.mrf.mxu1  ;;  %v2030_v39 = vadd.f32 %v3725_v50, %v4809_v49  ;;  %v971_v10 = vadd.f32 %v970_v46, %v952_v45 }
 0x16d   : > { %v1986_v54 = vpop.f32.mrf.mxu0 }
 0x16e   : > { %v3766_v60 = vpop.f32.mrf.mxu1  ;;  %v2029_v37 = vadd.f32 %v1986_v54, %v4812_v56  ;;  %v2198_v61 = vadd.f32 %v4832_v59, %v2030_v39  ;;  %v972_v18 = vadd.f32 %v971_v10, %v955_v55 }
 0x16f   : > { %v3726_v53 = vpop.f32.mrf.mxu0 }
 0x170   : > { %v2185_v11 = vpop.f32.mrf.mxu1  ;;  %v2197_v49 = vadd.f32 %v4844_v33, %v2029_v37  ;;  %v973_v50 = vadd.f32 %v972_v18, %v958_v29 }
 0x171   : > { %v1989_v36 = vpop.f32.mrf.mxu0 }
 0x172   : > { %v3817_v52 = vpop.f32.mrf.mxu1  ;;  %v974_v59 = vrot.slane %v973_v50, 4 }
 0x173   : > { %v3729_v32 = vpop.f32.mrf.mxu0 }
 0x174   : > { %v2486_v44 = vpop.f32.mrf.mxu1  ;;  %v975_v39 = vadd.f32 %v974_v59, %v973_v50 }
 0x175   : > { %v2000_v56 = vpop.f32.mrf.mxu0 }
 0x176   : > { %v3818_v2 = vpop.f32.mrf.mxu1  ;;  %v976_v54 = vrot.slane %v975_v39, 2 }
 0x177   : > { %v3730_v4 = vpop.f32.mrf.mxu0 }
 0x178   : > { %v2489_v57 = vpop.f32.mrf.mxu1  ;;  %v977_v12 = vadd.f32 %v976_v54, %v975_v39 }
 0x179   : > { %v2003_v11 = vpop.f32.mrf.mxu0 }
 0x17a   : > { %v3821_v3 = vpop.f32.mrf.mxu1  ;;  %v978_v46 = vrot.slane %v977_v12, 1 }
 0x17b   : > { %v3733_v33 = vpop.f32.mrf.mxu0 }
 0x17c   : > { %v4940_v60 = vpop.f32.mrf.mxu1  ;;  %v979_v42 = vadd.f32 %v978_v46, %v977_v12  ;;  %v2031_v12 = vadd.f32 %v2000_v56, %v4851_v14  ;;  %v2034_v46 = vadd.f32 %v3733_v33, %v4863_v6 }
 0x17d   : > { %v2014_v26 = vpop.f32.mrf.mxu0 }
 0x17e   : > { %v3822_v45 = vpop.f32.mrf.mxu1  ;;  %v980_v55 = vmul.f32 0.015625, %v979_v42  ;;  %v2202_v14 = vadd.f32 %v4923_v21, %v2034_v46 }
 0x17f   : > { %v3734_v37 = vpop.f32.mrf.mxu0  ;;  %v2032_v45 = vadd.f32 %v3729_v32, %v4818_v8  ;;  %v2199_v8 = vadd.f32 %v4889_v58, %v2031_v12 }
 0x180   : > { %v2503_v20 = vpop.f32.mrf.mxu1  ;;  %v981_v29 = vadd.f32 1e-05, %v980_v55  ;;  %v2033_v37 = vadd.f32 %v2014_v26, %v4872_v40 }
 0x181   : > { %v2017_v53 = vpop.f32.mrf.mxu0 }
 0x182   : > { %v3825_v10 = vpop.f32.mrf.mxu1  ;;  %3999 = vrsqrt.f32 %v981_v29  ;;  %v4956_v6 = vadd.f32 %v4930_v48, %v2033_v37 }
 0x183   : > { %v3785_v36 = vpop.f32.mrf.mxu0 }
 0x184   : > { %v2514_v18 = vpop.f32.mrf.mxu1  ;;  %v2362_v53 = vadd.f32 %v3785_v36, %v4913_v1  ;;  %v4965_v1 = vld [vmem:[%s5114_s3] ss:$0 sm:$0xff] }
 0x185   : > { %v2306_v50 = vpop.f32.mrf.mxu0 }
 0x186   : > { %v3826_v2 = vpop.f32.mrf.mxu1  ;;  %v2361_v55 = vadd.f32 %v2306_v50, %v4920_v38  ;;  %v4967_v38 = vadd.f32 %v3817_v52, %v2362_v53 }
 0x187   : > { %v3786_v59 = vpop.f32.mrf.mxu0 }
 0x188   : > { %v2517_v4 = vpop.f32.mrf.mxu1 }
 0x189   : > { %v2309_v57 = vpop.f32.mrf.mxu0 }
 0x18a   : > { %v4942_v11 = vpop.f32.mrf.mxu1  ;;  %v2200_v57 = vadd.f32 %v4874_v41, %v2032_v45  ;;  %v4969_v41 = vadd.f32 %v2486_v44, %v2361_v55  ;;  %v4984_v44 = vld [vmem:[%s5115_s4] ss:$0 sm:$0xff] }
 0x18b   : > { %v3789_v39 = vpop.f32.mrf.mxu0 }
 0x18c   : > { %v4944_v54 = vpop.f32.mrf.mxu1  ;;  %v2364_v29 = vadd.f32 %v3789_v39, %v2198_v61 }
 0x18d   : > { %v2320_v20 = vpop.f32.mrf.mxu0 }
 0x18e   : > { %v3830_v42 = vpop.f32.mrf.mxu1  ;;  %v4960_v56 = vadd.f32 %v2320_v20, %v2197_v49  ;;  %v4971_v58 = vadd.f32 %v3821_v3, %v2364_v29 }
 0x18f   : > { %v3790_v2 = vpop.f32.mrf.mxu0  ;;  %v4958_v32 = vpop.eup %3999 }
 0x190   : > { %v2531_v59 = vpop.f32.mrf.mxu1  ;;  %v993_v48 = vmul.f32 %v4958_v32, %v4877_v63  ;;  %v994_v61 = vmul.f32 %v4958_v32, %v4880_v0  ;;  %v991_v49 = vmul.f32 %v4958_v32, %v4860_v27  ;;  %v992_v33 = vmul.f32 %v4958_v32, %v4866_v19 }
 0x191   : > { %v2323_v4 = vpop.f32.mrf.mxu0  ;;  %v985_v3 = vmul.f32 %v4958_v32, %v4827_v47  ;;  %v986_v63 = vmul.f32 %v4958_v32, %v4830_v31  ;;  %v983_v0 = vmul.f32 %v4958_v32, %v4821_v7 }
 0x192   : > { %v3857_v40 = vpop.f32.mrf.mxu1  ;;  %v1015_v36 = vmul.f32 %v4965_v1, %v993_v48  ;;  %v1016_v19 = vmul.f32 %v4965_v1, %v994_v61  ;;  %v1013_v50 = vmul.f32 %v4965_v1, %v991_v49  ;;  %v1014_v39 = vmul.f32 %v4965_v1, %v992_v33 }
 0x193   : > { %v3793_v21 = vpop.f32.mrf.mxu0  ;;  %v1007_v47 = vmul.f32 %v4965_v1, %v985_v3  ;;  %v1008_v37 = vmul.f32 %v4965_v1, %v986_v63  ;;  %v984_v3 = vmul.f32 %v4958_v32, %v4824_v35 }
 0x194   : > { %v2682_v26 = vpop.f32.mrf.mxu1  ;;  %v2366_v52 = vadd.f32 %v3793_v21, %v2200_v57  ;;  %v1037_v20 = vadd.f32 %v4984_v44, %v1015_v36  ;;  %v1038_v7 = vadd.f32 %v4984_v44, %v1016_v19  ;;  %v1035_v42 = vadd.f32 %v4984_v44, %v1013_v50 }
 0x195   : > { %v2334_v27 = vpop.f32.mrf.mxu0  ;;  %v1036_v53 = vadd.f32 %v4984_v44, %v1014_v39  ;;  %v1029_v59 = vadd.f32 %v4984_v44, %v1007_v47  ;;  %v997_v36 = vmul.f32 %v4958_v32, %v4902_v15  ;;  %v998_v47 = vmul.f32 %v4958_v32, %v4905_v62 }
 0x196   : > { %v3858_v45 = vpop.f32.mrf.mxu1  ;;  %v2365_v12 = vadd.f32 %v2334_v27, %v2199_v8  ;;  %v2546_v46 = vadd.f32 %v3825_v10, %v2366_v52  ;;  %v1030_v10 = vadd.f32 %v4984_v44, %v1008_v37  ;;  %v2748_v57 = vrot.slane %v1037_v20, 1 }
 0x197   : > { %v3794_v31 = vpop.f32.mrf.mxu0  ;;  %v2749_v8 = vrot.slane %v1038_v7, 1  ;;  %v2745_v21 = vrot.slane %v1035_v42, 1  ;;  %v2746_v48 = vrot.slane %v1036_v53, 1  ;;  %v2736_v33 = vrot.slane %v1029_v59, 1 }
 0x198   : > { %v2685_v55 = vpop.f32.mrf.mxu1  ;;  %v2714_v29 = vadd.f32 %v3857_v40, %v2546_v46  ;;  %v2545_v2 = vadd.f32 %v2514_v18, %v2365_v12  ;;  %v2737_v52 = vrot.slane %v1030_v10, 1  ;;  %v1005_v27 = vmul.f32 %v4965_v1, %v983_v0 }
 0x199   : > { %v2337_v4 = vpop.f32.mrf.mxu0  ;;  %v2750_v40 = vsel %vm364_vm3, %v2748_v57, %v2749_v8  ;;  %v2747_v18 = vsel %vm364_vm3, %v2745_v21, %v2746_v48  ;;  %v1006_v46 = vmul.f32 %v4965_v1, %v984_v3  ;;  %v1019_v37 = vmul.f32 %v4965_v1, %v997_v36 }
 0x19a   : > { %v3861_v61 = vpop.f32.mrf.mxu1  ;;  %v2713_v49 = vadd.f32 %v2682_v26, %v2545_v2  ;;  %v2770_v39 = vadd.f32 %v2750_v40, %v2714_v29  ;;  %v2738_v26 = vsel %vm364_vm3, %v2736_v33, %v2737_v52  ;;  %v1027_v35 = vadd.f32 %v4984_v44, %v1005_v27 }
 0x19b   : > { %v3797_v63 = vpop.f32.mrf.mxu0  ;;  %v1028_v42 = vadd.f32 %v4984_v44, %v1006_v46  ;;  %v1020_v55 = vmul.f32 %v4965_v1, %v998_v47  ;;  %v1041_v29 = vadd.f32 %v4984_v44, %v1019_v37  ;;  %v995_v59 = vmul.f32 %v4958_v32, %v4883_v51 }
 0x19c   : > { %v2696_v19 = vpop.f32.mrf.mxu1  ;;  %v2368_v50 = vadd.f32 %v3797_v63, %v2202_v14  ;;  %v2769_v45 = vadd.f32 %v2747_v18, %v2713_v49  ;;  %v3335_v15 = vmul.f32 -1.442695, %v2770_v39  ;;  %v2733_v53 = vrot.slane %v1027_v35, 1 }
 0x19d   : > { %v2348_v12 = vpop.f32.mrf.mxu0  ;;  %v1042_v4 = vadd.f32 %v4984_v44, %v1020_v55  ;;  %v2754_v57 = vrot.slane %v1041_v29, 1  ;;  %v1017_v8 = vmul.f32 %v4965_v1, %v995_v59  ;;  %v987_v52 = vmul.f32 %v4958_v32, %v4835_v5 }
 0x19e   : > { %v3862_v0 = vpop.f32.mrf.mxu1  ;;  %v2367_v31 = vadd.f32 %v2348_v12, %v4956_v6  ;;  %v3334_v20 = vmul.f32 -1.442695, %v2769_v45  ;;  %v2548_v14 = vadd.f32 %v4942_v11, %v2368_v50  ;;  %4001 = vpow2.f32 %v3335_v15 }
 0x19f   : > { %v3798_v7 = vpop.f32.mrf.mxu0  ;;  %v996_v6 = vmul.f32 %v4958_v32, %v4892_v9  ;;  %v2734_v11 = vrot.slane %v1028_v42, 1  ;;  %v2755_v33 = vrot.slane %v1042_v4, 1  ;;  %v990_v9 = vmul.f32 %v4958_v32, %v4857_v43 }
 0x1a0   : > { %v2699_v2 = vpop.f32.mrf.mxu1  ;;  %v2716_v62 = vadd.f32 %v3861_v61, %v2548_v14  ;;  %4003 = vpow2.f32 %v3334_v20  ;;  %v2547_v48 = vadd.f32 %v4944_v54, %v2367_v31  ;;  %v989_v61 = vmul.f32 %v4958_v32, %v4854_v16 }
 0x1a1   : > { %v2351_v10 = vpop.f32.mrf.mxu0  ;;  %v1018_v21 = vmul.f32 %v4965_v1, %v996_v6  ;;  %v2735_v51 = vsel %vm364_vm3, %v2733_v53, %v2734_v11  ;;  %v1039_v63 = vadd.f32 %v4984_v44, %v1017_v8  ;;  %v2756_v16 = vsel %vm364_vm3, %v2754_v57, %v2755_v33 }
 0x1a2   : > { %v2715_v54 = vadd.f32 %v2696_v19, %v2547_v48  ;;  %v1011_v27 = vmul.f32 %v4965_v1, %v989_v61  ;;  %v1012_v36 = vmul.f32 %v4965_v1, %v990_v9  ;;  %v988_v43 = vmul.f32 %v4958_v32, %v4838_v34 }
 0x1a3   : > { %v3849_v49 = vpop.f32.mrf.mxu0  ;;  %v1040_v40 = vadd.f32 %v4984_v44, %v1018_v21  ;;  %v2772_v39 = vadd.f32 %v2756_v16, %v2716_v62  ;;  %v1009_v35 = vmul.f32 %v4965_v1, %v987_v52  ;;  %v2543_v53 = vadd.f32 %v4940_v60, %v4960_v56 }
 0x1a4   : > { %v2710_v3 = vadd.f32 %v3849_v49, %v4967_v38  ;;  %v2751_v38 = vrot.slane %v1039_v63, 1  ;;  %v1033_v46 = vadd.f32 %v4984_v44, %v1011_v27  ;;  %v1034_v19 = vadd.f32 %v4984_v44, %v1012_v36 }
 0x1a5   : > { %v2654_v18 = vpop.f32.mrf.mxu0  ;;  %v2752_v12 = vrot.slane %v1040_v40, 1  ;;  %v3337_v0 = vmul.f32 -1.442695, %v2772_v39  ;;  %v1010_v31 = vmul.f32 %v4965_v1, %v988_v43  ;;  %v1031_v15 = vadd.f32 %v4984_v44, %v1009_v35 }
 0x1a6   : > { %v2766_v50 = vadd.f32 %v2738_v26, %v2710_v3  ;;  %v2709_v5 = vadd.f32 %v2654_v18, %v4969_v41  ;;  %v2742_v26 = vrot.slane %v1033_v46, 1  ;;  %v2743_v41 = vrot.slane %v1034_v19, 1 }
 0x1a7   : > { %v3850_v45 = vpop.f32.mrf.mxu0  ;;  %v2753_v34 = vsel %vm364_vm3, %v2751_v38, %v2752_v12  ;;  %v1032_v7 = vadd.f32 %v4984_v44, %v1010_v31  ;;  %v2739_v55 = vrot.slane %v1031_v15, 1 }
 0x1a8   : > { %v3331_v47 = vmul.f32 -1.442695, %v2766_v50  ;;  %v2765_v37 = vadd.f32 %v2735_v51, %v2709_v5  ;;  %v2771_v14 = vadd.f32 %v2753_v34, %v2715_v54  ;;  %v2744_v59 = vsel %vm364_vm3, %v2742_v26, %v2743_v41 }
 0x1a9   : > { %v2657_v32 = vpop.f32.mrf.mxu0  ;;  %v2740_v2 = vrot.slane %v1032_v7, 1 }
 0x1aa   : > { %4005 = vpow2.f32 %v3331_v47  ;;  %v3330_v20 = vmul.f32 -1.442695, %v2765_v37  ;;  %v3336_v1 = vmul.f32 -1.442695, %v2771_v14 }
 0x1ab   : > { %4007 = vpow2.f32 %v3337_v0  ;;  %v3853_v42 = vpop.f32.mrf.mxu0  ;;  %v4002_v62 = vpop.eup %4001  ;;  %v2741_v8 = vsel %vm364_vm3, %v2739_v55, %v2740_v2 }
 0x1ac   : > { %4009 = vpow2.f32 %v3330_v20  ;;  %v2712_v29 = vadd.f32 %v3853_v42, %v4971_v58  ;;  %v2802_v11 = vadd.f32 1.0, %v4002_v62 }
 0x1ad   : > { %v2668_v6 = vpop.f32.mrf.mxu0  ;;  %v4004_v10 = vpop.eup %4003  ;;  %4011 = vpow2.f32 %v3336_v1 }
 0x1ae   : > { %v2768_v4 = vadd.f32 %v2744_v59, %v2712_v29  ;;  %v2711_v44 = vadd.f32 %v2668_v6, %v2543_v53  ;;  %v2801_v57 = vadd.f32 1.0, %v4004_v10  ;;  %4013 = vrcp.f32 %v2802_v11 }
 0x1af   : > { %v3854_v21 = vpop.f32.mrf.mxu0 }
 0x1b0   : > { %v3333_v60 = vmul.f32 -1.442695, %v2768_v4  ;;  %v2767_v56 = vadd.f32 %v2741_v8, %v2711_v44  ;;  %4015 = vrcp.f32 %v2801_v57  ;;  %v5138_v8 = vld [vmem:[#allocation2_spill] sm:$0xff] }
 0x1b1   : > { %v2671_v48 = vpop.f32.mrf.mxu0 }
 0x1b2   : > { %4017 = vpow2.f32 %v3333_v60  ;;  %v3332_v58 = vmul.f32 -1.442695, %v2767_v56  ;;  %v5139_v60 = vld [vmem:[#allocation3_spill] sm:$0xff] }
 0x1b4   : > { %4019 = vpow2.f32 %v3332_v58 }
 0x1b7   : > { %v4006_v61 = vpop.eup %4005 }
 0x1b8   : > { %v4008_v49 = vpop.eup %4007  ;;  %v2798_v51 = vadd.f32 1.0, %v4006_v61 }
 0x1b9   : > { %v4010_v33 = vpop.eup %4009  ;;  %v2804_v9 = vadd.f32 1.0, %v4008_v49 }
 0x1ba   : > { %4021 = vrcp.f32 %v2798_v51  ;;  %v2797_v52 = vadd.f32 1.0, %v4010_v33  ;;  %v4012_v3 = vpop.eup %4011 }
 0x1bb   : > { %4023 = vrcp.f32 %v2804_v9  ;;  %v4014_v63 = vpop.eup %4013  ;;  %v2803_v18 = vadd.f32 1.0, %v4012_v3 }
 0x1bc   : > { %4025 = vrcp.f32 %v2797_v52  ;;  %v2834_v54 = vrot.slane %v4014_v63, 7 }
 0x1bd   : > { %v4016_v40 = vpop.eup %4015  ;;  %4027 = vrcp.f32 %v2803_v18 }
 0x1be   : > { %v2833_v27 = vrot.slane %v4016_v40, 7  ;;  %v2855_v36 = vmul.f32 %v2834_v54, %v4185_v24  ;;  %v2856_v43 = vmul.f32 %v2834_v54, %v4188_v25 }
 0x1bf   : > { %v4018_v16 = vpop.eup %4017 }
 0x1c0   : > { %v2800_v50 = vadd.f32 1.0, %v4018_v16  ;;  %v2853_v39 = vmul.f32 %v2833_v27, %v4179_v22  ;;  %v2854_v38 = vmul.f32 %v2833_v27, %v4182_v23  ;;  %v3367_v45 = vpack.c.bf16 %v2855_v36, %v2855_v36 }
 0x1c1   : > { %v4020_v5 = vpop.eup %4019  ;;  %v3368_v12 = vpack.c.bf16 %v2856_v43, %v2856_v43 }
 0x1c2   : > { %v2799_v46 = vadd.f32 1.0, %v4020_v5  ;;  %v3365_v19 = vpack.c.bf16 %v2853_v39, %v2853_v39  ;;  %v3366_v35 = vpack.c.bf16 %v2854_v38, %v2854_v38  ;;  %4029 = vrcp.f32 %v2800_v50 }
 0x1c3   : > { %v2983_v47 = vshrl.u32 %v3367_v45, 16  ;;  %v2986_v37 = vshll.u32 %v3367_v45, 16  ;;  %v2992_v24 = vshll.u32 %v3368_v12, 16 }
 0x1c4   : > { %4031 = vrcp.f32 %v2799_v46  ;;  %v2969_v0 = vshrl.u32 %v3365_v19, 16  ;;  %v2972_v25 = vshll.u32 %v3365_v19, 16  ;;  %v2978_v26 = vshll.u32 %v3366_v35, 16 }
 0x1c5   : > { %v2985_v31 = vrot.slane %v2983_v47, 4  ;;  %v2988_v22 = vrot.slane %v2986_v37, 5  ;;  %v2994_v42 = vrot.slane %v2992_v24, 5  ;;  %v5140_v37 = vld [vmem:[#allocation8_spill] sm:$0xff] }
 0x1c6   : > { %v2971_v23 = vrot.slane %v2969_v0, 4  ;;  %v2974_v32 = vrot.slane %v2972_v25, 5  ;;  %v2980_v6 = vrot.slane %v2978_v26, 5  ;;  %v5141_v0 = vld [vmem:[#allocation9_spill] sm:$0xff]  ;;  %v5143_v26 = vld [vmem:[#allocation7_spill] sm:$0xff] }
 0x1c7   : > { %v4022_v34 = vpop.eup %4021  ;;  %v2989_v15 = vor.u32 %v2988_v22, %v2985_v31 }
 0x1c8   : > { %v4024_v41 = vpop.eup %4023  ;;  %v2830_v20 = vrot.slane %v4022_v34, 7  ;;  %v2975_v53 = vor.u32 %v2974_v32, %v2971_v23  ;;  %v5142_v23 = vld [vmem:[#allocation6_spill] sm:$0xff] }
 0x1c9   : > { %v4026_v14 = vpop.eup %4025  ;;  %v2836_v55 = vrot.slane %v4024_v41, 7  ;;  %v2990_v1 = vrot.slane %v2989_v15, 4 }
 0x1ca   : > { %v2847_v29 = vmul.f32 %v2830_v20, %v4150_v13  ;;  %v2848_v2 = vmul.f32 %v2830_v20, %v4164_v17  ;;  %v2829_v62 = vrot.slane %v4026_v14, 7  ;;  %v2976_v59 = vrot.slane %v2975_v53, 4  ;;  %v4028_v49 = vpop.eup %4027 }
 0x1cb   : > { %v2859_v10 = vmul.f32 %v2836_v55, %v4197_v28  ;;  %v2860_v11 = vmul.f32 %v2836_v55, %v4203_v30  ;;  %v2995_v4 = vsel %vm5063_vm14, %v2990_v1, %v2994_v42  ;;  %v2835_v45 = vrot.slane %v4028_v49, 7  ;;  %v5144_v42 = vld [vmem:[#allocation4_spill] sm:$0xff] }
 0x1cc   : > { %v3359_v44 = vpack.c.bf16 %v2847_v29, %v2847_v29  ;;  %v3360_v57 = vpack.c.bf16 %v2848_v2, %v2848_v2  ;;  %v2845_v21 = vmul.f32 %v2829_v62, %v5138_v8  ;;  %3037 = vst [vmem:[%s5070_s20 + $0x14] sm:$0xf] %v2995_v4  ;;  %v2981_v13 = vsel %vm5063_vm14, %v2976_v59, %v2980_v6  ;;  %v5145_v6 = vld [vmem:[#allocation5_spill] sm:$0xff] }
 0x1cd   : > { %v2846_v17 = vmul.f32 %v2829_v62, %v5139_v60  ;;  %v3371_v56 = vpack.c.bf16 %v2859_v10, %v2859_v10  ;;  %v3372_v48 = vpack.c.bf16 %v2860_v11, %v2860_v11  ;;  %3036 = vst [vmem:[%s5070_s20 + $0x10] sm:$0xf] %v2981_v13  ;;  %v2857_v24 = vmul.f32 %v2835_v45, %v5140_v37 }
 0x1ce   : > { %v2927_v58 = vshrl.u32 %v3359_v44, 16  ;;  %v2930_v28 = vshll.u32 %v3359_v44, 16  ;;  %v2936_v61 = vshll.u32 %v3360_v57, 16  ;;  %v3357_v30 = vpack.c.bf16 %v2845_v21, %v2845_v21 }
 0x1cf   : > { %v3358_v51 = vpack.c.bf16 %v2846_v17, %v2846_v17  ;;  %v3011_v33 = vshrl.u32 %v3371_v56, 16  ;;  %v3014_v9 = vshll.u32 %v3371_v56, 16  ;;  %v3020_v52 = vshll.u32 %v3372_v48, 16  ;;  %v4030_v3 = vpop.eup %4029 }
 0x1d0   : > { %v2929_v63 = vrot.slane %v2927_v58, 4  ;;  %v2932_v40 = vrot.slane %v2930_v28, 5  ;;  %v2938_v54 = vrot.slane %v2936_v61, 5  ;;  %v2913_v18 = vshrl.u32 %v3357_v30, 16 }
 0x1d1   : > { %v4032_v16 = vpop.eup %4031  ;;  %v2916_v27 = vshll.u32 %v3357_v30, 16  ;;  %v2922_v36 = vshll.u32 %v3358_v51, 16  ;;  %v3013_v43 = vrot.slane %v3011_v33, 4  ;;  %v3016_v50 = vrot.slane %v3014_v9, 5 }
 0x1d2   : > { %v2933_v5 = vor.u32 %v2932_v40, %v2929_v63  ;;  %v2915_v39 = vrot.slane %v2913_v18, 4  ;;  %v3022_v38 = vrot.slane %v3020_v52, 5  ;;  %v2832_v35 = vrot.slane %v4030_v3, 7 }
 0x1d3   : > { %v2918_v12 = vrot.slane %v2916_v27, 5  ;;  %v2924_v46 = vrot.slane %v2922_v36, 5  ;;  %v3017_v19 = vor.u32 %v3016_v50, %v3013_v43  ;;  %v2858_v25 = vmul.f32 %v2835_v45, %v5141_v0 }
 0x1d4   : > { %v2934_v47 = vrot.slane %v2933_v5, 4  ;;  %v2831_v31 = vrot.slane %v4032_v16, 7  ;;  %v2851_v32 = vmul.f32 %v2832_v35, %v5142_v23  ;;  %v2852_v41 = vmul.f32 %v2832_v35, %v5143_v26 }
 0x1d5   : > { %v2919_v22 = vor.u32 %v2918_v12, %v2915_v39  ;;  %v3018_v34 = vrot.slane %v3017_v19, 4  ;;  %v3369_v20 = vpack.c.bf16 %v2857_v24, %v2857_v24  ;;  %v3370_v14 = vpack.c.bf16 %v2858_v25, %v2858_v25 }
 0x1d6   : > { %v2939_v15 = vsel %vm5063_vm14, %v2934_v47, %v2938_v54  ;;  %v2849_v53 = vmul.f32 %v2831_v31, %v5144_v42  ;;  %v3363_v29 = vpack.c.bf16 %v2851_v32, %v2851_v32  ;;  %v3364_v2 = vpack.c.bf16 %v2852_v41, %v2852_v41 }
 0x1d7   : > { %3033 = vst [vmem:[%s5070_s20 + $0x4] sm:$0xf] %v2939_v15  ;;  %v2920_v55 = vrot.slane %v2919_v22, 4  ;;  %v3023_v1 = vsel %vm5063_vm14, %v3018_v34, %v3022_v38  ;;  %v2997_v62 = vshrl.u32 %v3369_v20, 16  ;;  %v3000_v59 = vshll.u32 %v3369_v20, 16 }
 0x1d8   : > { %3039 = vst [vmem:[%s5070_s20 + $0x1c] sm:$0xf] %v3023_v1  ;;  %v2850_v10 = vmul.f32 %v2831_v31, %v5145_v6  ;;  %v3006_v4 = vshll.u32 %v3370_v14, 16  ;;  %v2955_v44 = vshrl.u32 %v3363_v29, 16  ;;  %v2958_v57 = vshll.u32 %v3363_v29, 16 }
 0x1d9   : > { %v2925_v11 = vsel %vm5063_vm14, %v2920_v55, %v2924_v46  ;;  %v2999_v8 = vrot.slane %v2997_v62, 4  ;;  %v3002_v21 = vrot.slane %v3000_v59, 5  ;;  %v3361_v13 = vpack.c.bf16 %v2849_v53, %v2849_v53 }
 0x1da   : > { %3032 = vst [vmem:[%s5070_s20] sm:$0xf] %v2925_v11  ;;  %v2957_v60 = vrot.slane %v2955_v44, 4  ;;  %v2960_v17 = vrot.slane %v2958_v57, 5  ;;  %v2964_v56 = vshll.u32 %v3364_v2, 16  ;;  %v3362_v48 = vpack.c.bf16 %v2850_v10, %v2850_v10 }
 0x1db   : > { %v3003_v58 = vor.u32 %v3002_v21, %v2999_v8  ;;  %v2941_v28 = vshrl.u32 %v3361_v13, 16  ;;  %v2944_v61 = vshll.u32 %v3361_v13, 16  ;;  %v3008_v30 = vrot.slane %v3006_v4, 5 }
 0x1dc   : > { %v2961_v49 = vor.u32 %v2960_v17, %v2957_v60  ;;  %v2950_v52 = vshll.u32 %v3362_v48, 16  ;;  %v2966_v63 = vrot.slane %v2964_v56, 5 }
 0x1dd   : > { %v3004_v51 = vrot.slane %v3003_v58, 4  ;;  %v2943_v33 = vrot.slane %v2941_v28, 4  ;;  %v2946_v9 = vrot.slane %v2944_v61, 5 }
 0x1de   : > { %v2962_v3 = vrot.slane %v2961_v49, 4  ;;  %v2952_v27 = vrot.slane %v2950_v52, 5 }
 0x1df   : > { %v3009_v40 = vsel %vm5063_vm14, %v3004_v51, %v3008_v30  ;;  %v2947_v54 = vor.u32 %v2946_v9, %v2943_v33 }
 0x1e0   : > { %3038 = vst [vmem:[%s5070_s20 + $0x18] sm:$0xf] %v3009_v40  ;;  %v2967_v18 = vsel %vm5063_vm14, %v2962_v3, %v2966_v63 }
 0x1e1   : > { %3035 = vst [vmem:[%s5070_s20 + $0xc] sm:$0xf] %v2967_v18  ;;  %v2948_v16 = vrot.slane %v2947_v54, 4 }
 0x1e3   : > { %v2953_v36 = vsel %vm5063_vm14, %v2948_v16, %v2952_v27 }
 0x1e4   : > { %3034 = vst [vmem:[%s5070_s20 + $0x8] sm:$0xf] %v2953_v36 }
 0x1e5 PF: > { %s18_s27 = sadd.s32 1, %s4039_s27  }
 0x1e6   : > { %p15_p4 = scmp.ge.s32.totalorder %s18_s27, 4  }
 0x1e8   :  { %17 = sbr.rel (!%p15_p4) target bundleno = 1 (0x1), region = 90 }

</bundles_post_ra>
